<compile_context>
chip_gen: v6e
topology: v6e:2x2x1
jax: 0.10.0
libtpu: 0.0.40
codegen_flags: <defaults>
</compile_context>

<pallas_src>
import jax
import jax.numpy as jnp
from jax import lax
from jax.experimental import pallas as pl
from jax.experimental.pallas import tpu as pltpu

N_PIECES = 20
NEG_FILL = -99999.0
_CH = 8                # sort-position chunk: bounds the live 4-D working set
_UNROLL_CHUNKS = 4     # <= this many chunks -> Python-unrolled, else fori_loop


def _tree_sum(terms):
    """Pairwise-tree sum of equal-shaped arrays (log-depth, fills VALU slots)."""
    while len(terms) > 1:
        nxt = [terms[i] + terms[i + 1] for i in range(0, len(terms) - 1, 2)]
        if len(terms) % 2:
            nxt.append(terms[-1])
        terms = nxt
    return terms[0]


# ------------------------- fused conv + FSPool + MLP kernel -------------------------
def blp_kernel(x2d_ref,            # (Bt*S, C_in)   conv input, rows = (b, s) row-major
               negadd_ref,         # (Bt, S, dim)   (1 - mask) * NEG_FILL (pre-broadcast)
               wm_ref,             # (Bt, S, dim)   piecewise-linear weight * mask
               scal_ref,           # (1, S, 1, 1)   sort scaling  S + 1 - 2*(i+1)
               w1t_ref, b1_ref,    # (C_in, dim), (1, dim)
               w2t_ref, b2_ref,    # (dim, dim),  (1, dim)
               lw1t_ref, lb1_ref,  # (dim, dim),  (1, dim)
               wf_ref, bf_ref,     # (dim, 1),    (1, 1)    lw2/classifier folded
               out_ref):           # (1, Bt, 1)
    f32 = jnp.float32
    Bt, S, dim = negadd_ref.shape

    # ---- 1x1 convs as two single 2-D MXU matmuls over M = Bt*S rows ----------------
    h = jnp.dot(x2d_ref[...], w1t_ref[...], preferred_element_type=f32) + b1_ref[...]
    h = jnp.maximum(h, 0.0)
    y = jnp.dot(h, w2t_ref[...], preferred_element_type=f32) + b2_ref[...]   # (Bt*S, dim)

    # mask padded set positions before the relaxed sort (S % 8 == 0 -> aligned reshape)
    z = y.reshape(Bt, S, dim) + negadd_ref[...]                              # (Bt, S, dim)

    # ---- rowsum[b, j, d] = sum_k |z[b, j, d] - z[b, k, d]|  (grouped pairwise tree)
    groups = []
    for g0 in range(0, S, _CH):
        terms = [jnp.abs(z - z[:, k:k + 1, :]) for k in range(g0, min(g0 + _CH, S))]
        groups.append(_tree_sum(terms))
    rowsum = _tree_sum(groups)                                               # (Bt, S, dim)

    z4 = z[:, None, :, :]                                                    # (Bt, 1, S, dim)
    r4 = rowsum[:, None, :, :]

    # ---- relaxed (neural) sort fused with the weighted pooling, chunked over i ------
    def chunk_contrib(i0, ch, pooled):
        scal_c = scal_ref[:, pl.ds(i0, ch), :, :]                  # (1, ch, 1, 1)
        logits = scal_c * z4 - r4                                  # (Bt, ch, S, dim)
        m = jnp.max(logits, axis=2, keepdims=True)                 # (Bt, ch, 1, dim)
        p = jnp.exp(logits - m)
        denom = jnp.sum(p, axis=2)                                 # (Bt, ch, dim)
        num = jnp.sum(p * z4, axis=2)                              # (Bt, ch, dim)
        xs = num * pl.reciprocal(denom, approx=True)               # sorted values
        wm_c = wm_ref[:, pl.ds(i0, ch), :]                         # (Bt, ch, dim)
        return pooled + jnp.sum(wm_c * xs, axis=1)                 # (Bt, dim)

    n_chunks = S // _CH
    pooled = jnp.zeros((Bt, dim), f32)
    if n_chunks <= _UNROLL_CHUNKS:
        for c in range(n_chunks):
            pooled = chunk_contrib(c * _CH, _CH, pooled)
    else:
        def body(c, acc):
            return chunk_contrib(pl.multiple_of(c * _CH, _CH), _CH, acc)
        pooled = lax.fori_loop(0, n_chunks, body, pooled, unroll=2)
    rem = S - n_chunks * _CH
    if rem:                                                        # (never hit when S % 8 == 0)
        pooled = chunk_contrib(n_chunks * _CH, rem, pooled)

    # ---- fused tail: Linear -> ReLU -> (Linear . classifier) epilogue ---------------
    t = jnp.dot(pooled, lw1t_ref[...], preferred_element_type=f32) + lb1_ref[...]
    t = jnp.maximum(t, 0.0)
    out_ref[0] = jnp.dot(t, wf_ref[...], preferred_element_type=f32) + bf_ref[...]


# ------------------------------------ wrapper ----------------------------------------
def blp_forward(U, V, n_points_U, n_points_V, params, *, block_b=None):
    """Pallas implementation of BLP_.forward((U, V, n_points_U, n_points_V))."""
    f32 = jnp.float32
    U = U.astype(f32)
    V = V.astype(f32)
    B, C_in = U.shape[0], U.shape[1]

    # Fold the U/V concat into the NCL -> (B, S, C) layout change (single XLA pass).
    x = jnp.concatenate(
        [jnp.transpose(U, (0, 2, 1)), jnp.transpose(V, (0, 2, 1))], axis=1)   # (B, S, C_in)
    S = x.shape[1]
    # TODO(synk): support S % 8 != 0 (needs an unaligned in-kernel reshape or a batched
    # matmul fallback); the relaxed sort depends on S, so the set axis cannot be padded.
    assert S % 8 == 0 and S >= 8, f"total set size {S} must be a multiple of 8"

    n = (n_points_U + n_points_V).astype(f32)                                 # (B,)
    dim = params["w1"].shape[0]
    out_ch = params["lw2"].shape[0]

    # ---- FSPool mask / piecewise-linear weights (hoisted out of the kernel) ---------
    pos = jnp.arange(S, dtype=f32)[None, :]                                   # (1, S)
    den = jnp.maximum(n - 1.0, 1.0)[:, None]                                  # (B, 1)
    ratios_raw = pos / den
    mask = (ratios_raw <= 1.0).astype(f32)                                    # (B, S)
    ratios = jnp.minimum(ratios_raw, 1.0)
    index = float(N_PIECES) * ratios
    idx = jnp.floor(index).astype(jnp.int32)
    frac = index - jnp.floor(index)
    pw = params["pw"]                                                         # (dim, 21)
    left = pw[:, idx]                                                         # (dim, B, S)
    right = pw[:, jnp.minimum(idx + 1, N_PIECES)]
    w_pw = (1.0 - frac)[None] * left + frac[None] * right                     # (dim, B, S)
    wm = jnp.transpose(w_pw * mask[None], (1, 2, 0))                          # (B, S, dim)
    negadd = jnp.broadcast_to(((1.0 - mask) * NEG_FILL)[:, :, None], (B, S, dim))
    scal = (float(S + 1) - 2.0 * (jnp.arange(S, dtype=f32) + 1.0)).reshape(1, S, 1, 1)

    # ---- per-generation batch blocking + VMEM budget ---------------------------------
    try:
        kind = jax.devices()[0].device_kind.lower()
    except Exception:
        kind = ""
    two_cores = "v7" in kind                        # v7x: 2 TensorCores, 64 MiB VMEM
    vmem_budget = (20 if two_cores else 48) << 20   # bytes of block-resident data
    vmem_limit = (32 if two_cores else 64) << 20

    if block_b is None:
        bytes_per_b = 4 * (
            2 * 2 * S * (C_in + 2 * dim)     # double-buffered x / negadd / wm blocks (+margin)
            + 4 * _CH * S * dim              # chunked softmax intermediates
            + 10 * S * dim                   # z / rowsum / tree terms
        )
        block_b = max(1, min(B, vmem_budget // max(1, bytes_per_b)))
        if two_cores and B >= 2 and (-(-B // block_b)) < 2:
            block_b = -(-B // 2)             # make G >= 2 so both TensorCores get work
    Bt = int(block_b)
    G = -(-B // Bt)
    Bp = G * Bt
    if Bp != B:                              # pad ragged batch (padded rows sliced off)
        pad = Bp - B
        x = jnp.pad(x, ((0, pad), (0, 0), (0, 0)))
        negadd = jnp.pad(negadd, ((0, pad), (0, 0), (0, 0)))
        wm = jnp.pad(wm, ((0, pad), (0, 0), (0, 0)))
    x2d = x.reshape(Bp * S, C_in)            # rows = (b, s) row-major -> single MXU matmul

    # ---- weight prep: transposes + exact lw2/classifier fold -------------------------
    w1t = params["w1"].T                                   # (C_in, dim)
    b1 = params["b1"].reshape(1, dim)
    w2t = params["w2"].T                                   # (dim, dim)
    b2 = params["b2"].reshape(1, dim)
    lw1t = params["lw1"].T                                 # (dim, dim)
    lb1 = params["lb1"].reshape(1, dim)
    wf = params["lw2"].T @ params["cw"].T                  # (dim, 1)
    bf = params["lb2"].reshape(1, out_ch) @ params["cw"].T + params["cb"].reshape(1, 1)

    out = pl.pallas_call(
        blp_kernel,
        out_shape=jax.ShapeDtypeStruct((G, Bt, 1), f32),
        grid=(G,),
        in_specs=[
            pl.BlockSpec((Bt * S, C_in), lambda i: (i, 0)),
            pl.BlockSpec((Bt, S, dim), lambda i: (i, 0, 0)),
            pl.BlockSpec((Bt, S, dim), lambda i: (i, 0, 0)),
            pl.BlockSpec((1, S, 1, 1), lambda i: (0, 0, 0, 0)),
            pl.BlockSpec((C_in, dim), lambda i: (0, 0)),
            pl.BlockSpec((1, dim), lambda i: (0, 0)),
            pl.BlockSpec((dim, dim), lambda i: (0, 0)),
            pl.BlockSpec((1, dim), lambda i: (0, 0)),
            pl.BlockSpec((dim, dim), lambda i: (0, 0)),
            pl.BlockSpec((1, dim), lambda i: (0, 0)),
            pl.BlockSpec((dim, 1), lambda i: (0, 0)),
            pl.BlockSpec((1, 1), lambda i: (0, 0)),
        ],
        out_specs=pl.BlockSpec((1, Bt, 1), lambda i: (i, 0, 0)),
        compiler_params=pltpu.CompilerParams(
            dimension_semantics=("parallel",),
            vmem_limit_bytes=vmem_limit),
    )(x2d, negadd, wm, scal, w1t, b1, w2t, b2, lw1t, lb1, wf, bf)

    return out.reshape(Bp, 1)[:B]                          # (B, 1)


# ------------------------------ plain-JAX reference ----------------------------------
def reference_forward(U, V, n_points_U, n_points_V, p):
    hp = lax.Precision.HIGHEST
    x = jnp.concatenate([U, V], axis=2).astype(jnp.float32)
    n = (n_points_U + n_points_V).astype(jnp.float32)
    B, C, S = x.shape
    dim = p["w1"].shape[0]

    y = jnp.einsum("dc,bcs->bds", p["w1"], x, precision=hp) + p["b1"][None]
    y = jnp.maximum(y, 0.0)
    y = jnp.einsum("dc,bcs->bds", p["w2"], y, precision=hp) + p["b2"][None]

    pos = jnp.arange(S, dtype=jnp.float32)[None, :]
    denom = jnp.maximum(n - 1.0, 1.0)[:, None]
    ratios_raw = pos / denom
    mask = (ratios_raw <= 1.0).astype(jnp.float32)[:, None, :]           # (B,1,S)
    ratios = jnp.minimum(ratios_raw, 1.0)

    index = float(N_PIECES) * ratios
    idx = jnp.floor(index).astype(jnp.int32)
    frac = index - jnp.floor(index)
    left = jnp.transpose(p["pw"][:, idx], (1, 0, 2))                     # (B,dim,S)
    right = jnp.transpose(p["pw"][:, jnp.minimum(idx + 1, N_PIECES)], (1, 0, 2))
    w_pw = (1.0 - frac)[:, None, :] * left + frac[:, None, :] * right

    z = y + (1.0 - mask) * NEG_FILL                                      # (B,dim,S)
    s = z.reshape(B * dim, S, 1)
    A = jnp.abs(s - jnp.transpose(s, (0, 2, 1)))                         # (BD,S,S)
    rowsum = jnp.sum(A, axis=2)                                          # (BD,S)
    scaling = (S + 1 - 2 * (jnp.arange(S) + 1)).astype(jnp.float32)
    Cm = s * scaling[None, None, :]                                      # C[m,i,j]=s[m,i]*scal[j]
    P_max = jnp.transpose(Cm - rowsum[:, :, None], (0, 2, 1))
    P_hat = jax.nn.softmax(P_max, axis=-1)
    xs = jnp.einsum("mij,mj->mi", P_hat, s[:, :, 0], precision=hp).reshape(B, dim, S)

    pooled = jnp.sum(xs * w_pw * mask, axis=2)                           # (B,dim)

    h = jnp.maximum(pooled @ p["lw1"].T + p["lb1"][:, 0], 0.0)
    o = h @ p["lw2"].T + p["lb2"][:, 0]
    return o @ p["cw"].T + p["cb"][:, 0]                                 # (B,1)


def init_params(key, c_in, dim, out_ch):
    ks = jax.random.split(key, 12)
    r = lambda k, shape, s: (s * jax.random.normal(k, shape)).astype(jnp.float32)
    return dict(
        w1=r(ks[0], (dim, c_in), c_in ** -0.5), b1=r(ks[1], (dim, 1), 0.1),
        w2=r(ks[2], (dim, dim), dim ** -0.5),   b2=r(ks[3], (dim, 1), 0.1),
        pw=r(ks[4], (dim, N_PIECES + 1), 1.0),            # FSPool: normal_ init
        lw1=r(ks[5], (dim, dim), dim ** -0.5),  lb1=r(ks[6], (dim, 1), 0.1),
        lw2=r(ks[7], (out_ch, dim), dim ** -0.5), lb2=r(ks[8], (out_ch, 1), 0.1),
        cw=r(ks[9], (1, out_ch), out_ch ** -0.5), cb=r(ks[10], (1, 1), 0.1),
    )


if __name__ == "__main__":
    key = jax.random.PRNGKey(0)
    B, C_in, dim, out_ch = 2, 4, 32, 8
    S_U, S_V = 8, 8

    k_u, k_v, k_p = jax.random.split(key, 3)
    U = jax.random.normal(k_u, (B, C_in, S_U), jnp.float32)
    V = jax.random.normal(k_v, (B, C_in, S_V), jnp.float32)
    n_points_U = jnp.array([8, 6], jnp.int32)
    n_points_V = jnp.array([8, 5], jnp.int32)   # batch 0: full set, batch 1: padded set

    params = init_params(k_p, C_in, dim, out_ch)

    out = blp_forward(U, V, n_points_U, n_points_V, params)
    out = jax.block_until_ready(out)

    ref = reference_forward(U, V, n_points_U, n_points_V, params)

    assert out.shape == (B, 1), out.shape
    assert bool(jnp.all(jnp.isfinite(out)))
    assert jnp.allclose(out, ref, rtol=5e-2, atol=5e-2), (out, ref)

    print("KERNEL_OK")
</pallas_src>

<mosaic_0001>
module attributes {stable_mosaic.version = 11 : i64} {
  func.func @blp_kernel(%arg0: i32, %arg1: memref<32x4xf32, #tpu.memory_space<vmem>>, %arg2: memref<2x16x32xf32, #tpu.memory_space<vmem>>, %arg3: memref<2x16x32xf32, #tpu.memory_space<vmem>>, %arg4: memref<1x16x1x1xf32, #tpu.memory_space<vmem>>, %arg5: memref<4x32xf32, #tpu.memory_space<vmem>>, %arg6: memref<1x32xf32, #tpu.memory_space<vmem>>, %arg7: memref<32x32xf32, #tpu.memory_space<vmem>>, %arg8: memref<1x32xf32, #tpu.memory_space<vmem>>, %arg9: memref<32x32xf32, #tpu.memory_space<vmem>>, %arg10: memref<1x32xf32, #tpu.memory_space<vmem>>, %arg11: memref<32x1xf32, #tpu.memory_space<vmem>>, %arg12: memref<1x1xf32, #tpu.memory_space<vmem>>, %arg13: memref<1x2x1xf32, #tpu.memory_space<vmem>>) attributes {dimension_semantics = [#tpu.dimension_semantics<parallel>], iteration_bounds = array<i64: 1>, scalar_prefetch = 0 : i64, scratch_operands = 0 : i64, tpu.core_type = #tpu.core_type<tc>, window_params = [{transform_indices = @transform_0, window_bounds = array<i64: 32, 4>}, {transform_indices = @transform_1, window_bounds = array<i64: 2, 16, 32>}, {transform_indices = @transform_2, window_bounds = array<i64: 2, 16, 32>}, {pipeline_mode = #tpu.pipeline_mode<synchronous>, transform_indices = @transform_3, window_bounds = array<i64: 1, 16, 1, 1>}, {pipeline_mode = #tpu.pipeline_mode<synchronous>, transform_indices = @transform_4, window_bounds = array<i64: 4, 32>}, {pipeline_mode = #tpu.pipeline_mode<synchronous>, transform_indices = @transform_5, window_bounds = array<i64: 1, 32>}, {pipeline_mode = #tpu.pipeline_mode<synchronous>, transform_indices = @transform_6, window_bounds = array<i64: 32, 32>}, {pipeline_mode = #tpu.pipeline_mode<synchronous>, transform_indices = @transform_7, window_bounds = array<i64: 1, 32>}, {pipeline_mode = #tpu.pipeline_mode<synchronous>, transform_indices = @transform_8, window_bounds = array<i64: 32, 32>}, {pipeline_mode = #tpu.pipeline_mode<synchronous>, transform_indices = @transform_9, window_bounds = array<i64: 1, 32>}, {pipeline_mode = #tpu.pipeline_mode<synchronous>, transform_indices = @transform_10, window_bounds = array<i64: 32, 1>}, {pipeline_mode = #tpu.pipeline_mode<synchronous>, transform_indices = @transform_11, window_bounds = array<i64: 1, 1>}, {transform_indices = @transform_12, window_bounds = array<i64: 1, 2, 1>}]} {
    %c0 = arith.constant 0 : index
    %c0_0 = arith.constant 0 : index
    %0 = vector.load %arg1[%c0, %c0_0] : memref<32x4xf32, #tpu.memory_space<vmem>>, vector<32x4xf32>
    %c0_1 = arith.constant 0 : index
    %c0_2 = arith.constant 0 : index
    %1 = vector.load %arg5[%c0_1, %c0_2] : memref<4x32xf32, #tpu.memory_space<vmem>>, vector<4x32xf32>
    %cst = arith.constant dense<0.000000e+00> : vector<32x32xf32>
    %2 = tpu.matmul %0, %1, %cst {dimension_numbers = #tpu.dot_dimension_numbers<[1], [0], [0], [1], [0, 0, 1, 1], [], []>} : vector<32x4xf32>, vector<4x32xf32>, vector<32x32xf32> -> vector<32x32xf32>
    %c0_3 = arith.constant 0 : index
    %c0_4 = arith.constant 0 : index
    %3 = vector.load %arg6[%c0_3, %c0_4] : memref<1x32xf32, #tpu.memory_space<vmem>>, vector<1x32xf32>
    %4 = vector.broadcast %3 : vector<1x32xf32> to vector<32x32xf32>
    %5 = arith.addf %2, %4 : vector<32x32xf32>
    %cst_5 = arith.constant 0.000000e+00 : f32
    %6 = vector.broadcast %cst_5 : f32 to vector<32x32xf32>
    %7 = arith.maximumf %5, %6 : vector<32x32xf32>
    %c0_6 = arith.constant 0 : index
    %c0_7 = arith.constant 0 : index
    %8 = vector.load %arg7[%c0_6, %c0_7] : memref<32x32xf32, #tpu.memory_space<vmem>>, vector<32x32xf32>
    %cst_8 = arith.constant dense<0.000000e+00> : vector<32x32xf32>
    %9 = tpu.matmul %7, %8, %cst_8 {dimension_numbers = #tpu.dot_dimension_numbers<[1], [0], [0], [1], [0, 0, 1, 1], [], []>} : vector<32x32xf32>, vector<32x32xf32>, vector<32x32xf32> -> vector<32x32xf32>
    %c0_9 = arith.constant 0 : index
    %c0_10 = arith.constant 0 : index
    %10 = vector.load %arg8[%c0_9, %c0_10] : memref<1x32xf32, #tpu.memory_space<vmem>>, vector<1x32xf32>
    %11 = vector.broadcast %10 : vector<1x32xf32> to vector<32x32xf32>
    %12 = arith.addf %9, %11 : vector<32x32xf32>
    %13 = vector.shape_cast %12 : vector<32x32xf32> to vector<2x16x32xf32>
    %c0_11 = arith.constant 0 : index
    %c0_12 = arith.constant 0 : index
    %c0_13 = arith.constant 0 : index
    %14 = vector.load %arg2[%c0_11, %c0_12, %c0_13] : memref<2x16x32xf32, #tpu.memory_space<vmem>>, vector<2x16x32xf32>
    %15 = arith.addf %13, %14 : vector<2x16x32xf32>
    %16 = vector.extract_strided_slice %15 {offsets = [0, 0, 0], sizes = [2, 1, 32], strides = [1, 1, 1]} : vector<2x16x32xf32> to vector<2x1x32xf32>
    %17 = vector.broadcast %16 : vector<2x1x32xf32> to vector<2x16x32xf32>
    %18 = arith.subf %15, %17 : vector<2x16x32xf32>
    %19 = math.absf %18 : vector<2x16x32xf32>
    %20 = vector.extract_strided_slice %15 {offsets = [0, 1, 0], sizes = [2, 1, 32], strides = [1, 1, 1]} : vector<2x16x32xf32> to vector<2x1x32xf32>
    %21 = vector.broadcast %20 : vector<2x1x32xf32> to vector<2x16x32xf32>
    %22 = arith.subf %15, %21 : vector<2x16x32xf32>
    %23 = math.absf %22 : vector<2x16x32xf32>
    %24 = vector.extract_strided_slice %15 {offsets = [0, 2, 0], sizes = [2, 1, 32], strides = [1, 1, 1]} : vector<2x16x32xf32> to vector<2x1x32xf32>
    %25 = vector.broadcast %24 : vector<2x1x32xf32> to vector<2x16x32xf32>
    %26 = arith.subf %15, %25 : vector<2x16x32xf32>
    %27 = math.absf %26 : vector<2x16x32xf32>
    %28 = vector.extract_strided_slice %15 {offsets = [0, 3, 0], sizes = [2, 1, 32], strides = [1, 1, 1]} : vector<2x16x32xf32> to vector<2x1x32xf32>
    %29 = vector.broadcast %28 : vector<2x1x32xf32> to vector<2x16x32xf32>
    %30 = arith.subf %15, %29 : vector<2x16x32xf32>
    %31 = math.absf %30 : vector<2x16x32xf32>
    %32 = vector.extract_strided_slice %15 {offsets = [0, 4, 0], sizes = [2, 1, 32], strides = [1, 1, 1]} : vector<2x16x32xf32> to vector<2x1x32xf32>
    %33 = vector.broadcast %32 : vector<2x1x32xf32> to vector<2x16x32xf32>
    %34 = arith.subf %15, %33 : vector<2x16x32xf32>
    %35 = math.absf %34 : vector<2x16x32xf32>
    %36 = vector.extract_strided_slice %15 {offsets = [0, 5, 0], sizes = [2, 1, 32], strides = [1, 1, 1]} : vector<2x16x32xf32> to vector<2x1x32xf32>
    %37 = vector.broadcast %36 : vector<2x1x32xf32> to vector<2x16x32xf32>
    %38 = arith.subf %15, %37 : vector<2x16x32xf32>
    %39 = math.absf %38 : vector<2x16x32xf32>
    %40 = vector.extract_strided_slice %15 {offsets = [0, 6, 0], sizes = [2, 1, 32], strides = [1, 1, 1]} : vector<2x16x32xf32> to vector<2x1x32xf32>
    %41 = vector.broadcast %40 : vector<2x1x32xf32> to vector<2x16x32xf32>
    %42 = arith.subf %15, %41 : vector<2x16x32xf32>
    %43 = math.absf %42 : vector<2x16x32xf32>
    %44 = vector.extract_strided_slice %15 {offsets = [0, 7, 0], sizes = [2, 1, 32], strides = [1, 1, 1]} : vector<2x16x32xf32> to vector<2x1x32xf32>
    %45 = vector.broadcast %44 : vector<2x1x32xf32> to vector<2x16x32xf32>
    %46 = arith.subf %15, %45 : vector<2x16x32xf32>
    %47 = math.absf %46 : vector<2x16x32xf32>
    %48 = arith.addf %19, %23 : vector<2x16x32xf32>
    %49 = arith.addf %27, %31 : vector<2x16x32xf32>
    %50 = arith.addf %35, %39 : vector<2x16x32xf32>
    %51 = arith.addf %43, %47 : vector<2x16x32xf32>
    %52 = arith.addf %48, %49 : vector<2x16x32xf32>
    %53 = arith.addf %50, %51 : vector<2x16x32xf32>
    %54 = arith.addf %52, %53 : vector<2x16x32xf32>
    %55 = vector.extract_strided_slice %15 {offsets = [0, 8, 0], sizes = [2, 1, 32], strides = [1, 1, 1]} : vector<2x16x32xf32> to vector<2x1x32xf32>
    %56 = vector.broadcast %55 : vector<2x1x32xf32> to vector<2x16x32xf32>
    %57 = arith.subf %15, %56 : vector<2x16x32xf32>
    %58 = math.absf %57 : vector<2x16x32xf32>
    %59 = vector.extract_strided_slice %15 {offsets = [0, 9, 0], sizes = [2, 1, 32], strides = [1, 1, 1]} : vector<2x16x32xf32> to vector<2x1x32xf32>
    %60 = vector.broadcast %59 : vector<2x1x32xf32> to vector<2x16x32xf32>
    %61 = arith.subf %15, %60 : vector<2x16x32xf32>
    %62 = math.absf %61 : vector<2x16x32xf32>
    %63 = vector.extract_strided_slice %15 {offsets = [0, 10, 0], sizes = [2, 1, 32], strides = [1, 1, 1]} : vector<2x16x32xf32> to vector<2x1x32xf32>
    %64 = vector.broadcast %63 : vector<2x1x32xf32> to vector<2x16x32xf32>
    %65 = arith.subf %15, %64 : vector<2x16x32xf32>
    %66 = math.absf %65 : vector<2x16x32xf32>
    %67 = vector.extract_strided_slice %15 {offsets = [0, 11, 0], sizes = [2, 1, 32], strides = [1, 1, 1]} : vector<2x16x32xf32> to vector<2x1x32xf32>
    %68 = vector.broadcast %67 : vector<2x1x32xf32> to vector<2x16x32xf32>
    %69 = arith.subf %15, %68 : vector<2x16x32xf32>
    %70 = math.absf %69 : vector<2x16x32xf32>
    %71 = vector.extract_strided_slice %15 {offsets = [0, 12, 0], sizes = [2, 1, 32], strides = [1, 1, 1]} : vector<2x16x32xf32> to vector<2x1x32xf32>
    %72 = vector.broadcast %71 : vector<2x1x32xf32> to vector<2x16x32xf32>
    %73 = arith.subf %15, %72 : vector<2x16x32xf32>
    %74 = math.absf %73 : vector<2x16x32xf32>
    %75 = vector.extract_strided_slice %15 {offsets = [0, 13, 0], sizes = [2, 1, 32], strides = [1, 1, 1]} : vector<2x16x32xf32> to vector<2x1x32xf32>
    %76 = vector.broadcast %75 : vector<2x1x32xf32> to vector<2x16x32xf32>
    %77 = arith.subf %15, %76 : vector<2x16x32xf32>
    %78 = math.absf %77 : vector<2x16x32xf32>
    %79 = vector.extract_strided_slice %15 {offsets = [0, 14, 0], sizes = [2, 1, 32], strides = [1, 1, 1]} : vector<2x16x32xf32> to vector<2x1x32xf32>
    %80 = vector.broadcast %79 : vector<2x1x32xf32> to vector<2x16x32xf32>
    %81 = arith.subf %15, %80 : vector<2x16x32xf32>
    %82 = math.absf %81 : vector<2x16x32xf32>
    %83 = vector.extract_strided_slice %15 {offsets = [0, 15, 0], sizes = [2, 1, 32], strides = [1, 1, 1]} : vector<2x16x32xf32> to vector<2x1x32xf32>
    %84 = vector.broadcast %83 : vector<2x1x32xf32> to vector<2x16x32xf32>
    %85 = arith.subf %15, %84 : vector<2x16x32xf32>
    %86 = math.absf %85 : vector<2x16x32xf32>
    %87 = arith.addf %58, %62 : vector<2x16x32xf32>
    %88 = arith.addf %66, %70 : vector<2x16x32xf32>
    %89 = arith.addf %74, %78 : vector<2x16x32xf32>
    %90 = arith.addf %82, %86 : vector<2x16x32xf32>
    %91 = arith.addf %87, %88 : vector<2x16x32xf32>
    %92 = arith.addf %89, %90 : vector<2x16x32xf32>
    %93 = arith.addf %91, %92 : vector<2x16x32xf32>
    %94 = arith.addf %54, %93 : vector<2x16x32xf32>
    %95 = vector.shape_cast %15 : vector<2x16x32xf32> to vector<2x1x16x32xf32>
    %96 = vector.shape_cast %94 : vector<2x16x32xf32> to vector<2x1x16x32xf32>
    %cst_14 = arith.constant 0.000000e+00 : f32
    %97 = vector.broadcast %cst_14 : f32 to vector<2x32xf32>
    %c0_15 = arith.constant 0 : index
    %c0_16 = arith.constant 0 : index
    %c0_17 = arith.constant 0 : index
    %c0_18 = arith.constant 0 : index
    %98 = vector.load %arg4[%c0_15, %c0_16, %c0_17, %c0_18] : memref<1x16x1x1xf32, #tpu.memory_space<vmem>>, vector<1x8x1x1xf32>
    %99 = vector.broadcast %98 : vector<1x8x1x1xf32> to vector<2x8x16x32xf32>
    %100 = vector.broadcast %95 : vector<2x1x16x32xf32> to vector<2x8x16x32xf32>
    %101 = arith.mulf %99, %100 : vector<2x8x16x32xf32>
    %102 = vector.broadcast %96 : vector<2x1x16x32xf32> to vector<2x8x16x32xf32>
    %103 = arith.subf %101, %102 : vector<2x8x16x32xf32>
    %cst_19 = arith.constant dense<0xFF800000> : vector<2x8x32xf32>
    %104 = vector.multi_reduction <maximumf>, %103, %cst_19 [2] : vector<2x8x16x32xf32> to vector<2x8x32xf32>
    %105 = vector.shape_cast %104 : vector<2x8x32xf32> to vector<2x8x1x32xf32>
    %106 = vector.broadcast %105 : vector<2x8x1x32xf32> to vector<2x8x16x32xf32>
    %107 = arith.subf %103, %106 : vector<2x8x16x32xf32>
    %108 = math.exp %107 : vector<2x8x16x32xf32>
    %cst_20 = arith.constant dense<0.000000e+00> : vector<2x8x32xf32>
    %109 = vector.multi_reduction <add>, %108, %cst_20 [2] : vector<2x8x16x32xf32> to vector<2x8x32xf32>
    %110 = vector.broadcast %95 : vector<2x1x16x32xf32> to vector<2x8x16x32xf32>
    %111 = arith.mulf %108, %110 : vector<2x8x16x32xf32>
    %cst_21 = arith.constant dense<0.000000e+00> : vector<2x8x32xf32>
    %112 = vector.multi_reduction <add>, %111, %cst_21 [2] : vector<2x8x16x32xf32> to vector<2x8x32xf32>
    %113 = tpu.reciprocal %109 {approx = true} : vector<2x8x32xf32> -> vector<2x8x32xf32>
    %114 = arith.mulf %112, %113 : vector<2x8x32xf32>
    %c0_22 = arith.constant 0 : index
    %c0_23 = arith.constant 0 : index
    %c0_24 = arith.constant 0 : index
    %115 = vector.load %arg3[%c0_22, %c0_23, %c0_24] : memref<2x16x32xf32, #tpu.memory_space<vmem>>, vector<2x8x32xf32>
    %116 = arith.mulf %115, %114 : vector<2x8x32xf32>
    %cst_25 = arith.constant dense<0.000000e+00> : vector<2x32xf32>
    %117 = vector.multi_reduction <add>, %116, %cst_25 [1] : vector<2x8x32xf32> to vector<2x32xf32>
    %118 = arith.addf %97, %117 : vector<2x32xf32>
    %c0_26 = arith.constant 0 : index
    %c8 = arith.constant 8 : index
    %c0_27 = arith.constant 0 : index
    %c0_28 = arith.constant 0 : index
    %119 = vector.load %arg4[%c0_26, %c8, %c0_27, %c0_28] : memref<1x16x1x1xf32, #tpu.memory_space<vmem>>, vector<1x8x1x1xf32>
    %120 = vector.broadcast %119 : vector<1x8x1x1xf32> to vector<2x8x16x32xf32>
    %121 = vector.broadcast %95 : vector<2x1x16x32xf32> to vector<2x8x16x32xf32>
    %122 = arith.mulf %120, %121 : vector<2x8x16x32xf32>
    %123 = vector.broadcast %96 : vector<2x1x16x32xf32> to vector<2x8x16x32xf32>
    %124 = arith.subf %122, %123 : vector<2x8x16x32xf32>
    %cst_29 = arith.constant dense<0xFF800000> : vector<2x8x32xf32>
    %125 = vector.multi_reduction <maximumf>, %124, %cst_29 [2] : vector<2x8x16x32xf32> to vector<2x8x32xf32>
    %126 = vector.shape_cast %125 : vector<2x8x32xf32> to vector<2x8x1x32xf32>
    %127 = vector.broadcast %126 : vector<2x8x1x32xf32> to vector<2x8x16x32xf32>
    %128 = arith.subf %124, %127 : vector<2x8x16x32xf32>
    %129 = math.exp %128 : vector<2x8x16x32xf32>
    %cst_30 = arith.constant dense<0.000000e+00> : vector<2x8x32xf32>
    %130 = vector.multi_reduction <add>, %129, %cst_30 [2] : vector<2x8x16x32xf32> to vector<2x8x32xf32>
    %131 = vector.broadcast %95 : vector<2x1x16x32xf32> to vector<2x8x16x32xf32>
    %132 = arith.mulf %129, %131 : vector<2x8x16x32xf32>
    %cst_31 = arith.constant dense<0.000000e+00> : vector<2x8x32xf32>
    %133 = vector.multi_reduction <add>, %132, %cst_31 [2] : vector<2x8x16x32xf32> to vector<2x8x32xf32>
    %134 = tpu.reciprocal %130 {approx = true} : vector<2x8x32xf32> -> vector<2x8x32xf32>
    %135 = arith.mulf %133, %134 : vector<2x8x32xf32>
    %c0_32 = arith.constant 0 : index
    %c8_33 = arith.constant 8 : index
    %c0_34 = arith.constant 0 : index
    %136 = vector.load %arg3[%c0_32, %c8_33, %c0_34] : memref<2x16x32xf32, #tpu.memory_space<vmem>>, vector<2x8x32xf32>
    %137 = arith.mulf %136, %135 : vector<2x8x32xf32>
    %cst_35 = arith.constant dense<0.000000e+00> : vector<2x32xf32>
    %138 = vector.multi_reduction <add>, %137, %cst_35 [1] : vector<2x8x32xf32> to vector<2x32xf32>
    %139 = arith.addf %118, %138 : vector<2x32xf32>
    %c0_36 = arith.constant 0 : index
    %c0_37 = arith.constant 0 : index
    %140 = vector.load %arg9[%c0_36, %c0_37] : memref<32x32xf32, #tpu.memory_space<vmem>>, vector<32x32xf32>
    %cst_38 = arith.constant dense<0.000000e+00> : vector<2x32xf32>
    %141 = tpu.matmul %139, %140, %cst_38 {dimension_numbers = #tpu.dot_dimension_numbers<[1], [0], [0], [1], [0, 0, 1, 1], [], []>} : vector<2x32xf32>, vector<32x32xf32>, vector<2x32xf32> -> vector<2x32xf32>
    %c0_39 = arith.constant 0 : index
    %c0_40 = arith.constant 0 : index
    %142 = vector.load %arg10[%c0_39, %c0_40] : memref<1x32xf32, #tpu.memory_space<vmem>>, vector<1x32xf32>
    %143 = vector.broadcast %142 : vector<1x32xf32> to vector<2x32xf32>
    %144 = arith.addf %141, %143 : vector<2x32xf32>
    %cst_41 = arith.constant 0.000000e+00 : f32
    %145 = vector.broadcast %cst_41 : f32 to vector<2x32xf32>
    %146 = arith.maximumf %144, %145 : vector<2x32xf32>
    %c0_42 = arith.constant 0 : index
    %c0_43 = arith.constant 0 : index
    %147 = vector.load %arg11[%c0_42, %c0_43] : memref<32x1xf32, #tpu.memory_space<vmem>>, vector<32x1xf32>
    %cst_44 = arith.constant dense<0.000000e+00> : vector<2x1xf32>
    %148 = tpu.matmul %146, %147, %cst_44 {dimension_numbers = #tpu.dot_dimension_numbers<[1], [0], [0], [1], [0, 0, 1, 1], [], []>} : vector<2x32xf32>, vector<32x1xf32>, vector<2x1xf32> -> vector<2x1xf32>
    %c0_45 = arith.constant 0 : index
    %c0_46 = arith.constant 0 : index
    %149 = vector.load %arg12[%c0_45, %c0_46] : memref<1x1xf32, #tpu.memory_space<vmem>>, vector<1x1xf32>
    %150 = vector.broadcast %149 : vector<1x1xf32> to vector<2x1xf32>
    %151 = arith.addf %148, %150 : vector<2x1xf32>
    %c0_47 = arith.constant 0 : index
    %c0_48 = arith.constant 0 : index
    %c0_49 = arith.constant 0 : index
    %152 = vector.load %arg13[%c0_47, %c0_48, %c0_49] : memref<1x2x1xf32, #tpu.memory_space<vmem>>, vector<1x2x1xf32>
    %153 = vector.shape_cast %152 : vector<1x2x1xf32> to vector<2x1xf32>
    %154 = vector.shape_cast %151 : vector<2x1xf32> to vector<1x2x1xf32>
    tpu.vector_store %arg13[%c0_47, %c0_48, %c0_49], %154 {strides = array<i32>} : memref<1x2x1xf32, #tpu.memory_space<vmem>>, vector<1x2x1xf32>,
    return
  }
  func.func @transform_0(%arg0: i32) -> (i32, i32) {
    %c0_i32 = arith.constant 0 : i32
    %c0_i32_0 = arith.constant 0 : i32
    return %arg0, %c0_i32 : i32, i32
  }
  func.func @transform_1(%arg0: i32) -> (i32, i32, i32) {
    %c0_i32 = arith.constant 0 : i32
    %c0_i32_0 = arith.constant 0 : i32
    %c0_i32_1 = arith.constant 0 : i32
    return %arg0, %c0_i32, %c0_i32_0 : i32, i32, i32
  }
  func.func @transform_2(%arg0: i32) -> (i32, i32, i32) {
    %c0_i32 = arith.constant 0 : i32
    %c0_i32_0 = arith.constant 0 : i32
    %c0_i32_1 = arith.constant 0 : i32
    return %arg0, %c0_i32, %c0_i32_0 : i32, i32, i32
  }
  func.func @transform_3(%arg0: i32) -> (i32, i32, i32, i32) {
    %c0_i32 = arith.constant 0 : i32
    %c0_i32_0 = arith.constant 0 : i32
    %c0_i32_1 = arith.constant 0 : i32
    %c0_i32_2 = arith.constant 0 : i32
    %c0_i32_3 = arith.constant 0 : i32
    return %c0_i32, %c0_i32_0, %c0_i32_1, %c0_i32_2 : i32, i32, i32, i32
  }
  func.func @transform_4(%arg0: i32) -> (i32, i32) {
    %c0_i32 = arith.constant 0 : i32
    %c0_i32_0 = arith.constant 0 : i32
    %c0_i32_1 = arith.constant 0 : i32
    return %c0_i32, %c0_i32_0 : i32, i32
  }
  func.func @transform_5(%arg0: i32) -> (i32, i32) {
    %c0_i32 = arith.constant 0 : i32
    %c0_i32_0 = arith.constant 0 : i32
    %c0_i32_1 = arith.constant 0 : i32
    return %c0_i32, %c0_i32_0 : i32, i32
  }
  func.func @transform_6(%arg0: i32) -> (i32, i32) {
    %c0_i32 = arith.constant 0 : i32
    %c0_i32_0 = arith.constant 0 : i32
    %c0_i32_1 = arith.constant 0 : i32
    return %c0_i32, %c0_i32_0 : i32, i32
  }
  func.func @transform_7(%arg0: i32) -> (i32, i32) {
    %c0_i32 = arith.constant 0 : i32
    %c0_i32_0 = arith.constant 0 : i32
    %c0_i32_1 = arith.constant 0 : i32
    return %c0_i32, %c0_i32_0 : i32, i32
  }
  func.func @transform_8(%arg0: i32) -> (i32, i32) {
    %c0_i32 = arith.constant 0 : i32
    %c0_i32_0 = arith.constant 0 : i32
    %c0_i32_1 = arith.constant 0 : i32
    return %c0_i32, %c0_i32_0 : i32, i32
  }
  func.func @transform_9(%arg0: i32) -> (i32, i32) {
    %c0_i32 = arith.constant 0 : i32
    %c0_i32_0 = arith.constant 0 : i32
    %c0_i32_1 = arith.constant 0 : i32
    return %c0_i32, %c0_i32_0 : i32, i32
  }
  func.func @transform_10(%arg0: i32) -> (i32, i32) {
    %c0_i32 = arith.constant 0 : i32
    %c0_i32_0 = arith.constant 0 : i32
    %c0_i32_1 = arith.constant 0 : i32
    return %c0_i32, %c0_i32_0 : i32, i32
  }
  func.func @transform_11(%arg0: i32) -> (i32, i32) {
    %c0_i32 = arith.constant 0 : i32
    %c0_i32_0 = arith.constant 0 : i32
    %c0_i32_1 = arith.constant 0 : i32
    return %c0_i32, %c0_i32_0 : i32, i32
  }
  func.func @transform_12(%arg0: i32) -> (i32, i32, i32) {
    %c0_i32 = arith.constant 0 : i32
    %c0_i32_0 = arith.constant 0 : i32
    %c0_i32_1 = arith.constant 0 : i32
    return %arg0, %c0_i32, %c0_i32_0 : i32, i32, i32
  }
}

</mosaic_0001>

<bundles_post_ra>
// kernel: tpu_custom_call.1
= control target key start
LH: loop header
LB: loop body
LE: loop exit
PB: predicated region body
PF: predicated region fallthrough
CT: control target
= control target key end

     0   :  { %s5258_s0 = inlined_call_operand.vmem [shape: f32[32,4], index: 0, kind: input, shape index: {}]   ;;  %s5259_s1 = inlined_call_operand.vmem [shape: f32[2,16,32], index: 1, kind: input, shape index: {}]   ;;  %s5260_s2 = inlined_call_operand.vmem [shape: f32[2,16,32], index: 2, kind: input, shape index: {}]   ;;  %s5261_s3 = inlined_call_operand.vmem [shape: f32[1,16,1,1], index: 3, kind: input, shape index: {}]   ;;  %s5262_s4 = inlined_call_operand.hbm [shape: f32[4,32], index: 4, kind: input, shape index: {}]   ;;  %s5263_s5 = inlined_call_operand.hbm [shape: f32[1,32], index: 5, kind: input, shape index: {}]   ;;  %s5264_s6 = inlined_call_operand.vmem [shape: f32[32,32], index: 6, kind: input, shape index: {}]   ;;  %s5265_s7 = inlined_call_operand.vmem [shape: f32[1,32], index: 7, kind: input, shape index: {}]   ;;  %s5266_s8 = inlined_call_operand.hbm [shape: f32[32,32], index: 8, kind: input, shape index: {}]   ;;  %s5267_s9 = inlined_call_operand.vmem [shape: f32[1,32], index: 9, kind: input, shape index: {}]   ;;  %s5268_s10 = inlined_call_operand.vmem [shape: f32[32,1], index: 10, kind: input, shape index: {}]   ;;  %s5269_s11 = inlined_call_operand.<no memory space> [shape: f32[1,1], index: 11, kind: input, shape index: {}]   ;;  %s5270_s12 = inlined_call_operand.vmem [shape: f32[1,2,1], index: 12, kind: output, shape index: {}]  }
   0x1   :  { %v17_v0 = vstv %s5269_s11 }
   0x2   :  { %18 = vst [vmem:[#allocation2] sm:$0x1] %v17_v0 }
   0x3   :  { %19 = vsyncpa [#allocation4], 0 }
   0x4   :  { %20 = vsyncpa [#allocation6], 0  ;;  %s2766_s23 = smov [#allocation5]   ;;  %s2767_s25 = smov [#allocation3]  }
   0x5   :  { %s45_s24 = sshll.u32 %s2766_s23, 4  ;;  %s35_s26 = sshll.u32 %s2767_s25, 4  ;;  %s46_s24 = int_to_ptr.vmem [resolvable:$true] %s45_s24  ;;  %s36_s26 = int_to_ptr.vmem [resolvable:$true] %s35_s26 }
   0x6   :  { %s2710_s27 = scalar_lea.vmem %s46_s24, 16  ;;  %s2714_s28 = scalar_lea.vmem %s46_s24, 32 }
   0x7   :  { %p2711_p0 = scmp.ne.s32.totalorder %s46_s24, %s2710_s27  ;;  %p2715_p1 = scmp.lt.s32.totalorder %s46_s24, %s46_s24 }
   0x8   :  { %p2716_p2 = scmp.lt.s32.totalorder %s2714_s28, %s2710_s27 }
   0xa   :  { %p2717_p3 = por %p2716_p2, %p2715_p1 }
   0xc   :  { %p2718_p4 = pnand %p2717_p3, %p2711_p0 }
   0xe   :  { %2721 = shalt.err (!%p2718_p4)
}
   0xf   :  { %48 = dma.hbm_to_vmem [thread:$0]  %s5263_s5, 16, %s46_s24, [#allocation6]  }
  0x10   :  { %s2730_s11 = scalar_lea.vmem %s36_s26, 64  ;;  %p2735_p6 = scmp.lt.s32.totalorder %s36_s26, %s36_s26 }
  0x11   :  { %p2731_p5 = scmp.ne.s32.totalorder %s36_s26, %s2730_s11  ;;  %p2736_p7 = scmp.lt.s32.totalorder %s2730_s11, %s2730_s11 }
  0x13   :  { %p2737_p8 = por %p2736_p7, %p2735_p6 }
  0x15   :  { %p2738_p9 = pnand %p2737_p8, %p2731_p5 }
  0x17   :  { %2741 = shalt.err (!%p2738_p9)
}
  0x18   :  { %38 = dma.hbm_to_vmem [thread:$0]  %s5262_s4, 64, %s36_s26, [#allocation4]  }
  0x19   :  { %s2768_s15 = smov [#allocation7]  }
  0x1a   :  { %s58_s16 = sshll.u32 %s2768_s15, 4  ;;  %s59_s16 = int_to_ptr.vmem [resolvable:$true] %s58_s16 }
  0x1b   :  { %s2750_s17 = scalar_lea.vmem %s59_s16, 512  ;;  %p2755_p11 = scmp.lt.s32.totalorder %s59_s16, %s59_s16 }
  0x1c   :  { %p2751_p10 = scmp.ne.s32.totalorder %s59_s16, %s2750_s17  ;;  %p2756_p12 = scmp.lt.s32.totalorder %s2750_s17, %s2750_s17 }
  0x1e   :  { %p2757_p13 = por %p2756_p12, %p2755_p11 }
  0x20   :  { %p2758_p0 = pnand %p2757_p13, %p2751_p10 }
  0x22   :  { %2761 = shalt.err (!%p2758_p0)
}
  0x23   :  { %s2769_s5 = smov 128   ;;  %s2770_s18 = smov 8  }
  0x24   :  { %64 = dma.hbm_to_vmem [thread:$0]  %s5266_s8, 512, %s59_s16, [#allocation6], %s2769_s5, %s2769_s5, %s2770_s18  }
  0x25   :  { %2762 = dma.done.wait [#allocation4], 64  }
  0x26   :  { %2763 = vsyncadd [#allocation4], 4294967232 }
  0x27   :  { %2764 = dma.done.wait [#allocation6], 528  }
  0x28   :  { %2765 = vsyncadd [#allocation6], 4294966768  ;;  %vm105_vm0 = vcmask 1043456   ;;  %vm92_vm1 = vcmask 31744   ;;  %v84_v1 = vld [vmem:[#allocation3] sm:$0xf]  ;;  %v315_v50 = vlaneseq }
  0x29   :  { %v80_v2 = vld [vmem:[%s5258_s0] sm:$0xff]  ;;  %v81_v3 = vld [vmem:[%s5258_s0 + $0x8] sm:$0xff]  ;;  %2456 = vmatprep.subr.msk.mxu0 %vm105_vm0, %v84_v1  ;;  %v82_v4 = vld [vmem:[%s5258_s0 + $0x10] sm:$0xff]  ;;  %v2771_v12 = vmov 0   ;;  %vm209_vm2 = vcmask 261120   ;;  %vm2773_vm3 = vmmov 0  }
  0x2a   :  { %2458 = vmatprep.mubr.msk.f32.mxu0 %vm92_vm1, %v80_v2  ;;  %2457 = vmatpush3.msk.msra.mxu0 %vm105_vm0, %v84_v1  ;;  %v83_v5 = vld [vmem:[%s5258_s0 + $0x18] sm:$0xff]  ;;  %v200_v7 = vld [vmem:[%s5264_s6 + $0x10] sm:$0xff]  ;;  %v199_v8 = vld [vmem:[%s5264_s6 + $0x8] sm:$0xff]  ;;  %v316_v54 = vshrl.u32 %v315_v50, 7  ;;  %vm1385_vm4 = vcmask 1041409   ;;  %vm1387_vm5 = vcmask 1042434  }
  0x2b   :  { %2459 = vmatmul.mubr.msk.f32.vlgmr.msra.gmra.mxu0 %vm92_vm1, %v81_v3  ;;  %v201_v6 = vld [vmem:[%s5264_s6 + $0x18] sm:$0xff]  ;;  %v198_v9 = vld [vmem:[%s5264_s6] sm:$0xff]  ;;  %v2421_v10 = vld [vmem:[%s5261_s3 + $0x8] ss:$0 sm:$0xff]  ;;  %2509 = vset.pattern.permute.xlu1 %v2771_v12  ;;  %vm1389_vm6 = vcmask 1043459   ;;  %vm1391_vm7 = vcmask 1044484  }
  0x2c   :  { %2461 = vmatprep.mubr.msk.f32.mxu0 %vm92_vm1, %v82_v4  ;;  %2464 = vmatprep.subr.mxu1 %v201_v6  ;;  %v2405_v11 = vld [vmem:[%s5261_s3] ss:$0 sm:$0xff]  ;;  %v2422_v13 = vld [vmem:[%s5261_s3 + $0x9] ss:$0 sm:$0xff]  ;;  %v2406_v14 = vld [vmem:[%s5261_s3 + $0x1] ss:$0 sm:$0xff] }
  0x2d   :  { %2465 = vmatpush3.msra.mxu1 %v201_v6  ;;  %2508 = vset.pattern.permute.xlu0 %v2771_v12  ;;  %v2423_v15 = vld [vmem:[%s5261_s3 + $0xa] ss:$0 sm:$0xff]  ;;  %v2407_v16 = vld [vmem:[%s5261_s3 + $0x2] ss:$0 sm:$0xff]  ;;  %v2424_v17 = vld [vmem:[%s5261_s3 + $0xb] ss:$0 sm:$0xff] }
  0x2e   :  { %2466 = vmatprep.subr.mxu1 %v200_v7  ;;  %1476 = vperm.xlu1 %2509, %v2421_v10   ;;  %v2408_v18 = vld [vmem:[%s5261_s3 + $0x3] ss:$0 sm:$0xff]  ;;  %v2425_v19 = vld [vmem:[%s5261_s3 + $0xc] ss:$0 sm:$0xff]  ;;  %v2409_v20 = vld [vmem:[%s5261_s3 + $0x4] ss:$0 sm:$0xff] }
  0x2f   :  { %2462 = vmatmul.mubr.msk.f32.gmra.mxu0 %vm92_vm1, %v83_v5  ;;  %2467 = vmatpush3.msra.mxu1 %v200_v7  ;;  %v2426_v21 = vld [vmem:[%s5261_s3 + $0xd] ss:$0 sm:$0xff]  ;;  %v2410_v22 = vld [vmem:[%s5261_s3 + $0x5] ss:$0 sm:$0xff]  ;;  %v2427_v23 = vld [vmem:[%s5261_s3 + $0xe] ss:$0 sm:$0xff] }
  0x30   :  { %2468 = vmatprep.subr.mxu1 %v199_v8  ;;  %680 = vperm.xlu0 %2508, %v2405_v11   ;;  %v2411_v24 = vld [vmem:[%s5261_s3 + $0x6] ss:$0 sm:$0xff]  ;;  %v2428_v25 = vld [vmem:[%s5261_s3 + $0xf] ss:$0 sm:$0xff]  ;;  %v2412_v26 = vld [vmem:[%s5261_s3 + $0x7] ss:$0 sm:$0xff] }
  0x31   :  { %2469 = vmatpush3.msra.mxu1 %v199_v8  ;;  %v2394_v27 = vld [vmem:[#allocation5] ss:$0 sm:$0xff]  ;;  %v2950_v52 = vld [vmem:[%s5265_s7] ss:$0 sm:$0xff]  ;;  %v308_v57 = vld [vmem:[%s5259_s1 + $0x8] sm:$0xff]  ;;  %v2960_v58 = vsub.s32 0, %v316_v54 }
  0x32   :  { %2470 = vmatprep.subr.mxu1 %v198_v9  ;;  %1480 = vperm.xlu1 %2509, %v2422_v13   ;;  %v2962_v59 = vsub.s32 1, %v316_v54  ;;  %v2966_v61 = vsub.s32 2, %v316_v54  ;;  %v2968_v62 = vsub.s32 3, %v316_v54  ;;  %v2970_v63 = vsub.s32 4, %v316_v54  ;;  %v307_v13 = vld [vmem:[%s5259_s1] sm:$0xff] }
  0x33   :  { %2471 = vmatpush3.msra.mxu1 %v198_v9  ;;  %v2972_v0 = vsub.s32 5, %v316_v54  ;;  %v2976_v3 = vsub.s32 6, %v316_v54  ;;  %v2978_v4 = vsub.s32 7, %v316_v54  ;;  %vm1393_vm8 = vcmask 1045509  }
  0x34   :  { %684 = vperm.xlu0 %2508, %v2406_v14   ;;  %vm1395_vm9 = vcmask 1046534   ;;  %vm1397_vm10 = vcmask 1047559   ;;  %vm2386_vm11 = vcmask 1024  }
  0x36   :  { %1484 = vperm.xlu1 %2509, %v2423_v15  }
  0x38   :  { %688 = vperm.xlu0 %2508, %v2407_v16  }
  0x3a   :  { %1488 = vperm.xlu1 %2509, %v2424_v17  }
  0x3c   :  { %692 = vperm.xlu0 %2508, %v2408_v18  }
  0x3e   :  { %1492 = vperm.xlu1 %2509, %v2425_v19  }
  0x40   :  { %696 = vperm.xlu0 %2508, %v2409_v20  }
  0x42   :  { %1496 = vperm.xlu1 %2509, %v2426_v21  }
  0x44   :  { %700 = vperm.xlu0 %2508, %v2410_v22  }
  0x46   :  { %1500 = vperm.xlu1 %2509, %v2427_v23  }
  0x48   :  { %704 = vperm.xlu0 %2508, %v2411_v24  }
  0x4a   :  { %1504 = vperm.xlu1 %2509, %v2428_v25  }
  0x4c   :  { %708 = vperm.xlu0 %2508, %v2412_v26  }
  0xa9   :  { %v2929_v41 = vpop.permute.xlu1 %1476 }
  0xaa   :  { %5376 = vst [vmem:[#allocation11_spill] sm:$0xff] %v2929_v41 }
  0xab   :  { %v2927_v40 = vpop.permute.xlu0 %680 }
  0xac   :  { %5375 = vst [vmem:[#allocation10_spill] sm:$0xff] %v2927_v40 }
  0xad   :  { %v2933_v43 = vpop.permute.xlu1 %1480 }
  0xae   :  { %5378 = vst [vmem:[#allocation13_spill] sm:$0xff] %v2933_v43 }
  0xaf   :  { %v2931_v42 = vpop.permute.xlu0 %684 }
  0xb0   :  { %5377 = vst [vmem:[#allocation12_spill] sm:$0xff] %v2931_v42 }
  0xb1   :  { %v2937_v45 = vpop.permute.xlu1 %1484 }
  0xb2   :  { %5380 = vst [vmem:[#allocation15_spill] sm:$0xff] %v2937_v45 }
  0xb3   :  { %v2935_v44 = vpop.permute.xlu0 %688 }
  0xb4   :  { %5379 = vst [vmem:[#allocation14_spill] sm:$0xff] %v2935_v44 }
  0xb5   :  { %v2941_v47 = vpop.permute.xlu1 %1488 }
  0xb6   :  { %5382 = vst [vmem:[#allocation17_spill] sm:$0xff] %v2941_v47 }
  0xb7   :  { %v2939_v46 = vpop.permute.xlu0 %692 }
  0xb8   :  { %5381 = vst [vmem:[#allocation16_spill] sm:$0xff] %v2939_v46 }
  0xb9   :  { %v2945_v49 = vpop.permute.xlu1 %1492 }
  0xba   :  { %5384 = vst [vmem:[#allocation19_spill] sm:$0xff] %v2945_v49 }
  0xbb   :  { %v2943_v48 = vpop.permute.xlu0 %696 }
  0xbc   :  { %5383 = vst [vmem:[#allocation18_spill] sm:$0xff] %v2943_v48 }
  0xbd   :  { %v2955_v56 = vpop.permute.xlu1 %1496 }
  0xbe   :  { %5386 = vst [vmem:[#allocation21_spill] sm:$0xff] %v2955_v56 }
  0xbf   :  { %v2952_v53 = vpop.permute.xlu0 %700 }
  0xc0   :  { %5385 = vst [vmem:[#allocation20_spill] sm:$0xff] %v2952_v53 }
  0xc1   :  { %v2980_v5 = vpop.permute.xlu1 %1500 }
  0xc2   :  { %5389 = vst [vmem:[#allocation24_spill] sm:$0xff] %v2980_v5 }
  0xc3   :  { %v2974_v1 = vpop.permute.xlu0 %704 }
  0xc4   :  { %5388 = vst [vmem:[#allocation23_spill] sm:$0xff] %v2974_v1 }
  0xc7   :  { %v3026_v18 = vpop.permute.xlu0 %708 }
  0xc8   :  { %5392 = vst [vmem:[#allocation27_spill] sm:$0xff] %v3026_v18 }
  0xeb   :  { %v2460_v28 = vpop.f32.mrf.mxu0 }
  0xec   :  { %v181_v29 = vadd.f32 %v2460_v28, %v2394_v27 }
  0xed   :  { %v175_v30 = vpop.f32.mrf.mxu0 }
  0xee   :  { %v176_v31 = vadd.f32 %v2394_v27, %v175_v30  ;;  %v195_v34 = vmax.f32 %v181_v29, 0.0 }
  0xef   :  { %v2463_v32 = vpop.f32.mrf.mxu0 }
  0xf0   :  { %v194_v33 = vmax.f32 %v176_v31, 0.0  ;;  %v191_v35 = vadd.f32 %v2463_v32, %v2394_v27 }
  0xf1   :  { %v185_v36 = vpop.f32.mrf.mxu0 }
  0xf2   :  { %v186_v37 = vadd.f32 %v2394_v27, %v185_v36  ;;  %2472 = vmatprep.mubr.msk.f32.mxu1 %vm209_vm2, %v194_v33  ;;  %v197_v39 = vmax.f32 %v191_v35, 0.0  ;;  %v3058_v27 = vpop.permute.xlu1 %1504 }
  0xf3   :  { %2473 = vmatmul.mubr.msk.f32.vlgmr.msra.gmra.mxu1 %vm209_vm2, %v195_v34  ;;  %5401 = vst [vmem:[#allocation36_spill] sm:$0xff] %v3058_v27 }
  0xf4   :  { %v196_v38 = vmax.f32 %v186_v37, 0.0 }
  0xf6   :  { %2475 = vmatprep.mubr.msk.f32.mxu1 %vm209_vm2, %v196_v38 }
  0xf7   :  { %2476 = vmatmul.mubr.msk.f32.gmra.mxu1 %vm209_vm2, %v197_v39 }
 0x1b3   :  { %v2474_v51 = vpop.f32.mrf.mxu1 }
 0x1b4   :  { %v294_v55 = vadd.f32 %v2474_v51, %v2950_v52 }
 0x1b5   :  { %v288_v2 = vpop.f32.mrf.mxu1 }
 0x1b6   :  { %v2964_v60 = vadd.f32 %v308_v57, %v294_v55  ;;  %v289_v8 = vadd.f32 %v2950_v52, %v288_v2 }
 0x1b7   :  { %v2477_v37 = vpop.f32.mrf.mxu1 }
 0x1b8   :  { %5387 = vst [vmem:[#allocation22_spill] sm:$0xff] %v2964_v60  ;;  %v2984_v6 = vrot.slane %v2964_v60, %v2960_v58  ;;  %v2988_v7 = vrot.slane %v2964_v60, %v2962_v59  ;;  %v2993_v9 = vrot.slane %v2964_v60, %v2966_v61  ;;  %v2997_v10 = vrot.slane %v2964_v60, %v2968_v62 }
 0x1b9   :  { %v3001_v11 = vrot.slane %v2964_v60, %v2970_v63  ;;  %v3005_v12 = vrot.slane %v2964_v60, %v2972_v0  ;;  %v3012_v14 = vrot.slane %v2964_v60, %v2976_v3  ;;  %v3016_v15 = vrot.slane %v2964_v60, %v2978_v4 }
 0x1ba   :  { %v3020_v16 = vmul.f32 %v2927_v40, %v2964_v60  ;;  %v3024_v17 = vmul.f32 %v2931_v42, %v2964_v60  ;;  %v3030_v19 = vmul.f32 %v2935_v44, %v2964_v60  ;;  %v3034_v20 = vmul.f32 %v2939_v46, %v2964_v60 }
 0x1bb   :  { %v3038_v21 = vmul.f32 %v2943_v48, %v2964_v60  ;;  %v3042_v22 = vmul.f32 %v2952_v53, %v2964_v60  ;;  %v3046_v23 = vmul.f32 %v2974_v1, %v2964_v60  ;;  %v3050_v24 = vmul.f32 %v3026_v18, %v2964_v60 }
 0x1bc   :  { %5390 = vst [vmem:[#allocation25_spill] sm:$0xff] %v3020_v16  ;;  %5391 = vst [vmem:[#allocation26_spill] sm:$0xff] %v3024_v17  ;;  %v3054_v25 = vmul.f32 %v2929_v41, %v2964_v60  ;;  %v3056_v26 = vadd.f32 %v307_v13, %v289_v8  ;;  %v3062_v28 = vmul.f32 %v2933_v43, %v2964_v60 }
 0x1bd   :  { %5393 = vst [vmem:[#allocation28_spill] sm:$0xff] %v3030_v19  ;;  %5394 = vst [vmem:[#allocation29_spill] sm:$0xff] %v3034_v20  ;;  %v3066_v29 = vmul.f32 %v2937_v45, %v2964_v60  ;;  %v3070_v30 = vmul.f32 %v2941_v47, %v2964_v60  ;;  %v3074_v31 = vmul.f32 %v2945_v49, %v2964_v60 }
 0x1be   :  { %5395 = vst [vmem:[#allocation30_spill] sm:$0xff] %v3038_v21  ;;  %5396 = vst [vmem:[#allocation31_spill] sm:$0xff] %v3042_v22  ;;  %v3078_v32 = vmul.f32 %v2955_v56, %v2964_v60  ;;  %v3082_v33 = vmul.f32 %v2980_v5, %v2964_v60  ;;  %v3086_v34 = vmul.f32 %v3058_v27, %v2964_v60 }
 0x1bf   :  { %5397 = vst [vmem:[#allocation32_spill] sm:$0xff] %v3046_v23  ;;  %5398 = vst [vmem:[#allocation33_spill] sm:$0xff] %v3050_v24  ;;  %v480_v35 = vsub.f32 %v2964_v60, %v2984_v6  ;;  %v3100_v50 = vrot.slane %v3056_v26, %v2960_v58  ;;  %v3104_v51 = vrot.slane %v3056_v26, %v2962_v59 }
 0x1c0   :  { %5399 = vst [vmem:[#allocation34_spill] sm:$0xff] %v3054_v25  ;;  %5400 = vst [vmem:[#allocation35_spill] sm:$0xff] %v3056_v26  ;;  %v3112_v57 = vrot.slane %v3056_v26, %v2966_v61  ;;  %v3116_v2 = vrot.slane %v3056_v26, %v2968_v62  ;;  %v3120_v8 = vrot.slane %v3056_v26, %v2970_v63 }
 0x1c1   :  { %5402 = vst [vmem:[#allocation37_spill] sm:$0xff] %v3062_v28  ;;  %5403 = vst [vmem:[#allocation38_spill] sm:$0xff] %v3066_v29  ;;  %v3124_v13 = vrot.slane %v3056_v26, %v2972_v0  ;;  %v3128_v54 = vrot.slane %v3056_v26, %v2976_v3  ;;  %v3132_v55 = vrot.slane %v3056_v26, %v2978_v4 }
 0x1c2   :  { %5404 = vst [vmem:[#allocation39_spill] sm:$0xff] %v3070_v30  ;;  %5405 = vst [vmem:[#allocation40_spill] sm:$0xff] %v3074_v31  ;;  %v479_v39 = vsub.f32 %v3056_v26, %v2984_v6  ;;  %v495_v38 = vsub.f32 %v3056_v26, %v2988_v7  ;;  %v511_v36 = vsub.f32 %v3056_v26, %v2993_v9 }
 0x1c3   :  { %5406 = vst [vmem:[#allocation41_spill] sm:$0xff] %v3078_v32  ;;  %5407 = vst [vmem:[#allocation42_spill] sm:$0xff] %v3082_v33  ;;  %v543_v33 = vsub.f32 %v3056_v26, %v3001_v11  ;;  %v559_v32 = vsub.f32 %v3056_v26, %v3005_v12  ;;  %v575_v31 = vsub.f32 %v3056_v26, %v3012_v14 }
 0x1c4   :  { %5408 = vst [vmem:[#allocation43_spill] sm:$0xff] %v3086_v34  ;;  %5409 = vst [vmem:[#allocation44_spill] sm:$0xff] %v3132_v55  ;;  %v527_v34 = vsub.f32 %v3056_v26, %v2997_v10  ;;  %v591_v6 = vsub.f32 %v3056_v26, %v3016_v15  ;;  %v592_v30 = vsub.f32 %v2964_v60, %v3016_v15  ;;  %v3277_v55 = vand.u32 2147483647, %v511_v36 }
 0x1c5   :  { %v3154_v29 = vmul.f32 %v2927_v40, %v3056_v26  ;;  %v3158_v28 = vmul.f32 %v2931_v42, %v3056_v26  ;;  %v3162_v25 = vmul.f32 %v2935_v44, %v3056_v26  ;;  %v3166_v24 = vmul.f32 %v2939_v46, %v3056_v26 }
 0x1c6   :  { %v304_v23 = vadd.f32 %v2477_v37, %v2950_v52  ;;  %v3171_v15 = vmul.f32 %v2943_v48, %v3056_v26  ;;  %v3175_v22 = vmul.f32 %v2952_v53, %v3056_v26  ;;  %v3179_v21 = vmul.f32 %v2974_v1, %v3056_v26  ;;  %v310_v37 = vld [vmem:[%s5259_s1 + $0x18] sm:$0xff]  ;;  %5430 = vst [vmem:[#allocation64_spill] sm:$0xff] %v3277_v55 }
 0x1c7   :  { %5410 = vst [vmem:[#allocation45_spill] sm:$0xff] %v3154_v29  ;;  %5411 = vst [vmem:[#allocation46_spill] sm:$0xff] %v3158_v28  ;;  %v3183_v20 = vmul.f32 %v3026_v18, %v3056_v26  ;;  %v3210_v19 = vmul.f32 %v2955_v56, %v3056_v26  ;;  %v3260_v29 = vand.u32 2147483647, %v480_v35  ;;  %v3266_v28 = vand.u32 2147483647, %v495_v38 }
 0x1c8   :  { %5412 = vst [vmem:[#allocation47_spill] sm:$0xff] %v3162_v25  ;;  %5413 = vst [vmem:[#allocation48_spill] sm:$0xff] %v3166_v24  ;;  %v3190_v24 = vmul.f32 %v2929_v41, %v3056_v26  ;;  %v339_v25 = vsub.f32 %v3056_v26, %v3104_v51  ;;  %v5431_v35 = vsub.f32 %v2964_v60, %v2993_v9  ;;  %v3299_v55 = vand.u32 2147483647, %v543_v33 }
 0x1c9   :  { %5414 = vst [vmem:[#allocation49_spill] sm:$0xff] %v3171_v15  ;;  %5415 = vst [vmem:[#allocation50_spill] sm:$0xff] %v3175_v22  ;;  %v3194_v15 = vmul.f32 %v2933_v43, %v3056_v26  ;;  %v3198_v22 = vmul.f32 %v2937_v45, %v3056_v26  ;;  %v5435_v9 = vsub.f32 %v2964_v60, %v3001_v11 }
 0x1ca   :  { %5416 = vst [vmem:[#allocation51_spill] sm:$0xff] %v3179_v21  ;;  %5417 = vst [vmem:[#allocation52_spill] sm:$0xff] %v3183_v20  ;;  %v3202_v21 = vmul.f32 %v2941_v47, %v3056_v26  ;;  %v3206_v20 = vmul.f32 %v2945_v49, %v3056_v26  ;;  %v5439_v11 = vsub.f32 %v2964_v60, %v3012_v14  ;;  %v309_v14 = vld [vmem:[%s5259_s1 + $0x10] sm:$0xff] }
 0x1cb   :  { %5418 = vst [vmem:[#allocation53_spill] sm:$0xff] %v3190_v24  ;;  %5419 = vst [vmem:[#allocation54_spill] sm:$0xff] %v3194_v15  ;;  %v3214_v24 = vmul.f32 %v2980_v5, %v3056_v26  ;;  %v3218_v15 = vmul.f32 %v3058_v27, %v3056_v26 }
 0x1cc   :  { %5420 = vst [vmem:[#allocation55_spill] sm:$0xff] %v3198_v22  ;;  %5421 = vst [vmem:[#allocation56_spill] sm:$0xff] %v3202_v21  ;;  %v3220_v22 = vadd.f32 %v310_v37, %v304_v23  ;;  %v323_v21 = vsub.f32 %v3056_v26, %v3100_v50  ;;  %v371_v23 = vsub.f32 %v3056_v26, %v3116_v2 }
 0x1cd   :  { %5422 = vst [vmem:[#allocation57_spill] sm:$0xff] %v3206_v20  ;;  %5423 = vst [vmem:[#allocation58_spill] sm:$0xff] %v3210_v19  ;;  %v324_v20 = vsub.f32 %v2964_v60, %v3100_v50  ;;  %v340_v19 = vsub.f32 %v2964_v60, %v3104_v51  ;;  %v372_v37 = vsub.f32 %v2964_v60, %v3116_v2  ;;  %v3258_v51 = vand.u32 2147483647, %v479_v39 }
 0x1ce   :  { %5424 = vst [vmem:[#allocation59_spill] sm:$0xff] %v3214_v24  ;;  %5425 = vst [vmem:[#allocation60_spill] sm:$0xff] %v3218_v15  ;;  %v355_v24 = vsub.f32 %v3056_v26, %v3112_v57  ;;  %v356_v15 = vsub.f32 %v2964_v60, %v3112_v57  ;;  %v3256_v17 = vrot.slane %v3220_v22, %v2960_v58  ;;  %v3282_v39 = vand.u32 2147483647, %v5431_v35 }
 0x1cf   :  { %5426 = vst [vmem:[#allocation61_spill] sm:$0xff] %v3220_v22  ;;  %5427 = vst [vmem:[#allocation62_spill] sm:$0xff] %v3260_v29  ;;  %v3264_v57 = vrot.slane %v3220_v22, %v2962_v59  ;;  %v5428_v2 = vsub.f32 %v2964_v60, %v2988_v7  ;;  %v3275_v50 = vrot.slane %v3220_v22, %v2966_v61  ;;  %v3288_v29 = vand.u32 2147483647, %v527_v34  ;;  %v298_v7 = vpop.f32.mrf.mxu1 }
 0x1d0   :  { %5432 = vst [vmem:[#allocation65_spill] sm:$0xff] %v3282_v39  ;;  %v3286_v38 = vrot.slane %v3220_v22, %v2968_v62  ;;  %v3297_v36 = vrot.slane %v3220_v22, %v2970_v63  ;;  %5434 = vst [vmem:[#allocation66_spill] sm:$0xff] %v3299_v55  ;;  %v3304_v35 = vand.u32 2147483647, %v5435_v9  ;;  %v3308_v34 = vrot.slane %v3220_v22, %v2972_v0 }
 0x1d1   :  { %v3271_v16 = vand.u32 2147483647, %v5428_v2  ;;  %v5433_v2 = vsub.f32 %v2964_v60, %v2997_v10  ;;  %v3310_v39 = vand.u32 2147483647, %v559_v32  ;;  %v5437_v10 = vsub.f32 %v2964_v60, %v3005_v12 }
 0x1d2   :  { %5436 = vst [vmem:[#allocation67_spill] sm:$0xff] %v3304_v35  ;;  %v3319_v33 = vrot.slane %v3220_v22, %v2976_v3  ;;  %v3321_v55 = vand.u32 2147483647, %v575_v31  ;;  %v3326_v9 = vand.u32 2147483647, %v5439_v11  ;;  %v3330_v32 = vrot.slane %v3220_v22, %v2978_v4 }
 0x1d3   :  { %5429 = vst [vmem:[#allocation63_spill] sm:$0xff] %v3271_v16  ;;  %v3293_v16 = vand.u32 2147483647, %v5433_v2  ;;  %v3315_v2 = vand.u32 2147483647, %v5437_v10  ;;  %v299_v35 = vadd.f32 %v2950_v52, %v298_v7  ;;  %v3343_v31 = vmul.f32 %v2931_v42, %v3220_v22 }
 0x1d4   :  { %v3333_v12 = vand.u32 2147483647, %v591_v6  ;;  %v3335_v10 = vand.u32 2147483647, %v592_v30  ;;  %v3350_v11 = vmul.f32 %v2935_v44, %v3220_v22  ;;  %v3354_v52 = vmul.f32 %v2939_v46, %v3220_v22 }
 0x1d5   :  { %5438 = vst [vmem:[#allocation68_spill] sm:$0xff] %v3315_v2  ;;  %v3339_v2 = vmul.f32 %v2927_v40, %v3220_v22  ;;  %5441 = vst [vmem:[#allocation70_spill] sm:$0xff] %v3343_v31  ;;  %v3358_v30 = vmul.f32 %v2943_v48, %v3220_v22  ;;  %v3362_v6 = vmul.f32 %v2952_v53, %v3220_v22 }
 0x1d6   :  { %5442 = vst [vmem:[#allocation71_spill] sm:$0xff] %v3350_v11  ;;  %5443 = vst [vmem:[#allocation72_spill] sm:$0xff] %v3354_v52  ;;  %v3366_v7 = vmul.f32 %v2974_v1, %v3220_v22  ;;  %v3370_v31 = vmul.f32 %v3026_v18, %v3220_v22  ;;  %v3374_v11 = vmul.f32 %v2929_v41, %v3220_v22 }
 0x1d7   :  { %5440 = vst [vmem:[#allocation69_spill] sm:$0xff] %v3339_v2  ;;  %5444 = vst [vmem:[#allocation73_spill] sm:$0xff] %v3358_v30  ;;  %v3378_v52 = vmul.f32 %v2933_v43, %v3220_v22  ;;  %v3382_v30 = vmul.f32 %v2937_v45, %v3220_v22  ;;  %v3402_v2 = vand.u32 2147483647, %v323_v21  ;;  %v5471_v45 = vld [vmem:[#allocation65_spill] sm:$0xff]  ;;  %v5473_v43 = vld [vmem:[#allocation66_spill] sm:$0xff]  ;;  %v611_v44 = vadd.f32 %v3333_v12, %v3321_v55 }
 0x1d8   :  { %5445 = vst [vmem:[#allocation74_spill] sm:$0xff] %v3362_v6  ;;  %5446 = vst [vmem:[#allocation75_spill] sm:$0xff] %v3366_v7  ;;  %v3386_v6 = vmul.f32 %v2941_v47, %v3220_v22  ;;  %v3390_v7 = vmul.f32 %v2945_v49, %v3220_v22  ;;  %v3410_v49 = vand.u32 2147483647, %v339_v25  ;;  %v5469_v47 = vld [vmem:[#allocation64_spill] sm:$0xff] }
 0x1d9   :  { %5447 = vst [vmem:[#allocation76_spill] sm:$0xff] %v3370_v31  ;;  %5448 = vst [vmem:[#allocation77_spill] sm:$0xff] %v3374_v11  ;;  %v3392_v31 = vadd.f32 %v309_v14, %v299_v35  ;;  %v3396_v11 = vmul.f32 %v2955_v56, %v3220_v22  ;;  %v3412_v35 = vand.u32 2147483647, %v340_v19  ;;  %v3414_v14 = vand.u32 2147483647, %v355_v24 }
 0x1da   :  { %5449 = vst [vmem:[#allocation78_spill] sm:$0xff] %v3378_v52  ;;  %5450 = vst [vmem:[#allocation79_spill] sm:$0xff] %v3382_v30  ;;  %v3400_v52 = vmul.f32 %v2980_v5, %v3220_v22  ;;  %v3404_v30 = vand.u32 2147483647, %v324_v20  ;;  %v3420_v5 = vand.u32 2147483647, %v372_v37  ;;  %v5457_v19 = vsub.f32 %v3056_v26, %v3120_v8 }
 0x1db   :  { %5451 = vst [vmem:[#allocation80_spill] sm:$0xff] %v3386_v6  ;;  %5452 = vst [vmem:[#allocation81_spill] sm:$0xff] %v3390_v7  ;;  %v3408_v6 = vmul.f32 %v3058_v27, %v3220_v22  ;;  %v3416_v7 = vand.u32 2147483647, %v356_v15  ;;  %v322_v21 = vrot.slane %v3392_v31, %v2960_v58  ;;  %v338_v25 = vrot.slane %v3392_v31, %v2962_v59  ;;  %v5475_v53 = vld [vmem:[#allocation67_spill] sm:$0xff] }
 0x1dc   :  { %5453 = vst [vmem:[#allocation82_spill] sm:$0xff] %v3392_v31  ;;  %5454 = vst [vmem:[#allocation83_spill] sm:$0xff] %v3396_v11  ;;  %v3418_v11 = vand.u32 2147483647, %v371_v23  ;;  %v3431_v24 = vand.u32 2147483647, %v5457_v19  ;;  %v354_v23 = vrot.slane %v3392_v31, %v2966_v61  ;;  %v370_v37 = vrot.slane %v3392_v31, %v2968_v62 }
 0x1dd   :  { %5455 = vst [vmem:[#allocation84_spill] sm:$0xff] %v3400_v52  ;;  %5456 = vst [vmem:[#allocation85_spill] sm:$0xff] %v3408_v6  ;;  %v386_v58 = vrot.slane %v3392_v31, %v2970_v63  ;;  %v5458_v59 = vsub.f32 %v2964_v60, %v3120_v8  ;;  %v402_v19 = vrot.slane %v3392_v31, %v2972_v0 }
 0x1de   :  { %v5459_v15 = vsub.f32 %v3056_v26, %v3124_v13  ;;  %v5460_v61 = vsub.f32 %v2964_v60, %v3124_v13  ;;  %v418_v63 = vrot.slane %v3392_v31, %v2976_v3  ;;  %v5461_v8 = vsub.f32 %v3056_v26, %v3128_v54  ;;  %v5463_v13 = vld [vmem:[#allocation44_spill] sm:$0xff] }
 0x1df   :  { %v3444_v20 = vand.u32 2147483647, %v5458_v59  ;;  %v5462_v0 = vsub.f32 %v2964_v60, %v3128_v54  ;;  %v5465_v3 = vsub.f32 %v2964_v60, %v5463_v13  ;;  %v326_v60 = vsub.f32 %v3220_v22, %v322_v21 }
 0x1e0   :  { %v3451_v6 = vand.u32 2147483647, %v5459_v15  ;;  %v3456_v62 = vand.u32 2147483647, %v5460_v61  ;;  %v3463_v59 = vand.u32 2147483647, %v5461_v8  ;;  %v434_v15 = vrot.slane %v3392_v31, %v2978_v4 }
 0x1e1   :  { %v3468_v52 = vand.u32 2147483647, %v5462_v0  ;;  %v5464_v61 = vsub.f32 %v3056_v26, %v5463_v13  ;;  %v3480_v56 = vand.u32 2147483647, %v5465_v3  ;;  %v325_v3 = vsub.f32 %v3392_v31, %v322_v21  ;;  %v5466_v0 = vld [vmem:[#allocation62_spill] sm:$0xff]  ;;  %v5467_v26 = vld [vmem:[#allocation63_spill] sm:$0xff] }
 0x1e2   :  { %v3514_v54 = vadd.f32 %v3266_v28, %v3258_v51  ;;  %v3518_v4 = vadd.f32 %v5467_v26, %v5466_v0  ;;  %v3523_v13 = vadd.f32 %v3288_v29, %v5469_v47  ;;  %v3527_v21 = vadd.f32 %v3293_v16, %v5471_v45 }
 0x1e3   :  { %v3475_v27 = vand.u32 2147483647, %v5464_v61  ;;  %v341_v61 = vsub.f32 %v3392_v31, %v338_v25  ;;  %v3531_v8 = vadd.f32 %v3310_v39, %v5473_v43  ;;  %v342_v28 = vsub.f32 %v3220_v22, %v338_v25 }
 0x1e4   :  { %5468 = vst [vmem:[#allocation44_spill] sm:$0xff] %v3518_v4  ;;  %5470 = vst [vmem:[#allocation62_spill] sm:$0xff] %v3523_v13  ;;  %v329_v51 = vand.u32 2147483647, %v325_v3  ;;  %v357_v26 = vsub.f32 %v3392_v31, %v354_v23  ;;  %v358_v0 = vsub.f32 %v3220_v22, %v354_v23  ;;  %v373_v41 = vsub.f32 %v3392_v31, %v370_v37 }
 0x1e5   :  { %5472 = vst [vmem:[#allocation63_spill] sm:$0xff] %v3527_v21  ;;  %5474 = vst [vmem:[#allocation64_spill] sm:$0xff] %v3531_v8  ;;  %v330_v18 = vand.u32 2147483647, %v326_v60  ;;  %v374_v47 = vsub.f32 %v3220_v22, %v370_v37  ;;  %v389_v29 = vsub.f32 %v3392_v31, %v386_v58  ;;  %v390_v45 = vsub.f32 %v3220_v22, %v386_v58  ;;  %v5476_v37 = vld [vmem:[#allocation68_spill] sm:$0xff] }
 0x1e6   :  { %v345_v16 = vand.u32 2147483647, %v341_v61  ;;  %v405_v43 = vsub.f32 %v3392_v31, %v402_v19  ;;  %v406_v39 = vsub.f32 %v3220_v22, %v402_v19  ;;  %v421_v25 = vsub.f32 %v3392_v31, %v418_v63 }
 0x1e7   :  { %v346_v3 = vand.u32 2147483647, %v342_v28  ;;  %v422_v1 = vsub.f32 %v3220_v22, %v418_v63  ;;  %v437_v23 = vsub.f32 %v3392_v31, %v434_v15  ;;  %v438_v60 = vsub.f32 %v3220_v22, %v434_v15 }
 0x1e8   :  { %v3548_v48 = vadd.f32 %v5476_v37, %v5475_v53  ;;  %v361_v46 = vand.u32 2147483647, %v357_v26  ;;  %v362_v58 = vand.u32 2147483647, %v358_v0  ;;  %v377_v61 = vand.u32 2147483647, %v373_v41 }
 0x1e9   :  { %v378_v19 = vand.u32 2147483647, %v374_v47  ;;  %v393_v42 = vand.u32 2147483647, %v389_v29  ;;  %v394_v40 = vand.u32 2147483647, %v390_v45  ;;  %v612_v63 = vadd.f32 %v3335_v10, %v3326_v9 }
 0x1ea   :  { %v409_v28 = vand.u32 2147483647, %v405_v43  ;;  %v410_v8 = vand.u32 2147483647, %v406_v39  ;;  %v425_v21 = vand.u32 2147483647, %v421_v25  ;;  %v443_v53 = vadd.f32 %v3410_v49, %v3402_v2 }
 0x1eb   :  { %v426_v15 = vand.u32 2147483647, %v422_v1  ;;  %v441_v4 = vand.u32 2147483647, %v437_v23  ;;  %v442_v13 = vand.u32 2147483647, %v438_v60  ;;  %v444_v41 = vadd.f32 %v3412_v35, %v3404_v30 }
 0x1ec   :  { %v445_v26 = vadd.f32 %v345_v16, %v329_v51  ;;  %v446_v55 = vadd.f32 %v346_v3, %v330_v18  ;;  %v447_v12 = vadd.f32 %v3418_v11, %v3414_v14  ;;  %v448_v9 = vadd.f32 %v3420_v5, %v3416_v7 }
 0x1ed   :  { %v449_v10 = vadd.f32 %v377_v61, %v361_v46  ;;  %v450_v0 = vadd.f32 %v378_v19, %v362_v58  ;;  %v451_v1 = vadd.f32 %v3451_v6, %v3431_v24  ;;  %v452_v47 = vadd.f32 %v3456_v62, %v3444_v20 }
 0x1ee   :  { %v453_v49 = vadd.f32 %v409_v28, %v393_v42  ;;  %v454_v2 = vadd.f32 %v410_v8, %v394_v40  ;;  %v455_v30 = vadd.f32 %v3475_v27, %v3463_v59  ;;  %v456_v18 = vadd.f32 %v3480_v56, %v3468_v52 }
 0x1ef   :  { %v457_v11 = vadd.f32 %v441_v4, %v425_v21  ;;  %v458_v35 = vadd.f32 %v442_v13, %v426_v15  ;;  %v5477_v46 = vsub.f32 %v3392_v31, %v3256_v17  ;;  %v459_v7 = vadd.f32 %v447_v12, %v443_v53 }
 0x1f0   :  { %v5478_v6 = vsub.f32 %v3220_v22, %v3256_v17  ;;  %v5479_v40 = vsub.f32 %v3392_v31, %v3264_v57  ;;  %v5480_v27 = vsub.f32 %v3220_v22, %v3264_v57  ;;  %v460_v56 = vadd.f32 %v448_v9, %v444_v41 }
 0x1f1   :  { %v485_v5 = vand.u32 2147483647, %v5477_v46  ;;  %v5481_v52 = vsub.f32 %v3392_v31, %v3275_v50  ;;  %v5482_v62 = vsub.f32 %v3220_v22, %v3275_v50  ;;  %v5483_v17 = vsub.f32 %v3392_v31, %v3286_v38 }
 0x1f2   :  { %v486_v14 = vand.u32 2147483647, %v5478_v6  ;;  %v501_v42 = vand.u32 2147483647, %v5479_v40  ;;  %v502_v20 = vand.u32 2147483647, %v5480_v27  ;;  %v463_v4 = vadd.f32 %v455_v30, %v451_v1 }
 0x1f3   :  { %v517_v24 = vand.u32 2147483647, %v5481_v52  ;;  %v518_v59 = vand.u32 2147483647, %v5482_v62  ;;  %v533_v8 = vand.u32 2147483647, %v5483_v17  ;;  %v5484_v13 = vsub.f32 %v3220_v22, %v3286_v38 }
 0x1f4   :  { %v5485_v57 = vsub.f32 %v3392_v31, %v3297_v36  ;;  %v5486_v29 = vsub.f32 %v3220_v22, %v3297_v36  ;;  %v464_v16 = vadd.f32 %v456_v18, %v452_v47  ;;  %v5487_v50 = vsub.f32 %v3392_v31, %v3308_v34  ;;  %v5493_v1 = vld [vmem:[#allocation62_spill] sm:$0xff]  ;;  %v5494_v30 = vld [vmem:[#allocation44_spill] sm:$0xff]  ;;  %v5495_v18 = vld [vmem:[#allocation63_spill] sm:$0xff] }
 0x1f5   :  { %v534_v21 = vand.u32 2147483647, %v5484_v13  ;;  %v5488_v39 = vsub.f32 %v3220_v22, %v3308_v34  ;;  %v5489_v38 = vsub.f32 %v3392_v31, %v3319_v33  ;;  %v5490_v23 = vsub.f32 %v3220_v22, %v3319_v33  ;;  %v5496_v6 = vld [vmem:[#allocation64_spill] sm:$0xff]  ;;  %v5504_v13 = vld [vmem:[#allocation23_spill] sm:$0xff] }
 0x1f6   :  { %v549_v51 = vand.u32 2147483647, %v5485_v57  ;;  %v550_v45 = vand.u32 2147483647, %v5486_v29  ;;  %v565_v43 = vand.u32 2147483647, %v5487_v50  ;;  %v5491_v36 = vsub.f32 %v3392_v31, %v3330_v32 }
 0x1f7   :  { %v566_v25 = vand.u32 2147483647, %v5488_v39  ;;  %v581_v3 = vand.u32 2147483647, %v5489_v38  ;;  %v582_v60 = vand.u32 2147483647, %v5490_v23  ;;  %v5492_v58 = vsub.f32 %v3220_v22, %v3330_v32 }
 0x1f8   :  { %v597_v37 = vand.u32 2147483647, %v5491_v36  ;;  %v601_v19 = vadd.f32 %v501_v42, %v485_v5  ;;  %v602_v28 = vadd.f32 %v502_v20, %v486_v14  ;;  %v605_v34 = vadd.f32 %v533_v8, %v517_v24  ;;  %v5497_v20 = vld [vmem:[#allocation10_spill] sm:$0xff]  ;;  %v5498_v24 = vld [vmem:[#allocation12_spill] sm:$0xff]  ;;  %v5505_v57 = vld [vmem:[#allocation27_spill] sm:$0xff] }
 0x1f9   :  { %v598_v61 = vand.u32 2147483647, %v5492_v58  ;;  %v606_v15 = vadd.f32 %v534_v21, %v518_v59  ;;  %v609_v53 = vadd.f32 %v565_v43, %v549_v51  ;;  %v610_v41 = vadd.f32 %v566_v25, %v550_v45  ;;  %v5506_v29 = vld [vmem:[#allocation11_spill] sm:$0xff]  ;;  %v5509_v50 = vld [vmem:[#allocation13_spill] sm:$0xff] }
 0x1fa   :  { %v613_v12 = vadd.f32 %v597_v37, %v581_v3  ;;  %v615_v33 = vadd.f32 %v5493_v1, %v3514_v54  ;;  %v461_v47 = vadd.f32 %v449_v10, %v445_v26  ;;  %v616_v46 = vadd.f32 %v5495_v18, %v5494_v30  ;;  %v5511_v39 = vld [vmem:[#allocation15_spill] sm:$0xff]  ;;  %v5513_v23 = vld [vmem:[#allocation17_spill] sm:$0xff]  ;;  %v5528_v18 = vld [vmem:[#allocation26_spill] sm:$0xff] }
 0x1fb   :  { %v614_v9 = vadd.f32 %v598_v61, %v582_v60  ;;  %v619_v40 = vadd.f32 %v611_v44, %v5496_v6  ;;  %v620_v32 = vadd.f32 %v612_v63, %v3548_v48  ;;  %v462_v27 = vadd.f32 %v450_v0, %v446_v55  ;;  %v5499_v44 = vld [vmem:[#allocation14_spill] sm:$0xff]  ;;  %v5500_v63 = vld [vmem:[#allocation16_spill] sm:$0xff]  ;;  %v5515_v36 = vld [vmem:[#allocation19_spill] sm:$0xff] }
 0x1fc   :  { %v465_v5 = vadd.f32 %v457_v11, %v453_v49  ;;  %v466_v14 = vadd.f32 %v458_v35, %v454_v2  ;;  %v467_v42 = vadd.f32 %v463_v4, %v459_v7  ;;  %v727_v52 = vmul.f32 %v5497_v20, %v3392_v31  ;;  %v5501_v0 = vld [vmem:[#allocation18_spill] sm:$0xff]  ;;  %v5502_v11 = vld [vmem:[#allocation20_spill] sm:$0xff]  ;;  %v5517_v58 = vld [vmem:[#allocation21_spill] sm:$0xff] }
 0x1fd   :  { %v3628_v62 = vmul.f32 %v5498_v24, %v3392_v31  ;;  %v468_v54 = vadd.f32 %v464_v16, %v460_v56  ;;  %v617_v26 = vadd.f32 %v605_v34, %v601_v19  ;;  %v618_v10 = vadd.f32 %v606_v15, %v602_v28  ;;  %v5519_v19 = vld [vmem:[#allocation24_spill] sm:$0xff]  ;;  %v5526_v1 = vld [vmem:[#allocation25_spill] sm:$0xff]  ;;  %v5529_v6 = vld [vmem:[#allocation47_spill] sm:$0xff] }
 0x1fe   :  { %v621_v59 = vadd.f32 %v613_v12, %v609_v53  ;;  %v622_v17 = vadd.f32 %v614_v9, %v610_v41  ;;  %v623_v8 = vadd.f32 %v619_v40, %v615_v33  ;;  %v3632_v48 = vmul.f32 %v5499_v44, %v3392_v31  ;;  %v5521_v34 = vld [vmem:[#allocation36_spill] sm:$0xff]  ;;  %v5525_v12 = vld [vmem:[#allocation45_spill] sm:$0xff] }
 0x1ff   :  { %v3636_v55 = vmul.f32 %v5500_v63, %v3392_v31  ;;  %v3640_v49 = vmul.f32 %v5501_v0, %v3392_v31  ;;  %v624_v2 = vadd.f32 %v620_v32, %v616_v46  ;;  %v3644_v35 = vmul.f32 %v5502_v11, %v3392_v31  ;;  %v5530_v32 = vld [vmem:[#allocation28_spill] sm:$0xff]  ;;  %v5533_v24 = vld [vmem:[#allocation49_spill] sm:$0xff]  ;;  %v5537_v63 = vld [vmem:[#allocation51_spill] sm:$0xff] }
 0x200   :  { %v469_v7 = vadd.f32 %v465_v5, %v461_v47  ;;  %v470_v56 = vadd.f32 %v466_v14, %v462_v27  ;;  %v3646_v4 = vadd.f32 %v623_v8, %v467_v42  ;;  %v3650_v21 = vmul.f32 %v5504_v13, %v3392_v31  ;;  %v5527_v47 = vld [vmem:[#allocation46_spill] sm:$0xff]  ;;  %v5531_v5 = vld [vmem:[#allocation48_spill] sm:$0xff]  ;;  %v5532_v42 = vld [vmem:[#allocation29_spill] sm:$0xff] }
 0x201   :  { %v3654_v51 = vmul.f32 %v5505_v57, %v3392_v31  ;;  %v3658_v45 = vmul.f32 %v5506_v29, %v3392_v31  ;;  %v3660_v16 = vadd.f32 %v624_v2, %v468_v54  ;;  %v3664_v43 = vmul.f32 %v5509_v50, %v3392_v31  ;;  %v5536_v8 = vld [vmem:[#allocation31_spill] sm:$0xff]  ;;  %v5538_v2 = vld [vmem:[#allocation32_spill] sm:$0xff]  ;;  %v5540_v13 = vld [vmem:[#allocation33_spill] sm:$0xff] }
 0x202   :  { %5503 = vst [vmem:[#allocation65_spill] sm:$0xff] %v3646_v4  ;;  %v3668_v25 = vmul.f32 %v5511_v39, %v3392_v31  ;;  %v625_v38 = vadd.f32 %v621_v59, %v617_v26  ;;  %v626_v3 = vadd.f32 %v622_v17, %v618_v10  ;;  %v3672_v60 = vmul.f32 %v5513_v23, %v3392_v31  ;;  %v5534_v26 = vld [vmem:[#allocation30_spill] sm:$0xff] }
 0x203   :  { %5507 = vst [vmem:[#allocation66_spill] sm:$0xff] %v3658_v45  ;;  %5508 = vst [vmem:[#allocation67_spill] sm:$0xff] %v3660_v16  ;;  %v3676_v37 = vmul.f32 %v5515_v36, %v3392_v31  ;;  %v3680_v61 = vmul.f32 %v5517_v58, %v3392_v31  ;;  %v3684_v28 = vmul.f32 %v5519_v19, %v3392_v31  ;;  %v5535_v59 = vld [vmem:[#allocation50_spill] sm:$0xff] }
 0x204   :  { %5510 = vst [vmem:[#allocation68_spill] sm:$0xff] %v3664_v43  ;;  %5512 = vst [vmem:[#allocation62_spill] sm:$0xff] %v3668_v25  ;;  %v3688_v15 = vmul.f32 %v5521_v34, %v3392_v31  ;;  %v3690_v53 = vadd.f32 %v625_v38, %v469_v7  ;;  %v3692_v41 = vadd.f32 %v626_v3, %v470_v56  ;;  %v5539_v7 = vld [vmem:[#allocation52_spill] sm:$0xff] }
 0x205   :  { %5514 = vst [vmem:[#allocation44_spill] sm:$0xff] %v3672_v60  ;;  %5516 = vst [vmem:[#allocation63_spill] sm:$0xff] %v3676_v37  ;;  %v3696_v9 = vsub.f32 %v5525_v12, %v3646_v4  ;;  %v3700_v33 = vsub.f32 %v5526_v1, %v3660_v16  ;;  %v3704_v30 = vsub.f32 %v5527_v47, %v3646_v4 }
 0x206   :  { %5518 = vst [vmem:[#allocation64_spill] sm:$0xff] %v3680_v61  ;;  %5520 = vst [vmem:[#allocation10_spill] sm:$0xff] %v3684_v28  ;;  %v3708_v46 = vsub.f32 %v5528_v18, %v3660_v16  ;;  %v3712_v40 = vsub.f32 %v5529_v6, %v3646_v4  ;;  %v3716_v27 = vsub.f32 %v5530_v32, %v3660_v16 }
 0x207   :  { %5522 = vst [vmem:[#allocation12_spill] sm:$0xff] %v3688_v15  ;;  %5523 = vst [vmem:[#allocation14_spill] sm:$0xff] %v3690_v53  ;;  %v3720_v14 = vsub.f32 %v5531_v5, %v3646_v4  ;;  %v3724_v20 = vsub.f32 %v5532_v42, %v3660_v16  ;;  %v3728_v54 = vsub.f32 %v5533_v24, %v3646_v4  ;;  %v775_v50 = vsel %vm209_vm2, %v3696_v9, -inf  ;;  %v5553_v15 = vld [vmem:[#allocation74_spill] sm:$0xff] }
 0x208   :  { %5524 = vst [vmem:[#allocation16_spill] sm:$0xff] %v3692_v41  ;;  %v3732_v10 = vsub.f32 %v5534_v26, %v3660_v16  ;;  %v3736_v17 = vsub.f32 %v5535_v59, %v3646_v4  ;;  %v3740_v44 = vsub.f32 %v5536_v8, %v3660_v16  ;;  %v3744_v0 = vsub.f32 %v5537_v63, %v3646_v4 }
 0x209   :  { %v3748_v11 = vsub.f32 %v5538_v2, %v3660_v16  ;;  %v3752_v56 = vsub.f32 %v5539_v7, %v3646_v4  ;;  %v3756_v57 = vsub.f32 %v5540_v13, %v3660_v16  ;;  %v3759_v29 = vsub.f32 %v727_v52, %v3690_v53  ;;  %v5541_v7 = vld [vmem:[#allocation69_spill] sm:$0xff] }
 0x20a   :  { %v776_v39 = vsel %vm209_vm2, %v3700_v33, -inf  ;;  %v784_v38 = vsel %vm209_vm2, %v3704_v30, -inf  ;;  %v785_v3 = vsel %vm209_vm2, %v3708_v46, -inf  ;;  %v793_v58 = vsel %vm209_vm2, %v3712_v40, -inf }
 0x20b   :  { %v777_v23 = vmax.f32 %v775_v50, %v776_v39  ;;  %v786_v36 = vmax.f32 %v784_v38, %v785_v3  ;;  %v794_v52 = vsel %vm209_vm2, %v3716_v27, -inf  ;;  %v802_v34 = vsel %vm209_vm2, %v3720_v14, -inf }
 0x20c   :  { %v795_v19 = vmax.f32 %v793_v58, %v794_v52  ;;  %v803_v12 = vsel %vm209_vm2, %v3724_v20, -inf  ;;  %v811_v1 = vsel %vm209_vm2, %v3728_v54, -inf  ;;  %v812_v32 = vsel %vm209_vm2, %v3732_v10, -inf }
 0x20d   :  { %v778_v47 = vrot.slane %v777_v23, 4  ;;  %v787_v18 = vrot.slane %v786_v36, 4  ;;  %v804_v6 = vmax.f32 %v802_v34, %v803_v12  ;;  %v813_v42 = vmax.f32 %v811_v1, %v812_v32 }
 0x20e   :  { %v796_v5 = vrot.slane %v795_v19, 4  ;;  %v820_v24 = vsel %vm209_vm2, %v3736_v17, -inf  ;;  %v821_v26 = vsel %vm209_vm2, %v3740_v44, -inf  ;;  %v3787_v13 = vsub.f32 %v5541_v7, %v3692_v41 }
 0x20f   :  { %v779_v59 = vmax.f32 %v777_v23, %v778_v47  ;;  %v788_v8 = vmax.f32 %v786_v36, %v787_v18  ;;  %v805_v63 = vrot.slane %v804_v6, 4  ;;  %v822_v2 = vmax.f32 %v820_v24, %v821_v26  ;;  %v5542_v36 = vld [vmem:[#allocation70_spill] sm:$0xff]  ;;  %v5547_v26 = vld [vmem:[#allocation72_spill] sm:$0xff] }
 0x210   :  { %v3791_v50 = vsub.f32 %v3628_v62, %v3690_v53  ;;  %v797_v39 = vmax.f32 %v795_v19, %v796_v5  ;;  %v814_v38 = vrot.slane %v813_v42, 4  ;;  %v829_v52 = vsel %vm209_vm2, %v3744_v0, -inf  ;;  %v5544_v19 = vld [vmem:[#allocation71_spill] sm:$0xff] }
 0x211   :  { %v780_v3 = vrot.slane %v779_v59, 2  ;;  %v789_v58 = vrot.slane %v788_v8, 2  ;;  %v830_v23 = vsel %vm209_vm2, %v3748_v11, -inf  ;;  %v3799_v34 = vsub.f32 %v5542_v36, %v3692_v41 }
 0x212   :  { %v3803_v12 = vsub.f32 %v3632_v48, %v3690_v53  ;;  %v806_v62 = vmax.f32 %v804_v6, %v805_v63  ;;  %v823_v1 = vrot.slane %v822_v2, 4  ;;  %v3807_v47 = vsub.f32 %v5544_v19, %v3692_v41 }
 0x213   :  { %v798_v18 = vrot.slane %v797_v39, 2  ;;  %v815_v32 = vmax.f32 %v813_v42, %v814_v38  ;;  %v838_v5 = vsel %vm209_vm2, %v3752_v56, -inf  ;;  %v3813_v24 = vsub.f32 %v3636_v55, %v3690_v53  ;;  %v5550_v42 = vld [vmem:[#allocation73_spill] sm:$0xff] }
 0x214   :  { %5543 = vst [vmem:[#allocation18_spill] sm:$0xff] %v3803_v12  ;;  %5545 = vst [vmem:[#allocation20_spill] sm:$0xff] %v3807_v47  ;;  %v3817_v7 = vsub.f32 %v5547_v26, %v3692_v41  ;;  %v831_v48 = vmax.f32 %v829_v52, %v830_v23  ;;  %v839_v6 = vsel %vm209_vm2, %v3756_v57, -inf  ;;  %v3823_v63 = vsub.f32 %v3640_v49, %v3690_v53 }
 0x215   :  { %5546 = vst [vmem:[#allocation23_spill] sm:$0xff] %v3813_v24  ;;  %v3827_v38 = vsub.f32 %v5550_v42, %v3692_v41  ;;  %v781_v36 = vmax.f32 %v779_v59, %v780_v3  ;;  %v3829_v19 = vmax.f32 %v788_v8, %v789_v58  ;;  %v3833_v55 = vsub.f32 %v3644_v35, %v3690_v53  ;;  %v5556_v8 = vld [vmem:[#allocation75_spill] sm:$0xff] }
 0x216   :  { %5548 = vst [vmem:[#allocation27_spill] sm:$0xff] %v3817_v7  ;;  %5549 = vst [vmem:[#allocation11_spill] sm:$0xff] %v3823_v63  ;;  %v807_v26 = vrot.slane %v806_v62, 2  ;;  %v824_v52 = vmax.f32 %v822_v2, %v823_v1  ;;  %v840_v23 = vmax.f32 %v838_v5, %v839_v6  ;;  %v3837_v28 = vsub.f32 %v5553_v15, %v3692_v41  ;;  %v5557_v2 = vld [vmem:[#allocation76_spill] sm:$0xff] }
 0x217   :  { %5551 = vst [vmem:[#allocation13_spill] sm:$0xff] %v3827_v38  ;;  %5552 = vst [vmem:[#allocation15_spill] sm:$0xff] %v3833_v55  ;;  %v3841_v49 = vsub.f32 %v3650_v21, %v3690_v53  ;;  %v3843_v42 = vmax.f32 %v797_v39, %v798_v18  ;;  %v816_v59 = vrot.slane %v815_v32, 2  ;;  %v3847_v3 = vsub.f32 %v5556_v8, %v3692_v41 }
 0x218   :  { %5554 = vst [vmem:[#allocation17_spill] sm:$0xff] %v3837_v28  ;;  %v3851_v35 = vsub.f32 %v3654_v51, %v3690_v53  ;;  %v3855_v58 = vsub.f32 %v5557_v2, %v3692_v41  ;;  %v832_v15 = vrot.slane %v831_v48, 4  ;;  %v782_v1 = vrot.slane %v781_v36, 1 }
 0x219   :  { %5555 = vst [vmem:[#allocation19_spill] sm:$0xff] %v3841_v49  ;;  %v847_v39 = vsel %vm209_vm2, %v3759_v29, -inf  ;;  %v848_v18 = vsel %vm209_vm2, %v3787_v13, -inf  ;;  %v3862_v5 = vmax.f32 %v806_v62, %v807_v26  ;;  %v825_v6 = vrot.slane %v824_v52, 2 }
 0x21a   :  { %v841_v8 = vrot.slane %v840_v23, 4  ;;  %v849_v51 = vmax.f32 %v847_v39, %v848_v18  ;;  %v3865_v37 = vmax.f32 %v815_v32, %v816_v59  ;;  %v856_v2 = vsel %vm209_vm2, %v3791_v50, -inf }
 0x21b   :  { %v857_v21 = vsel %vm209_vm2, %v3799_v34, -inf  ;;  %v833_v60 = vmax.f32 %v831_v48, %v832_v15  ;;  %v865_v62 = vsel %vm209_vm2, %v3803_v12, -inf  ;;  %v866_v26 = vsel %vm209_vm2, %v3807_v47, -inf }
 0x21c   :  { %v850_v25 = vrot.slane %v849_v51, 4  ;;  %v858_v43 = vmax.f32 %v856_v2, %v857_v21  ;;  %v874_v39 = vsel %vm209_vm2, %v3813_v24, -inf  ;;  %v875_v32 = vsel %vm209_vm2, %v3817_v7, -inf }
 0x21d   :  { %v883_v59 = vsel %vm209_vm2, %v3823_v63, -inf  ;;  %v3881_v18 = vmax.f32 %v781_v36, %v782_v1  ;;  %v842_v48 = vmax.f32 %v840_v23, %v841_v8  ;;  %v809_v2 = vrot.slane %v3862_v5, 1 }
 0x21e   :  { %v851_v15 = vmax.f32 %v849_v51, %v850_v25  ;;  %v859_v21 = vrot.slane %v858_v43, 4  ;;  %v867_v61 = vmax.f32 %v865_v62, %v866_v26  ;;  %v876_v41 = vmax.f32 %v874_v39, %v875_v32 }
 0x21f   :  { %v884_v45 = vsel %vm209_vm2, %v3827_v38, -inf  ;;  %v834_v53 = vrot.slane %v833_v60, 2  ;;  %v892_v16 = vsel %vm209_vm2, %v3833_v55, -inf  ;;  %v893_v36 = vsel %vm209_vm2, %v3837_v28, -inf }
 0x220   :  { %v860_v22 = vmax.f32 %v858_v43, %v859_v21  ;;  %v885_v31 = vmax.f32 %v883_v59, %v884_v45  ;;  %v868_v4 = vrot.slane %v867_v61, 4  ;;  %v877_v63 = vrot.slane %v876_v41, 4 }
 0x221   :  { %v901_v25 = vsel %vm209_vm2, %v3841_v49, -inf  ;;  %v843_v23 = vrot.slane %v842_v48, 2  ;;  %v852_v1 = vrot.slane %v851_v15, 2  ;;  %v894_v39 = vmax.f32 %v892_v16, %v893_v36 }
 0x222   :  { %v861_v8 = vrot.slane %v860_v22, 2  ;;  %v886_v51 = vrot.slane %v885_v31, 4  ;;  %v869_v62 = vmax.f32 %v867_v61, %v868_v4  ;;  %v878_v26 = vmax.f32 %v876_v41, %v877_v63 }
 0x223   :  { %v902_v45 = vsel %vm209_vm2, %v3847_v3, -inf  ;;  %v826_v43 = vmax.f32 %v824_v52, %v825_v6  ;;  %v835_v32 = vmax.f32 %v833_v60, %v834_v53  ;;  %v895_v28 = vrot.slane %v894_v39, 4 }
 0x224   :  { %v887_v59 = vmax.f32 %v885_v31, %v886_v51  ;;  %v903_v21 = vmax.f32 %v901_v25, %v902_v45  ;;  %v870_v55 = vrot.slane %v869_v62, 2  ;;  %v879_v38 = vrot.slane %v878_v26, 2 }
 0x225   :  { %v910_v49 = vsel %vm209_vm2, %v3851_v35, -inf  ;;  %v844_v7 = vmax.f32 %v842_v48, %v843_v23  ;;  %v853_v24 = vmax.f32 %v851_v15, %v852_v1  ;;  %v818_v4 = vrot.slane %v3865_v37, 1 }
 0x226   :  { %v888_v47 = vrot.slane %v887_v59, 2  ;;  %v904_v12 = vrot.slane %v903_v21, 4  ;;  %v862_v16 = vmax.f32 %v860_v22, %v861_v8  ;;  %v896_v61 = vmax.f32 %v894_v39, %v895_v28 }
 0x227   :  { %v911_v41 = vsel %vm209_vm2, %v3855_v58, -inf  ;;  %v871_v60 = vmax.f32 %v869_v62, %v870_v55  ;;  %v880_v31 = vmax.f32 %v878_v26, %v879_v38  ;;  %v827_v52 = vrot.slane %v826_v43, 1 }
 0x228   :  { %v905_v53 = vmax.f32 %v903_v21, %v904_v12  ;;  %v912_v63 = vmax.f32 %v910_v49, %v911_v41  ;;  %v836_v6 = vrot.slane %v835_v32, 1  ;;  %v889_v36 = vmax.f32 %v887_v59, %v888_v47 }
 0x229   :  { %v897_v25 = vrot.slane %v896_v61, 2  ;;  %v845_v51 = vrot.slane %v844_v7, 1  ;;  %v854_v48 = vrot.slane %v853_v24, 1  ;;  %v5558_v1 = vrot.slane %v3829_v19, 1 }
 0x22a   :  { %v906_v15 = vrot.slane %v905_v53, 2  ;;  %v913_v23 = vrot.slane %v912_v63, 4  ;;  %v5559_v28 = vrot.slane %v3843_v42, 1  ;;  %v863_v55 = vrot.slane %v862_v16, 1 }
 0x22b   :  { %v792_v22 = vmax.f32 %v3829_v19, %v5558_v1  ;;  %v898_v38 = vmax.f32 %v896_v61, %v897_v25  ;;  %v872_v12 = vrot.slane %v871_v60, 1  ;;  %v881_v49 = vrot.slane %v880_v31, 1 }
 0x22c   :  { %v801_v8 = vmax.f32 %v3843_v42, %v5559_v28  ;;  %v907_v62 = vmax.f32 %v905_v53, %v906_v15  ;;  %v914_v26 = vmax.f32 %v912_v63, %v913_v23  ;;  %v810_v47 = vmax.f32 %v3862_v5, %v809_v2 }
 0x22d   :  { %v819_v39 = vmax.f32 %v3865_v37, %v818_v4  ;;  %v3907_v45 = vmax.f32 %v826_v43, %v827_v52  ;;  %v890_v59 = vrot.slane %v889_v36, 1  ;;  %v3909_v21 = vmax.f32 %v835_v32, %v836_v6 }
 0x22e   :  { %v3911_v19 = vmax.f32 %v844_v7, %v845_v51  ;;  %v3913_v41 = vmax.f32 %v853_v24, %v854_v48  ;;  %v915_v42 = vrot.slane %v914_v26, 2  ;;  %v3915_v1 = vmax.f32 %v862_v16, %v863_v55  ;;  %v5561_v48 = vld [vmem:[#allocation20_spill] sm:$0xff] }
 0x22f   :  { %v899_v61 = vrot.slane %v898_v38, 1  ;;  %v919_v53 = vsub.f32 %v3696_v9, %v3881_v18  ;;  %v920_v5 = vsub.f32 %v3700_v33, %v3881_v18  ;;  %v3921_v37 = vmax.f32 %v871_v60, %v872_v12  ;;  %v5565_v12 = vld [vmem:[#allocation13_spill] sm:$0xff] }
 0x230   :  { %v3923_v2 = vmax.f32 %v880_v31, %v881_v49  ;;  %v908_v43 = vrot.slane %v907_v62, 1  ;;  %v921_v7 = vsub.f32 %v3704_v30, %v792_v22  ;;  %v3926_v32 = vmax.f32 %v889_v36, %v890_v59  ;;  %v5568_v59 = vld [vmem:[#allocation19_spill] sm:$0xff] }
 0x231   :  { %v916_v24 = vmax.f32 %v914_v26, %v915_v42  ;;  %v922_v4 = vsub.f32 %v3708_v46, %v792_v22  ;;  %v923_v16 = vsub.f32 %v3712_v40, %v801_v8  ;;  %v924_v63 = vsub.f32 %v3716_v27, %v801_v8 }
 0x232   :  { %v925_v9 = vsub.f32 %v3720_v14, %v810_v47  ;;  %v926_v33 = vsub.f32 %v3724_v20, %v810_v47  ;;  %v927_v18 = vsub.f32 %v3728_v54, %v819_v39  ;;  %v3934_v60 = vmax.f32 %v898_v38, %v899_v61 }
 0x233   :  { %v928_v31 = vsub.f32 %v3732_v10, %v819_v39  ;;  %v929_v30 = vsub.f32 %v3736_v17, %v3907_v45  ;;  %v930_v46 = vsub.f32 %v3740_v44, %v3907_v45  ;;  %v3941_v52 = vmax.f32 %v907_v62, %v908_v43  ;;  %v5566_v62 = vld [vmem:[#allocation15_spill] sm:$0xff]  ;;  %v5567_v39 = vld [vmem:[#allocation17_spill] sm:$0xff] }
 0x234   :  { %v931_v40 = vsub.f32 %v3744_v0, %v3909_v21  ;;  %v932_v27 = vsub.f32 %v3748_v11, %v3909_v21  ;;  %v933_v14 = vsub.f32 %v3752_v56, %v3911_v19  ;;  %v917_v20 = vrot.slane %v916_v24, 1 }
 0x235   :  { %v934_v54 = vsub.f32 %v3756_v57, %v3911_v19  ;;  %v951_v10 = vmul.f32 1.442695, %v919_v53  ;;  %v953_v17 = vmul.f32 1.442695, %v920_v5  ;;  %v935_v44 = vsub.f32 %v3759_v29, %v3913_v41  ;;  %v5560_v57 = vld [vmem:[#allocation18_spill] sm:$0xff] }
 0x236   :  { %v936_v6 = vsub.f32 %v3787_v13, %v3913_v41  ;;  %v955_v36 = vmul.f32 1.442695, %v921_v7  ;;  %v957_v0 = vmul.f32 1.442695, %v922_v4  ;;  %v937_v11 = vsub.f32 %v3791_v50, %v3915_v1  ;;  %v5562_v13 = vld [vmem:[#allocation23_spill] sm:$0xff] }
 0x237   :  { %v938_v56 = vsub.f32 %v3799_v34, %v3915_v1  ;;  %2510 = vpow2.f32 %v951_v10  ;;  %v959_v25 = vmul.f32 1.442695, %v923_v16  ;;  %v939_v51 = vsub.f32 %v5560_v57, %v3921_v37  ;;  %v5563_v50 = vld [vmem:[#allocation27_spill] sm:$0xff] }
 0x238   :  { %v940_v15 = vsub.f32 %v5561_v48, %v3921_v37  ;;  %2512 = vpow2.f32 %v953_v17  ;;  %v961_v29 = vmul.f32 1.442695, %v924_v63  ;;  %v918_v23 = vmax.f32 %v916_v24, %v917_v20  ;;  %v5564_v34 = vld [vmem:[#allocation11_spill] sm:$0xff]  ;;  %v5570_v20 = vld [vmem:[#allocation53_spill] sm:$0xff] }
 0x239   :  { %v941_v22 = vsub.f32 %v5562_v13, %v3923_v2  ;;  %2514 = vpow2.f32 %v955_v36  ;;  %v963_v28 = vmul.f32 1.442695, %v925_v9  ;;  %v942_v8 = vsub.f32 %v5563_v50, %v3923_v2 }
 0x23a   :  { %v943_v55 = vsub.f32 %v5564_v34, %v3926_v32  ;;  %2516 = vpow2.f32 %v957_v0  ;;  %v965_v38 = vmul.f32 1.442695, %v926_v33  ;;  %v944_v49 = vsub.f32 %v5565_v12, %v3926_v32  ;;  %v5575_v0 = vld [vmem:[#allocation54_spill] sm:$0xff] }
 0x23b   :  { %v945_v26 = vsub.f32 %v5566_v62, %v3934_v60  ;;  %2518 = vpow2.f32 %v959_v25  ;;  %v967_v47 = vmul.f32 1.442695, %v927_v18  ;;  %v946_v45 = vsub.f32 %v5567_v39, %v3934_v60 }
 0x23c   :  { %v947_v21 = vsub.f32 %v5568_v59, %v3941_v52  ;;  %2520 = vpow2.f32 %v961_v29  ;;  %v969_v19 = vmul.f32 1.442695, %v928_v31  ;;  %v948_v41 = vsub.f32 %v3847_v3, %v3941_v52  ;;  %v5587_v59 = vld [vmem:[#allocation57_spill] sm:$0xff] }
 0x23d   :  { %v949_v42 = vsub.f32 %v3851_v35, %v918_v23  ;;  %2522 = vpow2.f32 %v963_v28  ;;  %v971_v1 = vmul.f32 1.442695, %v929_v30  ;;  %v950_v61 = vsub.f32 %v3855_v58, %v918_v23  ;;  %v5579_v23 = vld [vmem:[#allocation55_spill] sm:$0xff] }
 0x23e   :  { %2524 = vpow2.f32 %v965_v38  ;;  %v973_v53 = vmul.f32 1.442695, %v930_v46  ;;  %v975_v5 = vmul.f32 1.442695, %v931_v40  ;;  %v977_v37 = vmul.f32 1.442695, %v932_v27 }
 0x23f   :  { %2526 = vpow2.f32 %v967_v47  ;;  %v979_v2 = vmul.f32 1.442695, %v933_v14  ;;  %v981_v43 = vmul.f32 1.442695, %v934_v54  ;;  %v983_v7 = vmul.f32 1.442695, %v935_v44 }
 0x240   :  { %2528 = vpow2.f32 %v969_v19  ;;  %v985_v32 = vmul.f32 1.442695, %v936_v6  ;;  %v987_v24 = vmul.f32 1.442695, %v937_v11  ;;  %v989_v4 = vmul.f32 1.442695, %v938_v56 }
 0x241   :  { %2530 = vpow2.f32 %v971_v1  ;;  %v991_v3 = vmul.f32 1.442695, %v939_v51  ;;  %v993_v16 = vmul.f32 1.442695, %v940_v15  ;;  %v995_v35 = vmul.f32 1.442695, %v941_v22 }
 0x242   :  { %2532 = vpow2.f32 %v973_v53  ;;  %v997_v63 = vmul.f32 1.442695, %v942_v8  ;;  %v999_v9 = vmul.f32 1.442695, %v943_v55  ;;  %v3981_v58 = vmul.f32 1.442695, %v944_v49 }
 0x243   :  { %2534 = vpow2.f32 %v975_v5  ;;  %v3983_v33 = vmul.f32 1.442695, %v945_v26  ;;  %v3985_v18 = vmul.f32 1.442695, %v946_v45  ;;  %v3987_v31 = vmul.f32 1.442695, %v947_v21 }
 0x244   :  { %v2511_v60 = vpop.eup %2510  ;;  %2536 = vpow2.f32 %v977_v37  ;;  %v3989_v30 = vmul.f32 1.442695, %v948_v41  ;;  %v3991_v46 = vmul.f32 1.442695, %v949_v42  ;;  %v3993_v40 = vmul.f32 1.442695, %v950_v61 }
 0x245   :  { %v2513_v52 = vpop.eup %2512  ;;  %2538 = vpow2.f32 %v979_v2  ;;  %v1015_v27 = vsel %vm209_vm2, %v2511_v60, 0.0  ;;  %v5569_v14 = vld [vmem:[#allocation65_spill] sm:$0xff]  ;;  %v5572_v44 = vld [vmem:[#allocation67_spill] sm:$0xff]  ;;  %v5573_v6 = vld [vmem:[#allocation34_spill] sm:$0xff] }
 0x246   :  { %v3998_v54 = vsub.f32 %v5570_v20, %v5569_v14  ;;  %v4000_v10 = vpop.eup %2514  ;;  %2540 = vpow2.f32 %v981_v43  ;;  %v1016_v17 = vsel %vm209_vm2, %v2513_v52, 0.0  ;;  %v4005_v36 = vsub.f32 %v5573_v6, %v5572_v44  ;;  %v5577_v51 = vld [vmem:[#allocation37_spill] sm:$0xff]  ;;  %v5581_v22 = vld [vmem:[#allocation38_spill] sm:$0xff]  ;;  %v5583_v55 = vld [vmem:[#allocation56_spill] sm:$0xff] }
 0x247   :  { %v4009_v11 = vsub.f32 %v5575_v0, %v5569_v14  ;;  %v4011_v56 = vpop.eup %2516  ;;  %2542 = vpow2.f32 %v983_v7  ;;  %v1017_v25 = vadd.f32 %v1016_v17, %v1015_v27  ;;  %v1024_v57 = vsel %vm209_vm2, %v4000_v10, 0.0  ;;  %v5585_v26 = vld [vmem:[#allocation39_spill] sm:$0xff]  ;;  %v5589_v19 = vld [vmem:[#allocation40_spill] sm:$0xff]  ;;  %v5591_v53 = vld [vmem:[#allocation58_spill] sm:$0xff] }
 0x248   :  { %5571 = vst [vmem:[#allocation21_spill] sm:$0xff] %v3998_v54  ;;  %5574 = vst [vmem:[#allocation24_spill] sm:$0xff] %v4005_v36  ;;  %v4017_v48 = vsub.f32 %v5577_v51, %v5572_v44  ;;  %v4019_v15 = vpop.eup %2518  ;;  %2544 = vpow2.f32 %v985_v32  ;;  %v1025_v29 = vsel %vm209_vm2, %v4011_v56, 0.0  ;;  %v4025_v13 = vsub.f32 %v5579_v23, %v5569_v14  ;;  %v5593_v27 = vld [vmem:[#allocation35_spill] sm:$0xff] }
 0x249   :  { %5576 = vst [vmem:[#allocation36_spill] sm:$0xff] %v4009_v11  ;;  %v4029_v28 = vsub.f32 %v5581_v22, %v5572_v44  ;;  %v4031_v50 = vpop.eup %2520  ;;  %2546 = vpow2.f32 %v987_v24  ;;  %v1018_v8 = vrot.slane %v1017_v25, 4  ;;  %v1026_v34 = vadd.f32 %v1025_v29, %v1024_v57  ;;  %v5596_v6 = vld [vmem:[#allocation59_spill] sm:$0xff]  ;;  %v5598_v57 = vld [vmem:[#allocation22_spill] sm:$0xff] }
 0x24a   :  { %5578 = vst [vmem:[#allocation45_spill] sm:$0xff] %v4017_v48  ;;  %5580 = vst [vmem:[#allocation25_spill] sm:$0xff] %v4025_v13  ;;  %v4035_v38 = vsub.f32 %v5583_v55, %v5569_v14  ;;  %v4037_v12 = vpop.eup %2522  ;;  %2548 = vpow2.f32 %v989_v4  ;;  %v1033_v49 = vsel %vm209_vm2, %v4019_v15, 0.0  ;;  %v1034_v62 = vsel %vm209_vm2, %v4031_v50, 0.0  ;;  %v5599_v29 = vld [vmem:[#allocation42_spill] sm:$0xff] }
 0x24b   :  { %5582 = vst [vmem:[#allocation46_spill] sm:$0xff] %v4029_v28  ;;  %v4045_v47 = vsub.f32 %v5585_v26, %v5572_v44  ;;  %v4047_v39 = vpop.eup %2524  ;;  %2550 = vpow2.f32 %v991_v3  ;;  %v1019_v45 = vadd.f32 %v1018_v8, %v1017_v25  ;;  %v4051_v21 = vsub.f32 %v5587_v59, %v5569_v14 }
 0x24c   :  { %5584 = vst [vmem:[#allocation26_spill] sm:$0xff] %v4035_v38  ;;  %v4055_v41 = vsub.f32 %v5589_v19, %v5572_v44  ;;  %v4057_v42 = vpop.eup %2526  ;;  %2552 = vpow2.f32 %v993_v16  ;;  %v1042_v1 = vsel %vm209_vm2, %v4037_v12, 0.0  ;;  %v1043_v61 = vsel %vm209_vm2, %v4047_v39, 0.0 }
 0x24d   :  { %5586 = vst [vmem:[#allocation47_spill] sm:$0xff] %v4045_v47  ;;  %5588 = vst [vmem:[#allocation28_spill] sm:$0xff] %v4051_v21  ;;  %v4065_v5 = vsub.f32 %v5591_v53, %v5569_v14  ;;  %v4067_v37 = vpop.eup %2528  ;;  %2554 = vpow2.f32 %v995_v35  ;;  %v1020_v2 = vrot.slane %v1019_v45, 2  ;;  %v1027_v43 = vrot.slane %v1026_v34, 4  ;;  %v5594_v35 = vld [vmem:[#allocation41_spill] sm:$0xff] }
 0x24e   :  { %5590 = vst [vmem:[#allocation48_spill] sm:$0xff] %v4055_v41  ;;  %v1035_v7 = vadd.f32 %v1034_v62, %v1033_v49  ;;  %v4069_v32 = vpop.eup %2530  ;;  %2556 = vpow2.f32 %v997_v63  ;;  %v1044_v24 = vadd.f32 %v1043_v61, %v1042_v1  ;;  %v1051_v4 = vsel %vm209_vm2, %v4057_v42, 0.0  ;;  %v5603_v49 = vld [vmem:[#allocation43_spill] sm:$0xff] }
 0x24f   :  { %5592 = vst [vmem:[#allocation29_spill] sm:$0xff] %v4065_v5  ;;  %v1052_v3 = vsel %vm209_vm2, %v4067_v37, 0.0  ;;  %v4075_v16 = vpop.eup %2532  ;;  %2558 = vpow2.f32 %v999_v9  ;;  %v1159_v20 = vmul.f32 %v2511_v60, %v5593_v27  ;;  %v4080_v17 = vsub.f32 %v5594_v35, %v5572_v44  ;;  %v5601_v9 = vld [vmem:[#allocation60_spill] sm:$0xff] }
 0x250   :  { %v4084_v0 = vsub.f32 %v5596_v6, %v5569_v14  ;;  %v4086_v63 = vpop.eup %2534  ;;  %v1053_v25 = vadd.f32 %v1052_v3, %v1051_v4  ;;  %v4089_v51 = vmul.f32 %v2513_v52, %v5598_v57  ;;  %v4093_v23 = vsub.f32 %v5599_v29, %v5572_v44 }
 0x251   :  { %5595 = vst [vmem:[#allocation49_spill] sm:$0xff] %v4080_v17  ;;  %v4097_v60 = vsub.f32 %v5601_v9, %v5569_v14  ;;  %v4099_v22 = vpop.eup %2536  ;;  %2560 = vpow2.f32 %v3981_v58  ;;  %v1028_v8 = vadd.f32 %v1027_v43, %v1026_v34  ;;  %v1060_v55 = vsel %vm209_vm2, %v4069_v32, 0.0 }
 0x252   :  { %5597 = vst [vmem:[#allocation30_spill] sm:$0xff] %v4084_v0  ;;  %5600 = vst [vmem:[#allocation50_spill] sm:$0xff] %v4093_v23  ;;  %v4106_v52 = vsub.f32 %v5603_v49, %v5572_v44  ;;  %v4108_v62 = vpop.eup %2538  ;;  %v1021_v26 = vadd.f32 %v1020_v2, %v1019_v45  ;;  %v1036_v59 = vrot.slane %v1035_v7, 4  ;;  %v1045_v19 = vrot.slane %v1044_v24, 4 }
 0x253   :  { %5602 = vst [vmem:[#allocation31_spill] sm:$0xff] %v4097_v60  ;;  %v1061_v14 = vsel %vm209_vm2, %v4075_v16, 0.0  ;;  %v4112_v1 = vpop.eup %2540  ;;  %2562 = vpow2.f32 %v3983_v33  ;;  %v4117_v58 = vmul.f32 %v4000_v10, %v5593_v27  ;;  %v4121_v44 = vmul.f32 %v4011_v56, %v5598_v57 }
 0x254   :  { %5604 = vst [vmem:[#allocation51_spill] sm:$0xff] %v4106_v52  ;;  %v4124_v34 = vsel %vm209_vm2, %v1159_v20, 0.0  ;;  %v4126_v45 = vpop.eup %2542  ;;  %2564 = vpow2.f32 %v3985_v18  ;;  %v1054_v61 = vrot.slane %v1053_v25, 4  ;;  %v1062_v53 = vadd.f32 %v1061_v14, %v1060_v55 }
 0x255   :  { %5605 = vst [vmem:[#allocation32_spill] sm:$0xff] %v4117_v58  ;;  %5606 = vst [vmem:[#allocation52_spill] sm:$0xff] %v4121_v44  ;;  %v4131_v33 = vmul.f32 %v4019_v15, %v5593_v27  ;;  %v4133_v2 = vpop.eup %2544  ;;  %2566 = vpow2.f32 %v3987_v31  ;;  %v1029_v10 = vrot.slane %v1028_v8, 2  ;;  %v1069_v56 = vsel %vm209_vm2, %v4086_v63, 0.0 }
 0x256   :  { %5607 = vst [vmem:[#allocation33_spill] sm:$0xff] %v4124_v34  ;;  %v4140_v43 = vmul.f32 %v4031_v50, %v5598_v57  ;;  %v4142_v4 = vpop.eup %2546  ;;  %2568 = vpow2.f32 %v3989_v30  ;;  %v1022_v18 = vrot.slane %v1021_v26, 1  ;;  %v1037_v3 = vadd.f32 %v1036_v59, %v1035_v7 }
 0x257   :  { %5608 = vst [vmem:[#allocation69_spill] sm:$0xff] %v4131_v33  ;;  %v1046_v15 = vadd.f32 %v1045_v19, %v1044_v24  ;;  %v4145_v20 = vpop.eup %2548  ;;  %2570 = vpow2.f32 %v3991_v46  ;;  %v1070_v31 = vsel %vm209_vm2, %v4099_v22, 0.0  ;;  %v1078_v35 = vsel %vm209_vm2, %v4108_v62, 0.0 }
 0x258   :  { %5609 = vst [vmem:[#allocation70_spill] sm:$0xff] %v4140_v43  ;;  %v1079_v50 = vsel %vm209_vm2, %v4112_v1, 0.0  ;;  %v4154_v6 = vpop.eup %2550  ;;  %2572 = vpow2.f32 %v3993_v40  ;;  %v1055_v30 = vadd.f32 %v1054_v61, %v1053_v25  ;;  %v1063_v7 = vrot.slane %v1062_v53, 4 }
 0x259   :  { %v1071_v24 = vadd.f32 %v1070_v31, %v1069_v56  ;;  %v4157_v29 = vpop.eup %2552  ;;  %v1080_v9 = vadd.f32 %v1079_v50, %v1078_v35  ;;  %v1087_v46 = vsel %vm209_vm2, %v4126_v45, 0.0  ;;  %v1088_v55 = vsel %vm209_vm2, %v4133_v2, 0.0 }
 0x25a   :  { %v1096_v49 = vsel %vm209_vm2, %v4142_v4, 0.0  ;;  %v4165_v59 = vpop.eup %2554  ;;  %v4167_v19 = vadd.f32 %v1029_v10, %v1028_v8  ;;  %v1038_v40 = vrot.slane %v1037_v3, 2  ;;  %v4171_v14 = vmul.f32 %v4037_v12, %v5593_v27 }
 0x25b   :  { %v1072_v25 = vrot.slane %v1071_v24, 4  ;;  %v4173_v61 = vpop.eup %2556  ;;  %v1081_v56 = vrot.slane %v1080_v9, 4  ;;  %v1089_v31 = vadd.f32 %v1088_v55, %v1087_v46  ;;  %v1097_v35 = vsel %vm209_vm2, %v4145_v20, 0.0 }
 0x25c   :  { %5610 = vst [vmem:[#allocation71_spill] sm:$0xff] %v4171_v14  ;;  %v1105_v50 = vsel %vm209_vm2, %v4154_v6, 0.0  ;;  %v4179_v52 = vpop.eup %2558  ;;  %v4181_v8 = vadd.f32 %v1022_v18, %v1021_v26  ;;  %v1047_v10 = vrot.slane %v1046_v15, 2  ;;  %v1056_v60 = vrot.slane %v1055_v30, 2 }
 0x25d   :  { %5611 = vst [vmem:[#allocation72_spill] sm:$0xff] %v4179_v52  ;;  %v1098_v23 = vadd.f32 %v1097_v35, %v1096_v49  ;;  %v1064_v0 = vadd.f32 %v1063_v7, %v1062_v53  ;;  %v1073_v12 = vadd.f32 %v1072_v25, %v1071_v24  ;;  %v1090_v17 = vrot.slane %v1089_v31, 4 }
 0x25e   :  { %5612 = vst [vmem:[#allocation73_spill] sm:$0xff] %v4181_v8  ;;  %v1106_v5 = vsel %vm209_vm2, %v4157_v29, 0.0  ;;  %v4185_v46 = vpop.eup %2560  ;;  %v1082_v55 = vadd.f32 %v1081_v56, %v1080_v9  ;;  %v1114_v47 = vsel %vm209_vm2, %v4165_v59, 0.0  ;;  %v4189_v38 = vadd.f32 %v1038_v40, %v1037_v3 }
 0x25f   :  { %5613 = vst [vmem:[#allocation74_spill] sm:$0xff] %v4185_v46  ;;  %v1099_v41 = vrot.slane %v1098_v23, 4  ;;  %v1107_v21 = vadd.f32 %v1106_v5, %v1105_v50  ;;  %v1091_v26 = vadd.f32 %v1090_v17, %v1089_v31  ;;  %v1115_v18 = vsel %vm209_vm2, %v4173_v61, 0.0 }
 0x260   :  { %v1123_v53 = vsel %vm209_vm2, %v4179_v52, 0.0  ;;  %v4195_v7 = vpop.eup %2562  ;;  %v1031_v24 = vrot.slane %v4167_v19, 1  ;;  %v1048_v49 = vadd.f32 %v1047_v10, %v1046_v15  ;;  %v1057_v56 = vadd.f32 %v1056_v60, %v1055_v30 }
 0x261   :  { %5614 = vst [vmem:[#allocation75_spill] sm:$0xff] %v4195_v7  ;;  %v1100_v9 = vadd.f32 %v1099_v41, %v1098_v23  ;;  %v1108_v25 = vrot.slane %v1107_v21, 4  ;;  %v4198_v5 = vpop.eup %2564  ;;  %v1065_v35 = vrot.slane %v1064_v0, 2  ;;  %v1116_v3 = vadd.f32 %v1115_v18, %v1114_v47 }
 0x262   :  { %v1124_v17 = vsel %vm209_vm2, %v4185_v46, 0.0  ;;  %v4202_v40 = vpop.eup %2566  ;;  %v1074_v31 = vrot.slane %v1073_v12, 2  ;;  %v1083_v50 = vrot.slane %v1082_v55, 2  ;;  %v1040_v15 = vrot.slane %v4189_v38, 1 }
 0x263   :  { %v1109_v28 = vadd.f32 %v1108_v25, %v1107_v21  ;;  %v1125_v13 = vadd.f32 %v1124_v17, %v1123_v53  ;;  %v4204_v48 = vpop.eup %2568  ;;  %v1092_v41 = vrot.slane %v1091_v26, 2  ;;  %v1117_v23 = vrot.slane %v1116_v3, 4 }
 0x264   :  { %v1132_v60 = vsel %vm209_vm2, %v4195_v7, 0.0  ;;  %v4209_v30 = vpop.eup %2570  ;;  %v1049_v47 = vrot.slane %v1048_v49, 1  ;;  %v1101_v10 = vrot.slane %v1100_v9, 2  ;;  %v1058_v54 = vrot.slane %v1057_v56, 1 }
 0x265   :  { %5615 = vst [vmem:[#allocation76_spill] sm:$0xff] %v4209_v30  ;;  %v1110_v18 = vrot.slane %v1109_v28, 2  ;;  %v1126_v11 = vrot.slane %v1125_v13, 4  ;;  %v4211_v36 = vpop.eup %2572  ;;  %v1066_v21 = vadd.f32 %v1065_v35, %v1064_v0  ;;  %v1118_v53 = vadd.f32 %v1117_v23, %v1116_v3 }
 0x266   :  { %5616 = vst [vmem:[#allocation18_spill] sm:$0xff] %v4211_v36  ;;  %v1133_v25 = vsel %vm209_vm2, %v4198_v5, 0.0  ;;  %v1075_v17 = vadd.f32 %v1074_v31, %v1073_v12  ;;  %v1084_v8 = vadd.f32 %v1083_v50, %v1082_v55  ;;  %v1093_v52 = vadd.f32 %v1092_v41, %v1091_v26 }
 0x267   :  { %v1127_v34 = vadd.f32 %v1126_v11, %v1125_v13  ;;  %v1134_v46 = vadd.f32 %v1133_v25, %v1132_v60  ;;  %v1119_v7 = vrot.slane %v1118_v53, 2  ;;  %v1141_v44 = vsel %vm209_vm2, %v4202_v40, 0.0 }
 0x268   :  { %v1142_v14 = vsel %vm209_vm2, %v4204_v48, 0.0  ;;  %v1102_v58 = vadd.f32 %v1101_v10, %v1100_v9  ;;  %v1111_v43 = vadd.f32 %v1110_v18, %v1109_v28  ;;  %v1067_v35 = vrot.slane %v1066_v21, 1 }
 0x269   :  { %v1128_v33 = vrot.slane %v1127_v34, 2  ;;  %v1135_v0 = vrot.slane %v1134_v46, 4  ;;  %v1143_v3 = vadd.f32 %v1142_v14, %v1141_v44  ;;  %v1150_v12 = vsel %vm209_vm2, %v4209_v30, 0.0 }
 0x26a   :  { %v1151_v11 = vsel %vm209_vm2, %v4211_v36, 0.0  ;;  %v1076_v13 = vrot.slane %v1075_v17, 1  ;;  %v1120_v55 = vadd.f32 %v1119_v7, %v1118_v53  ;;  %v1085_v50 = vrot.slane %v1084_v8, 1 }
 0x26b   :  { %v1136_v26 = vadd.f32 %v1135_v0, %v1134_v46  ;;  %v1152_v31 = vadd.f32 %v1151_v11, %v1150_v12  ;;  %v1094_v41 = vrot.slane %v1093_v52, 1  ;;  %v1129_v23 = vadd.f32 %v1128_v33, %v1127_v34 }
 0x26c   :  { %v1144_v60 = vrot.slane %v1143_v3, 4  ;;  %v1103_v9 = vrot.slane %v1102_v58, 1  ;;  %v1112_v28 = vrot.slane %v1111_v43, 1  ;;  %v4224_v44 = vadd.f32 %v1031_v24, %v4167_v19 }
 0x26d   :  { %v1137_v10 = vrot.slane %v1136_v26, 2  ;;  %v1153_v18 = vrot.slane %v1152_v31, 4  ;;  %v4227_v14 = vadd.f32 %v1040_v15, %v4189_v38  ;;  %v4229_v25 = vadd.f32 %v1049_v47, %v1048_v49 }
 0x26e   :  { %v1145_v36 = vadd.f32 %v1144_v60, %v1143_v3  ;;  %v4231_v7 = vadd.f32 %v1058_v54, %v1057_v56  ;;  %v1121_v46 = vrot.slane %v1120_v55, 1  ;;  %v4233_v34 = vadd.f32 %v1067_v35, %v1066_v21  ;;  %v5618_v35 = vld [vmem:[#allocation61_spill] sm:$0xff]  ;;  %v5623_v60 = vld [vmem:[#allocation52_spill] sm:$0xff] }
 0x26f   :  { %v1138_v53 = vadd.f32 %v1137_v10, %v1136_v26  ;;  %v1154_v0 = vadd.f32 %v1153_v18, %v1152_v31  ;;  %v4235_v33 = vadd.f32 %v1076_v13, %v1075_v17  ;;  %v1130_v12 = vrot.slane %v1129_v23, 1  ;;  %v5617_v17 = vld [vmem:[#allocation82_spill] sm:$0xff]  ;;  %v5624_v18 = vld [vmem:[#allocation72_spill] sm:$0xff] }
 0x270   :  { %v1146_v11 = vrot.slane %v1145_v36, 2  ;;  %v4237_v30 = vadd.f32 %v1085_v50, %v1084_v8  ;;  %v4239_v19 = vadd.f32 %v1094_v41, %v1093_v52  ;;  %v4241_v38 = vadd.f32 %v1103_v9, %v1102_v58  ;;  %v5620_v26 = vld [vmem:[#allocation70_spill] sm:$0xff]  ;;  %v5621_v50 = vld [vmem:[#allocation32_spill] sm:$0xff]  ;;  %v5622_v41 = vld [vmem:[#allocation71_spill] sm:$0xff] }
 0x271   :  { %v4243_v24 = vadd.f32 %v1112_v28, %v1111_v43  ;;  %v1139_v49 = vrot.slane %v1138_v53, 1  ;;  %v1166_v54 = vmul.f32 %v4047_v39, %v5598_v57  ;;  %v1167_v56 = vmul.f32 %v4057_v42, %v5593_v27 }
 0x272   :  { %v1168_v15 = vmul.f32 %v4067_v37, %v5598_v57  ;;  %v4251_v47 = vadd.f32 %v1121_v46, %v1120_v55  ;;  %v1147_v8 = vadd.f32 %v1146_v11, %v1145_v36  ;;  %v1155_v21 = vrot.slane %v1154_v0, 2  ;;  %v5619_v55 = vld [vmem:[#allocation69_spill] sm:$0xff]  ;;  %v5625_v11 = vld [vmem:[#allocation74_spill] sm:$0xff] }
 0x273   :  { %v1169_v52 = vmul.f32 %v4069_v32, %v5593_v27  ;;  %v4255_v58 = vadd.f32 %v1130_v12, %v1129_v23  ;;  %v1170_v43 = vmul.f32 %v4075_v16, %v5598_v57  ;;  %v1171_v39 = vmul.f32 %v4086_v63, %v5593_v27 }
 0x274   :  { %v1172_v42 = vmul.f32 %v4099_v22, %v5598_v57  ;;  %v1173_v37 = vmul.f32 %v4108_v62, %v5593_v27  ;;  %v1174_v36 = vmul.f32 %v4112_v1, %v5598_v57  ;;  %v1175_v32 = vmul.f32 %v4126_v45, %v5617_v17 }
 0x275   :  { %v1176_v3 = vmul.f32 %v4133_v2, %v5618_v35  ;;  %v4271_v13 = vadd.f32 %v1139_v49, %v1138_v53  ;;  %v1177_v16 = vmul.f32 %v4142_v4, %v5617_v17  ;;  %v1178_v63 = vmul.f32 %v4145_v20, %v5618_v35 }
 0x276   :  { %v4279_v22 = vmul.f32 %v4154_v6, %v5617_v17  ;;  %v1148_v62 = vrot.slane %v1147_v8, 1  ;;  %v1156_v1 = vadd.f32 %v1155_v21, %v1154_v0  ;;  %v4283_v45 = vmul.f32 %v4157_v29, %v5618_v35 }
 0x277   :  { %v4287_v2 = vmul.f32 %v4165_v59, %v5617_v17  ;;  %v4291_v4 = vmul.f32 %v4173_v61, %v5618_v35  ;;  %v1192_v20 = vsel %vm209_vm2, %v4089_v51, 0.0  ;;  %v1209_v6 = vsel %vm209_vm2, %v5619_v55, 0.0 }
 0x278   :  { %v1210_v31 = vsel %vm209_vm2, %v5620_v26, 0.0  ;;  %v1200_v29 = vsel %vm209_vm2, %v5621_v50, 0.0  ;;  %v1218_v59 = vsel %vm209_vm2, %v5622_v41, 0.0  ;;  %v1219_v23 = vsel %vm209_vm2, %v1166_v54, 0.0  ;;  %v5626_v54 = vld [vmem:[#allocation33_spill] sm:$0xff] }
 0x279   :  { %v1227_v61 = vsel %vm209_vm2, %v1167_v56, 0.0  ;;  %v1201_v9 = vsel %vm209_vm2, %v5623_v60, 0.0  ;;  %v1211_v51 = vadd.f32 %v1210_v31, %v1209_v6  ;;  %v1220_v28 = vadd.f32 %v1219_v23, %v1218_v59 }
 0x27a   :  { %v1228_v10 = vsel %vm209_vm2, %v1168_v15, 0.0  ;;  %v1183_v46 = vmul.f32 %v5624_v18, %v5617_v17  ;;  %v1236_v0 = vsel %vm209_vm2, %v1169_v52, 0.0  ;;  %v1237_v12 = vsel %vm209_vm2, %v1170_v43, 0.0 }
 0x27b   :  { %v1229_v53 = vadd.f32 %v1228_v10, %v1227_v61  ;;  %v1184_v49 = vmul.f32 %v5625_v11, %v5618_v35  ;;  %v1193_v56 = vadd.f32 %v1192_v20, %v5626_v54  ;;  %v1221_v21 = vrot.slane %v1220_v28, 4  ;;  %v5627_v20 = vld [vmem:[#allocation75_spill] sm:$0xff] }
 0x27c   :  { %v1238_v55 = vadd.f32 %v1237_v12, %v1236_v0  ;;  %v1202_v26 = vadd.f32 %v1201_v9, %v1200_v29  ;;  %v1245_v31 = vsel %vm209_vm2, %v1171_v39, 0.0  ;;  %v1246_v15 = vsel %vm209_vm2, %v1172_v42, 0.0 }
 0x27d   :  { %v1230_v6 = vrot.slane %v1229_v53, 4  ;;  %v1212_v50 = vrot.slane %v1211_v51, 4  ;;  %v1222_v41 = vadd.f32 %v1221_v21, %v1220_v28  ;;  %v1247_v23 = vadd.f32 %v1246_v15, %v1245_v31 }
 0x27e   :  { %v1239_v59 = vrot.slane %v1238_v55, 4  ;;  %v1157_v52 = vrot.slane %v1156_v1, 1  ;;  %v1254_v43 = vsel %vm209_vm2, %v1173_v37, 0.0  ;;  %v1255_v60 = vsel %vm209_vm2, %v1174_v36, 0.0 }
 0x27f   :  { %v1231_v61 = vadd.f32 %v1230_v6, %v1229_v53  ;;  %v1185_v10 = vmul.f32 %v5627_v20, %v5617_v17  ;;  %v1186_v29 = vmul.f32 %v4198_v5, %v5618_v35  ;;  %v1223_v9 = vrot.slane %v1222_v41, 2  ;;  %v5629_v5 = vld [vmem:[#allocation76_spill] sm:$0xff] }
 0x280   :  { %v1240_v39 = vadd.f32 %v1239_v59, %v1238_v55  ;;  %v4323_v18 = vadd.f32 %v1148_v62, %v1147_v8  ;;  %v1187_v42 = vmul.f32 %v4202_v40, %v5617_v17  ;;  %v1194_v28 = vrot.slane %v1193_v56, 4  ;;  %v5630_v8 = vld [vmem:[#allocation18_spill] sm:$0xff] }
 0x281   :  { %v1203_v0 = vrot.slane %v1202_v26, 4  ;;  %v4327_v53 = vadd.f32 %v1212_v50, %v1211_v51  ;;  %v1232_v37 = vrot.slane %v1231_v61, 2  ;;  %v1248_v12 = vrot.slane %v1247_v23, 4 }
 0x282   :  { %v1256_v36 = vadd.f32 %v1255_v60, %v1254_v43  ;;  %v4329_v11 = vadd.f32 %v1157_v52, %v1156_v1  ;;  %v1188_v54 = vmul.f32 %v4204_v48, %v5618_v35  ;;  %v1189_v21 = vmul.f32 %v5629_v5, %v5617_v17 }
 0x283   :  { %5628 = vst [vmem:[#allocation20_spill] sm:$0xff] %v4327_v53  ;;  %v1190_v62 = vmul.f32 %v5630_v8, %v5618_v35  ;;  %v4337_v55 = vadd.f32 %v1223_v9, %v1222_v41  ;;  %v1241_v40 = vrot.slane %v1240_v39, 2  ;;  %v1263_v51 = vsel %vm209_vm2, %v1175_v32, 0.0 }
 0x284   :  { %v1264_v6 = vsel %vm209_vm2, %v1176_v3, 0.0  ;;  %v4341_v31 = vadd.f32 %v1194_v28, %v1193_v56  ;;  %v4343_v1 = vadd.f32 %v1203_v0, %v1202_v26  ;;  %v1272_v15 = vsel %vm209_vm2, %v1177_v16, 0.0 }
 0x285   :  { %5631 = vst [vmem:[#allocation23_spill] sm:$0xff] %v4337_v55  ;;  %v1273_v48 = vsel %vm209_vm2, %v1178_v63, 0.0  ;;  %v1233_v59 = vadd.f32 %v1232_v37, %v1231_v61  ;;  %v1249_v52 = vadd.f32 %v1248_v12, %v1247_v23  ;;  %v1257_v43 = vrot.slane %v1256_v36, 4 }
 0x286   :  { %5632 = vst [vmem:[#allocation27_spill] sm:$0xff] %v4341_v31  ;;  %5633 = vst [vmem:[#allocation11_spill] sm:$0xff] %v4343_v1  ;;  %v1265_v41 = vadd.f32 %v1264_v6, %v1263_v51  ;;  %v1281_v60 = vsel %vm209_vm2, %v4279_v22, 0.0  ;;  %v1282_v32 = vsel %vm209_vm2, %v4283_v45, 0.0  ;;  %v1290_v3 = vsel %vm209_vm2, %v4287_v2, 0.0 }
 0x287   :  { %v1242_v16 = vadd.f32 %v1241_v40, %v1240_v39  ;;  %v1274_v26 = vadd.f32 %v1273_v48, %v1272_v15  ;;  %v1291_v63 = vsel %vm209_vm2, %v4291_v4, 0.0  ;;  %v1299_v23 = vsel %vm209_vm2, %v1183_v46, 0.0 }
 0x288   :  { %v1292_v61 = vadd.f32 %v1291_v63, %v1290_v3  ;;  %v1300_v20 = vsel %vm209_vm2, %v1184_v49, 0.0  ;;  %v1308_v22 = vsel %vm209_vm2, %v1185_v10, 0.0  ;;  %v1283_v9 = vadd.f32 %v1282_v32, %v1281_v60 }
 0x289   :  { %v1301_v28 = vadd.f32 %v1300_v20, %v1299_v23  ;;  %v1309_v45 = vsel %vm209_vm2, %v1186_v29, 0.0  ;;  %v1317_v2 = vsel %vm209_vm2, %v1187_v42, 0.0  ;;  %v1318_v39 = vsel %vm209_vm2, %v1188_v54, 0.0 }
 0x28a   :  { %v1293_v0 = vrot.slane %v1292_v61, 4  ;;  %v1310_v37 = vadd.f32 %v1309_v45, %v1308_v22  ;;  %v1326_v12 = vsel %vm209_vm2, %v1189_v21, 0.0  ;;  %v1250_v4 = vrot.slane %v1249_v52, 2 }
 0x28b   :  { %v1302_v5 = vrot.slane %v1301_v28, 4  ;;  %v1319_v8 = vadd.f32 %v1318_v39, %v1317_v2  ;;  %v1327_v46 = vsel %vm209_vm2, %v1190_v62, 0.0  ;;  %v1258_v49 = vadd.f32 %v1257_v43, %v1256_v36  ;;  %v5635_v36 = vld [vmem:[#allocation73_spill] sm:$0xff] }
 0x28c   :  { %v1294_v40 = vadd.f32 %v1293_v0, %v1292_v61  ;;  %v1311_v10 = vrot.slane %v1310_v37, 4  ;;  %v1328_v51 = vadd.f32 %v1327_v46, %v1326_v12  ;;  %v1234_v6 = vrot.slane %v1233_v59, 1 }
 0x28d   :  { %v1284_v15 = vrot.slane %v1283_v9, 4  ;;  %v1303_v29 = vadd.f32 %v1302_v5, %v1301_v28  ;;  %v1320_v48 = vrot.slane %v1319_v8, 4  ;;  %v1266_v42 = vrot.slane %v1265_v41, 4  ;;  %v5669_v5 = vld [vmem:[#allocation29_spill] sm:$0xff] }
 0x28e   :  { %v1295_v60 = vrot.slane %v1294_v40, 2  ;;  %v1312_v32 = vadd.f32 %v1311_v10, %v1310_v37  ;;  %v1329_v3 = vrot.slane %v1328_v51, 4  ;;  %v1243_v54 = vrot.slane %v1242_v16, 1 }
 0x28f   :  { %v1275_v63 = vrot.slane %v1274_v26, 4  ;;  %v1304_v21 = vrot.slane %v1303_v29, 2  ;;  %v1321_v23 = vadd.f32 %v1320_v48, %v1319_v8  ;;  %v4365_v20 = vadd.f32 %v1250_v4, %v1249_v52 }
 0x290   :  { %v1313_v22 = vrot.slane %v1312_v32, 2  ;;  %v1330_v62 = vadd.f32 %v1329_v3, %v1328_v51  ;;  %2574 = vrcp.f32 %v5635_v36  ;;  %v1259_v43 = vrot.slane %v1258_v49, 2  ;;  %v5656_v3 = vld [vmem:[#allocation44_spill] sm:$0xff]  ;;  %v5661_v36 = vld [vmem:[#allocation25_spill] sm:$0xff] }
 0x291   :  { %5634 = vst [vmem:[#allocation13_spill] sm:$0xff] %v4365_v20  ;;  %v4368_v61 = vadd.f32 %v1284_v15, %v1283_v9  ;;  %v1305_v45 = vadd.f32 %v1304_v21, %v1303_v29  ;;  %2576 = vrcp.f32 %v4224_v44  ;;  %v4371_v28 = vadd.f32 %v1234_v6, %v1233_v59  ;;  %v5652_v6 = vld [vmem:[#allocation62_spill] sm:$0xff]  ;;  %v5653_v29 = vld [vmem:[#allocation79_spill] sm:$0xff] }
 0x292   :  { %v4373_v2 = vadd.f32 %v1266_v42, %v1265_v41  ;;  %v4375_v0 = vadd.f32 %v1295_v60, %v1294_v40  ;;  %2578 = vrcp.f32 %v4227_v14  ;;  %v4378_v52 = vadd.f32 %v1275_v63, %v1274_v26  ;;  %v5643_v41 = vld [vmem:[#allocation14_spill] sm:$0xff]  ;;  %v5655_v60 = vld [vmem:[#allocation24_spill] sm:$0xff] }
 0x293   :  { %5636 = vst [vmem:[#allocation15_spill] sm:$0xff] %v4368_v61  ;;  %5637 = vst [vmem:[#allocation17_spill] sm:$0xff] %v4371_v28  ;;  %v1314_v37 = vadd.f32 %v1313_v22, %v1312_v32  ;;  %v1322_v39 = vrot.slane %v1321_v23, 2  ;;  %2580 = vrcp.f32 %v4229_v25  ;;  %v4381_v12 = vadd.f32 %v1243_v54, %v1242_v16  ;;  %v5644_v14 = vld [vmem:[#allocation66_spill] sm:$0xff]  ;;  %v5645_v25 = vld [vmem:[#allocation16_spill] sm:$0xff] }
 0x294   :  { %5638 = vst [vmem:[#allocation19_spill] sm:$0xff] %v4373_v2  ;;  %5639 = vst [vmem:[#allocation65_spill] sm:$0xff] %v4375_v0  ;;  %v1306_v9 = vrot.slane %v1305_v45, 1  ;;  %v1331_v4 = vrot.slane %v1330_v62, 2  ;;  %2582 = vrcp.f32 %v4231_v7  ;;  %v4384_v44 = vadd.f32 %v1259_v43, %v1258_v49  ;;  %v5646_v16 = vld [vmem:[#allocation77_spill] sm:$0xff]  ;;  %v5647_v7 = vld [vmem:[#allocation68_spill] sm:$0xff] }
 0x295   :  { %5640 = vst [vmem:[#allocation53_spill] sm:$0xff] %v4378_v52  ;;  %5641 = vst [vmem:[#allocation67_spill] sm:$0xff] %v4381_v12  ;;  %2584 = vrcp.f32 %v4233_v34  ;;  %v4390_v26 = vsub.f32 %v5644_v14, %v5643_v41  ;;  %v4396_v8 = vsub.f32 %v5646_v16, %v5645_v25  ;;  %v4400_v46 = vsub.f32 %v5647_v7, %v5643_v41  ;;  %v5649_v34 = vld [vmem:[#allocation78_spill] sm:$0xff]  ;;  %v5658_v63 = vld [vmem:[#allocation36_spill] sm:$0xff] }
 0x296   :  { %5642 = vst [vmem:[#allocation34_spill] sm:$0xff] %v4384_v44  ;;  %2586 = vrcp.f32 %v4235_v33  ;;  %v1315_v49 = vrot.slane %v1314_v37, 1  ;;  %v4402_v40 = vadd.f32 %v1322_v39, %v1321_v23  ;;  %v4407_v10 = vsub.f32 %v5649_v34, %v5645_v25  ;;  %v5659_v23 = vld [vmem:[#allocation45_spill] sm:$0xff]  ;;  %v5663_v14 = vld [vmem:[#allocation26_spill] sm:$0xff]  ;;  %v5664_v7 = vld [vmem:[#allocation47_spill] sm:$0xff] }
 0x297   :  { %2588 = vrcp.f32 %v4237_v30  ;;  %v4409_v51 = vadd.f32 %v1306_v9, %v1305_v45  ;;  %v4411_v33 = vadd.f32 %v1331_v4, %v1330_v62  ;;  %v4416_v15 = vsub.f32 %v5652_v6, %v5643_v41  ;;  %v5654_v30 = vld [vmem:[#allocation21_spill] sm:$0xff]  ;;  %v5662_v45 = vld [vmem:[#allocation46_spill] sm:$0xff]  ;;  %v5673_v12 = vld [vmem:[#allocation80_spill] sm:$0xff] }
 0x298   :  { %5648 = vst [vmem:[#allocation54_spill] sm:$0xff] %v4402_v40  ;;  %2590 = vrcp.f32 %v4239_v19  ;;  %v4421_v48 = vsub.f32 %v5653_v29, %v5645_v25  ;;  %v1571_v42 = vsel %vm209_vm2, %v5654_v30, -inf  ;;  %v1572_v32 = vsel %vm209_vm2, %v5655_v60, -inf  ;;  %v5683_v52 = vld [vmem:[#allocation81_spill] sm:$0xff] }
 0x299   :  { %5650 = vst [vmem:[#allocation37_spill] sm:$0xff] %v4409_v51  ;;  %5651 = vst [vmem:[#allocation55_spill] sm:$0xff] %v4411_v33  ;;  %2592 = vrcp.f32 %v4241_v38  ;;  %v4429_v54 = vsub.f32 %v5656_v3, %v5643_v41  ;;  %v1573_v19 = vmax.f32 %v1571_v42, %v1572_v32  ;;  %v1580_v21 = vsel %vm209_vm2, %v5658_v63, -inf  ;;  %v5667_v32 = vld [vmem:[#allocation48_spill] sm:$0xff] }
 0x29a   :  { %v1581_v38 = vsel %vm209_vm2, %v5659_v23, -inf  ;;  %v4435_v22 = vadd.f32 %v1315_v49, %v1314_v37  ;;  %v1589_v43 = vsel %vm209_vm2, %v5661_v36, -inf  ;;  %v1590_v39 = vsel %vm209_vm2, %v5662_v45, -inf  ;;  %v5666_v49 = vld [vmem:[#allocation28_spill] sm:$0xff] }
 0x29b   :  { %5657 = vst [vmem:[#allocation38_spill] sm:$0xff] %v4429_v54  ;;  %v1582_v62 = vmax.f32 %v1580_v21, %v1581_v38  ;;  %v1574_v9 = vrot.slane %v1573_v19, 4  ;;  %v1591_v4 = vmax.f32 %v1589_v43, %v1590_v39  ;;  %v1598_v16 = vsel %vm209_vm2, %v5663_v14, -inf }
 0x29c   :  { %5660 = vst [vmem:[#allocation56_spill] sm:$0xff] %v4435_v22  ;;  %v1599_v34 = vsel %vm209_vm2, %v5664_v7, -inf  ;;  %v1607_v42 = vsel %vm209_vm2, %v5666_v49, -inf  ;;  %v1608_v3 = vsel %vm209_vm2, %v5667_v32, -inf  ;;  %v1616_v59 = vsel %vm209_vm2, %v5669_v5, -inf }
 0x29d   :  { %v4445_v6 = vpop.eup %2574  ;;  %v1583_v29 = vrot.slane %v1582_v62, 4  ;;  %v1600_v37 = vmax.f32 %v1598_v16, %v1599_v34  ;;  %v1575_v38 = vmax.f32 %v1573_v19, %v1574_v9  ;;  %v1592_v43 = vrot.slane %v1591_v4, 4  ;;  %v5671_v34 = vld [vmem:[#allocation49_spill] sm:$0xff]  ;;  %v5675_v19 = vld [vmem:[#allocation63_spill] sm:$0xff] }
 0x29e   :  { %5665 = vst [vmem:[#allocation39_spill] sm:$0xff] %v4445_v6  ;;  %v4451_v21 = vpop.eup %2576  ;;  %v1609_v39 = vmax.f32 %v1607_v42, %v1608_v3  ;;  %2594 = vrcp.f32 %v4243_v24  ;;  %v1617_v22 = vsel %vm209_vm2, %v5671_v34, -inf  ;;  %v4464_v28 = vsub.f32 %v5673_v12, %v5645_v25  ;;  %v5677_v3 = vld [vmem:[#allocation30_spill] sm:$0xff] }
 0x29f   :  { %5668 = vst [vmem:[#allocation57_spill] sm:$0xff] %v4451_v21  ;;  %v4455_v56 = vpop.eup %2578  ;;  %v1584_v50 = vmax.f32 %v1582_v62, %v1583_v29  ;;  %v1601_v16 = vrot.slane %v1600_v37, 4  ;;  %v4468_v9 = vsub.f32 %v5675_v19, %v5643_v41  ;;  %v1576_v42 = vrot.slane %v1575_v38, 2  ;;  %v5679_v6 = vld [vmem:[#allocation50_spill] sm:$0xff]  ;;  %v5681_v19 = vld [vmem:[#allocation31_spill] sm:$0xff] }
 0x2a0   :  { %5670 = vst [vmem:[#allocation40_spill] sm:$0xff] %v4455_v56  ;;  %v4460_v51 = vpop.eup %2580  ;;  %5674 = vst [vmem:[#allocation41_spill] sm:$0xff] %v4464_v28  ;;  %v1625_v56 = vsel %vm209_vm2, %v5677_v3, -inf  ;;  %v1593_v62 = vmax.f32 %v1591_v4, %v1592_v43  ;;  %v1610_v29 = vrot.slane %v1609_v39, 4  ;;  %v1618_v21 = vmax.f32 %v1616_v59, %v1617_v22  ;;  %v5685_v22 = vld [vmem:[#allocation51_spill] sm:$0xff] }
 0x2a1   :  { %5672 = vst [vmem:[#allocation58_spill] sm:$0xff] %v4460_v51  ;;  %5676 = vst [vmem:[#allocation59_spill] sm:$0xff] %v4468_v9  ;;  %v4472_v24 = vpop.eup %2582  ;;  %v1626_v51 = vsel %vm209_vm2, %v5679_v6, -inf  ;;  %2596 = vrcp.f32 %v4251_v47  ;;  %v1585_v12 = vrot.slane %v1584_v50, 2  ;;  %v1602_v33 = vmax.f32 %v1600_v37, %v1601_v16  ;;  %v5687_v47 = vld [vmem:[#allocation64_spill] sm:$0xff]  ;;  %v5689_v16 = vld [vmem:[#allocation83_spill] sm:$0xff] }
 0x2a2   :  { %5678 = vst [vmem:[#allocation42_spill] sm:$0xff] %v4472_v24  ;;  %v4476_v0 = vpop.eup %2584  ;;  %v1634_v40 = vsel %vm209_vm2, %v5681_v19, -inf  ;;  %v4485_v24 = vsub.f32 %v5683_v52, %v5645_v25  ;;  %v1577_v4 = vmax.f32 %v1575_v38, %v1576_v42  ;;  %v1627_v59 = vmax.f32 %v1625_v56, %v1626_v51  ;;  %v5691_v52 = vld [vmem:[#allocation10_spill] sm:$0xff] }
 0x2a3   :  { %5680 = vst [vmem:[#allocation60_spill] sm:$0xff] %v4476_v0  ;;  %v4481_v61 = vpop.eup %2586  ;;  %v1635_v43 = vsel %vm209_vm2, %v5685_v22, -inf  ;;  %2598 = vrcp.f32 %v4255_v58  ;;  %v4494_v37 = vsub.f32 %v5687_v47, %v5643_v41  ;;  %v4502_v0 = vsub.f32 %v5691_v52, %v5643_v41  ;;  %v5695_v58 = vld [vmem:[#allocation84_spill] sm:$0xff] }
 0x2a4   :  { %5682 = vst [vmem:[#allocation43_spill] sm:$0xff] %v4481_v61  ;;  %5684 = vst [vmem:[#allocation69_spill] sm:$0xff] %v4485_v24  ;;  %v4489_v35 = vpop.eup %2588  ;;  %v4498_v61 = vsub.f32 %v5689_v16, %v5645_v25  ;;  %v1594_v51 = vrot.slane %v1593_v62, 2  ;;  %v1611_v38 = vmax.f32 %v1609_v39, %v1610_v29  ;;  %v1619_v42 = vrot.slane %v1618_v21, 4  ;;  %v5697_v52 = vld [vmem:[#allocation12_spill] sm:$0xff] }
 0x2a5   :  { %5686 = vst [vmem:[#allocation70_spill] sm:$0xff] %v4489_v35  ;;  %5688 = vst [vmem:[#allocation32_spill] sm:$0xff] %v4494_v37  ;;  %v4504_v56 = vpop.eup %2590  ;;  %v1636_v35 = vmax.f32 %v1634_v40, %v1635_v43  ;;  %2600 = vrcp.f32 %v4271_v13  ;;  %v4511_v47 = vsub.f32 %v5695_v58, %v5645_v25  ;;  %v4513_v16 = vmax.f32 %v1584_v50, %v1585_v12  ;;  %v5699_v40 = vld [vmem:[#allocation85_spill] sm:$0xff] }
 0x2a6   :  { %5690 = vst [vmem:[#allocation71_spill] sm:$0xff] %v4498_v61  ;;  %5692 = vst [vmem:[#allocation52_spill] sm:$0xff] %v4502_v0  ;;  %v4506_v17 = vpop.eup %2592  ;;  %v1603_v2 = vrot.slane %v1602_v33, 2  ;;  %2602 = vrcp.f32 %v4323_v18  ;;  %v1578_v39 = vrot.slane %v1577_v4, 1  ;;  %v1628_v29 = vrot.slane %v1627_v59, 4 }
 0x2a7   :  { %5693 = vst [vmem:[#allocation72_spill] sm:$0xff] %v4504_v56  ;;  %5694 = vst [vmem:[#allocation74_spill] sm:$0xff] %v4506_v17  ;;  %v4518_v56 = vsub.f32 %v5697_v52, %v5643_v41  ;;  %2604 = vrcp.f32 %v4329_v11  ;;  %v4523_v13 = vsub.f32 %v5699_v40, %v5645_v25  ;;  %v1637_v43 = vrot.slane %v1636_v35, 4 }
 0x2a8   :  { %5696 = vst [vmem:[#allocation33_spill] sm:$0xff] %v4511_v47  ;;  %v1643_v50 = vsel %vm209_vm2, %v4390_v26, -inf  ;;  %v4527_v12 = vmax.f32 %v1593_v62, %v1594_v51  ;;  %v1612_v58 = vrot.slane %v1611_v38, 2  ;;  %v1620_v18 = vmax.f32 %v1618_v21, %v1619_v42 }
 0x2a9   :  { %5698 = vst [vmem:[#allocation75_spill] sm:$0xff] %v4518_v56  ;;  %v1644_v41 = vsel %vm209_vm2, %v4396_v8, -inf  ;;  %v4532_v17 = vmax.f32 %v1602_v33, %v1603_v2  ;;  %v1652_v25 = vsel %vm209_vm2, %v4400_v46, -inf  ;;  %v4536_v40 = vmax.f32 %v1577_v4, %v1578_v39 }
 0x2aa   :  { %v1645_v11 = vmax.f32 %v1643_v50, %v1644_v41  ;;  %v1629_v57 = vmax.f32 %v1627_v59, %v1628_v29  ;;  %v1653_v62 = vsel %vm209_vm2, %v4407_v10, -inf  ;;  %v1661_v21 = vsel %vm209_vm2, %v4416_v15, -inf }
 0x2ab   :  { %v4542_v51 = vpop.eup %2594  ;;  %v1638_v42 = vmax.f32 %v1636_v35, %v1637_v43  ;;  %v1654_v52 = vmax.f32 %v1652_v25, %v1653_v62  ;;  %v1662_v2 = vsel %vm209_vm2, %v4421_v48, -inf  ;;  %v1596_v33 = vrot.slane %v4527_v12, 1 }
 0x2ac   :  { %5700 = vst [vmem:[#allocation76_spill] sm:$0xff] %v4542_v51  ;;  %v1646_v27 = vrot.slane %v1645_v11, 4  ;;  %v4547_v50 = vmax.f32 %v1611_v38, %v1612_v58  ;;  %v1663_v4 = vmax.f32 %v1661_v21, %v1662_v2  ;;  %v1670_v59 = vsel %vm209_vm2, %v4429_v54, -inf }
 0x2ad   :  { %v1655_v29 = vrot.slane %v1654_v52, 4  ;;  %v1671_v41 = vsel %vm209_vm2, %v4464_v28, -inf  ;;  %v1679_v35 = vsel %vm209_vm2, %v4468_v9, -inf  ;;  %v1621_v25 = vrot.slane %v1620_v18, 2 }
 0x2ae   :  { %v1647_v39 = vmax.f32 %v1645_v11, %v1646_v27  ;;  %v4555_v43 = vpop.eup %2596  ;;  %v1630_v62 = vrot.slane %v1629_v57, 2  ;;  %v1664_v51 = vrot.slane %v1663_v4, 4  ;;  %v1672_v44 = vmax.f32 %v1670_v59, %v1671_v41 }
 0x2af   :  { %5701 = vst [vmem:[#allocation18_spill] sm:$0xff] %v4555_v43  ;;  %v1639_v38 = vrot.slane %v1638_v42, 2  ;;  %v1656_v58 = vmax.f32 %v1654_v52, %v1655_v29  ;;  %v1680_v21 = vsel %vm209_vm2, %v4485_v24, -inf  ;;  %v1688_v27 = vsel %vm209_vm2, %v4494_v37, -inf }
 0x2b0   :  { %v4561_v11 = vpop.eup %2598  ;;  %v1605_v2 = vrot.slane %v4532_v17, 1  ;;  %v1665_v20 = vmax.f32 %v1663_v4, %v1664_v51  ;;  %v1673_v55 = vrot.slane %v1672_v44, 4  ;;  %v1681_v53 = vmax.f32 %v1679_v35, %v1680_v21 }
 0x2b1   :  { %5702 = vst [vmem:[#allocation73_spill] sm:$0xff] %v4561_v11  ;;  %v1648_v43 = vrot.slane %v1647_v39, 2  ;;  %v1657_v1 = vrot.slane %v1656_v58, 2  ;;  %v1689_v59 = vsel %vm209_vm2, %v4498_v61, -inf  ;;  %v1697_v52 = vsel %vm209_vm2, %v4502_v0, -inf }
 0x2b2   :  { %v4568_v29 = vpop.eup %2600  ;;  %v1666_v41 = vrot.slane %v1665_v20, 2  ;;  %v1674_v31 = vmax.f32 %v1672_v44, %v1673_v55  ;;  %v1682_v37 = vrot.slane %v1681_v53, 4  ;;  %v1690_v24 = vmax.f32 %v1688_v27, %v1689_v59 }
 0x2b3   :  { %5703 = vst [vmem:[#allocation14_spill] sm:$0xff] %v4568_v29  ;;  %v4570_v11 = vpop.eup %2602  ;;  %v1622_v9 = vmax.f32 %v1620_v18, %v1621_v25  ;;  %v1631_v51 = vmax.f32 %v1629_v57, %v1630_v62  ;;  %v1640_v4 = vmax.f32 %v1638_v42, %v1639_v38  ;;  %v1698_v35 = vsel %vm209_vm2, %v4511_v47, -inf }
 0x2b4   :  { %5704 = vst [vmem:[#allocation66_spill] sm:$0xff] %v4570_v11  ;;  %v4574_v21 = vpop.eup %2604  ;;  %v1675_v61 = vrot.slane %v1674_v31, 2  ;;  %v1683_v28 = vmax.f32 %v1681_v53, %v1682_v37  ;;  %v1691_v54 = vrot.slane %v1690_v24, 4  ;;  %v1706_v29 = vsel %vm209_vm2, %v4518_v56, -inf }
 0x2b5   :  { %5705 = vst [vmem:[#allocation16_spill] sm:$0xff] %v4574_v21  ;;  %v1649_v0 = vmax.f32 %v1647_v39, %v1648_v43  ;;  %v1658_v55 = vmax.f32 %v1656_v58, %v1657_v1  ;;  %v1699_v44 = vmax.f32 %v1697_v52, %v1698_v35  ;;  %v1707_v27 = vsel %vm209_vm2, %v4523_v13, -inf }
 0x2b6   :  { %v1614_v57 = vrot.slane %v4547_v50, 1  ;;  %v1667_v18 = vmax.f32 %v1665_v20, %v1666_v41  ;;  %v1684_v42 = vrot.slane %v1683_v28, 2  ;;  %v1692_v25 = vmax.f32 %v1690_v24, %v1691_v54 }
 0x2b7   :  { %v1623_v62 = vrot.slane %v1622_v9, 1  ;;  %v1676_v38 = vmax.f32 %v1674_v31, %v1675_v61  ;;  %v1700_v59 = vrot.slane %v1699_v44, 4  ;;  %v1708_v21 = vmax.f32 %v1706_v29, %v1707_v27 }
 0x2b8   :  { %v1632_v53 = vrot.slane %v1631_v51, 1  ;;  %v1641_v37 = vrot.slane %v1640_v4, 1  ;;  %v1685_v11 = vmax.f32 %v1683_v28, %v1684_v42  ;;  %v1693_v47 = vrot.slane %v1692_v25, 2 }
 0x2b9   :  { %v1650_v56 = vrot.slane %v1649_v0, 1  ;;  %v1659_v39 = vrot.slane %v1658_v55, 1  ;;  %v1701_v1 = vmax.f32 %v1699_v44, %v1700_v59  ;;  %v1709_v43 = vrot.slane %v1708_v21, 4 }
 0x2ba   :  { %v5706_v58 = vrot.slane %v4513_v16, 1  ;;  %v1597_v20 = vmax.f32 %v4527_v12, %v1596_v33  ;;  %v1668_v41 = vrot.slane %v1667_v18, 1  ;;  %v1694_v54 = vmax.f32 %v1692_v25, %v1693_v47 }
 0x2bb   :  { %v1606_v31 = vmax.f32 %v4532_v17, %v1605_v2  ;;  %v1677_v61 = vrot.slane %v1676_v38, 1  ;;  %v1702_v24 = vrot.slane %v1701_v1, 2  ;;  %v1710_v29 = vmax.f32 %v1708_v21, %v1709_v43  ;;  %v5708_v43 = vld [vmem:[#allocation41_spill] sm:$0xff] }
 0x2bc   :  { %v1588_v52 = vmax.f32 %v4513_v16, %v5706_v58  ;;  %v4587_v28 = vmax.f32 %v4547_v50, %v1614_v57  ;;  %v4589_v35 = vmax.f32 %v1622_v9, %v1623_v62  ;;  %v4591_v44 = vmax.f32 %v1631_v51, %v1632_v53  ;;  %v5709_v58 = vld [vmem:[#allocation59_spill] sm:$0xff] }
 0x2bd   :  { %v1686_v27 = vrot.slane %v1685_v11, 1  ;;  %v4593_v42 = vmax.f32 %v1640_v4, %v1641_v37  ;;  %v4595_v16 = vmax.f32 %v1649_v0, %v1650_v56  ;;  %v4597_v12 = vmax.f32 %v1658_v55, %v1659_v39 }
 0x2be   :  { %v1711_v47 = vrot.slane %v1710_v29, 2  ;;  %v4599_v33 = vmax.f32 %v1667_v18, %v1668_v41  ;;  %v1695_v17 = vrot.slane %v1694_v54, 1  ;;  %v1703_v2 = vmax.f32 %v1701_v1, %v1702_v24  ;;  %v5711_v41 = vld [vmem:[#allocation32_spill] sm:$0xff] }
 0x2bf   :  { %v1715_v50 = vsub.f32 %v5654_v30, %v4536_v40  ;;  %v4603_v21 = vmax.f32 %v1676_v38, %v1677_v61  ;;  %v1716_v9 = vsub.f32 %v5655_v60, %v4536_v40  ;;  %v1717_v51 = vsub.f32 %v5658_v63, %v1588_v52  ;;  %v5712_v61 = vld [vmem:[#allocation71_spill] sm:$0xff] }
 0x2c0   :  { %v1718_v0 = vsub.f32 %v5659_v23, %v1588_v52  ;;  %v4609_v56 = vmax.f32 %v1685_v11, %v1686_v27  ;;  %v1712_v4 = vmax.f32 %v1710_v29, %v1711_v47  ;;  %v1719_v55 = vsub.f32 %v5661_v36, %v1597_v20  ;;  %v5713_v29 = vld [vmem:[#allocation52_spill] sm:$0xff] }
 0x2c1   :  { %v1720_v57 = vsub.f32 %v5662_v45, %v1597_v20  ;;  %v1721_v18 = vsub.f32 %v5663_v14, %v1606_v31  ;;  %v1722_v30 = vsub.f32 %v5664_v7, %v1606_v31  ;;  %v1723_v25 = vsub.f32 %v5666_v49, %v4587_v28  ;;  %v5710_v20 = vld [vmem:[#allocation69_spill] sm:$0xff] }
 0x2c2   :  { %v1724_v60 = vsub.f32 %v5667_v32, %v4587_v28  ;;  %v4619_v63 = vmax.f32 %v1694_v54, %v1695_v17  ;;  %v1704_v23 = vrot.slane %v1703_v2, 1  ;;  %v1725_v40 = vsub.f32 %v5669_v5, %v4589_v35 }
 0x2c3   :  { %v1726_v36 = vsub.f32 %v5671_v34, %v4589_v35  ;;  %v1727_v45 = vsub.f32 %v5677_v3, %v4591_v44  ;;  %v1728_v14 = vsub.f32 %v5679_v6, %v4591_v44  ;;  %v1729_v7 = vsub.f32 %v5681_v19, %v4593_v42  ;;  %v5714_v44 = vld [vmem:[#allocation33_spill] sm:$0xff] }
 0x2c4   :  { %v1730_v49 = vsub.f32 %v5685_v22, %v4593_v42  ;;  %v1713_v32 = vrot.slane %v1712_v4, 1  ;;  %v1731_v11 = vsub.f32 %v4390_v26, %v4595_v16  ;;  %v1747_v5 = vmul.f32 1.442695, %v1715_v50  ;;  %v5715_v42 = vld [vmem:[#allocation75_spill] sm:$0xff] }
 0x2c5   :  { %v1749_v62 = vmul.f32 1.442695, %v1716_v9  ;;  %v1732_v34 = vsub.f32 %v4396_v8, %v4595_v16  ;;  %v1733_v3 = vsub.f32 %v4400_v46, %v4597_v12  ;;  %v1751_v38 = vmul.f32 1.442695, %v1717_v51  ;;  %v5707_v46 = vld [vmem:[#allocation38_spill] sm:$0xff] }
 0x2c6   :  { %v1753_v6 = vmul.f32 1.442695, %v1718_v0  ;;  %v4639_v59 = vmax.f32 %v1703_v2, %v1704_v23  ;;  %v1734_v19 = vsub.f32 %v4407_v10, %v4597_v12  ;;  %2606 = vpow2.f32 %v1747_v5  ;;  %v2218_v2 = vld [vmem:[#allocation7 + $0x18] sm:$0xff]  ;;  %v2217_v0 = vld [vmem:[#allocation7 + $0x10] sm:$0xff]  ;;  %v2215_v5 = vld [vmem:[#allocation7] sm:$0xff] }
 0x2c7   :  { %v1755_v22 = vmul.f32 1.442695, %v1719_v55  ;;  %v1735_v26 = vsub.f32 %v4416_v15, %v4599_v33  ;;  %v1736_v53 = vsub.f32 %v4421_v48, %v4599_v33  ;;  %2608 = vpow2.f32 %v1749_v62 }
 0x2c8   :  { %v1757_v8 = vmul.f32 1.442695, %v1720_v57  ;;  %v4647_v37 = vmax.f32 %v1712_v4, %v1713_v32  ;;  %v1737_v39 = vsub.f32 %v5707_v46, %v4603_v21  ;;  %2610 = vpow2.f32 %v1751_v38  ;;  %v5716_v38 = vld [vmem:[#allocation27_spill] sm:$0xff]  ;;  %v5718_v46 = vld [vmem:[#allocation20_spill] sm:$0xff] }
 0x2c9   :  { %v1759_v1 = vmul.f32 1.442695, %v1721_v18  ;;  %v1738_v10 = vsub.f32 %v5708_v43, %v4603_v21  ;;  %v1739_v52 = vsub.f32 %v5709_v58, %v4609_v56  ;;  %2612 = vpow2.f32 %v1753_v6  ;;  %v2216_v18 = vld [vmem:[#allocation7 + $0x8] sm:$0xff] }
 0x2ca   :  { %v1761_v15 = vmul.f32 1.442695, %v1722_v30  ;;  %v1740_v48 = vsub.f32 %v5710_v20, %v4609_v56  ;;  %v1741_v54 = vsub.f32 %v5711_v41, %v4619_v63  ;;  %2614 = vpow2.f32 %v1755_v22  ;;  %v5721_v43 = vld [vmem:[#allocation23_spill] sm:$0xff] }
 0x2cb   :  { %v1763_v31 = vmul.f32 1.442695, %v1723_v25  ;;  %v1742_v24 = vsub.f32 %v5712_v61, %v4619_v63  ;;  %v1743_v28 = vsub.f32 %v5713_v29, %v4639_v59  ;;  %2616 = vpow2.f32 %v1757_v8 }
 0x2cc   :  { %v1765_v35 = vmul.f32 1.442695, %v1724_v60  ;;  %v1744_v27 = vsub.f32 %v5714_v44, %v4639_v59  ;;  %v1745_v16 = vsub.f32 %v5715_v42, %v4647_v37  ;;  %2618 = vpow2.f32 %v1759_v1 }
 0x2cd   :  { %v1767_v12 = vmul.f32 1.442695, %v1725_v40  ;;  %v1746_v47 = vsub.f32 %v4523_v13, %v4647_v37  ;;  %2620 = vpow2.f32 %v1761_v15  ;;  %v1769_v33 = vmul.f32 1.442695, %v1726_v36 }
 0x2ce   :  { %v1771_v17 = vmul.f32 1.442695, %v1727_v45  ;;  %2622 = vpow2.f32 %v1763_v31  ;;  %v1773_v50 = vmul.f32 1.442695, %v1728_v14  ;;  %v1775_v21 = vmul.f32 1.442695, %v1729_v7 }
 0x2cf   :  { %v1777_v9 = vmul.f32 1.442695, %v1730_v49  ;;  %2624 = vpow2.f32 %v1765_v35  ;;  %v1779_v51 = vmul.f32 1.442695, %v1731_v11  ;;  %v1781_v56 = vmul.f32 1.442695, %v1732_v34 }
 0x2d0   :  { %2626 = vpow2.f32 %v1767_v12  ;;  %v1783_v4 = vmul.f32 1.442695, %v1733_v3  ;;  %v1785_v55 = vmul.f32 1.442695, %v1734_v19  ;;  %v5364_v57 = vmov 0.0  }
 0x2d1   :  { %2478 = vmatprep.subr.mxu0 %v5364_v57  ;;  %2486 = vmatprep.mubr.msk.f32.mxu0 %vm2773_vm3, %v5364_v57  ;;  %2628 = vpow2.f32 %v1769_v33  ;;  %v1787_v13 = vmul.f32 1.442695, %v1735_v26  ;;  %v1789_v30 = vmul.f32 1.442695, %v1736_v53  ;;  %v1791_v25 = vmul.f32 1.442695, %v1737_v39 }
 0x2d2   :  { %2479 = vmatpush3.msra.mxu0 %v2218_v2  ;;  %2489 = vmatprep.subr.mxu1 %v5364_v57  ;;  %2630 = vpow2.f32 %v1771_v17  ;;  %v4672_v60 = vmul.f32 1.442695, %v1738_v10  ;;  %v4674_v63 = vmul.f32 1.442695, %v1739_v52  ;;  %v4676_v23 = vmul.f32 1.442695, %v1740_v48 }
 0x2d3   :  { %2480 = vmatprep.subr.mxu0 %v5364_v57  ;;  %2497 = vmatprep.mubr.msk.f32.mxu1 %vm2773_vm3, %v5364_v57  ;;  %v4680_v40 = vpop.eup %2606  ;;  %2632 = vpow2.f32 %v1773_v50  ;;  %v4682_v36 = vmul.f32 1.442695, %v1741_v54  ;;  %v4684_v45 = vmul.f32 1.442695, %v1742_v24  ;;  %v4686_v14 = vmul.f32 1.442695, %v1743_v28 }
 0x2d4   :  { %2481 = vmatpush3.msra.mxu0 %v2217_v0  ;;  %v4688_v7 = vpop.eup %2608  ;;  %2634 = vpow2.f32 %v1775_v21  ;;  %v4690_v49 = vmul.f32 1.442695, %v1744_v27  ;;  %v4692_v32 = vmul.f32 1.442695, %v1745_v16  ;;  %v1811_v11 = vsel %vm209_vm2, %v4680_v40, 0.0  ;;  %v5717_v26 = vld [vmem:[#allocation11_spill] sm:$0xff] }
 0x2d5   :  { %2482 = vmatprep.subr.mxu0 %v5364_v57  ;;  %v4697_v62 = vpop.eup %2610  ;;  %2636 = vpow2.f32 %v1777_v9  ;;  %v4699_v34 = vmul.f32 1.442695, %v1746_v47  ;;  %v1812_v3 = vsel %vm209_vm2, %v4688_v7, 0.0  ;;  %v1196_v6 = vrot.slane %v5716_v38, 2  ;;  %v5724_v48 = vld [vmem:[#allocation13_spill] sm:$0xff]  ;;  %v5725_v24 = vld [vmem:[#allocation34_spill] sm:$0xff] }
 0x2d6   :  { %2483 = vmatpush3.msra.mxu0 %v2216_v18  ;;  %v4704_v59 = vpop.eup %2612  ;;  %2638 = vpow2.f32 %v1779_v51  ;;  %v1813_v19 = vadd.f32 %v1812_v3, %v1811_v11  ;;  %v1820_v22 = vsel %vm209_vm2, %v4697_v62, 0.0  ;;  %v1205_v53 = vrot.slane %v5717_v26, 2  ;;  %v2305_v33 = vld [vmem:[%s5268_s10 + $0x18] sm:$0xff]  ;;  %v2304_v17 = vld [vmem:[%s5268_s10 + $0x10] sm:$0xff] }
 0x2d7   :  { %2484 = vmatprep.subr.mxu0 %v5364_v57  ;;  %v4710_v8 = vpop.eup %2614  ;;  %2640 = vpow2.f32 %v1781_v56  ;;  %v1821_v37 = vsel %vm209_vm2, %v4704_v59, 0.0  ;;  %v5719_v39 = vrot.slane %v5718_v46, 2  ;;  %v5722_v10 = vrot.slane %v5721_v43, 1  ;;  %2490 = vmatpush3.msra.mxu1 %v2305_v33  ;;  %v5728_v18 = vld [vmem:[#allocation35_spill] sm:$0xff] }
 0x2d8   :  { %2485 = vmatpush3.msra.mxu0 %v2215_v5  ;;  %v4724_v52 = vpop.eup %2616  ;;  %2642 = vpow2.f32 %v1783_v4  ;;  %v1814_v15 = vrot.slane %v1813_v19, 4  ;;  %v1822_v20 = vadd.f32 %v1821_v37, %v1820_v22  ;;  %v1252_v41 = vrot.slane %v5724_v48, 1  ;;  %2491 = vmatprep.subr.mxu1 %v5364_v57  ;;  %v5731_v5 = vld [vmem:[#allocation22_spill] sm:$0xff] }
 0x2d9   :  { %v4717_v1 = vadd.f32 %v5719_v39, %v5718_v46  ;;  %v4722_v58 = vadd.f32 %v5722_v10, %v5721_v43  ;;  %v4727_v54 = vpop.eup %2618  ;;  %2644 = vpow2.f32 %v1785_v55  ;;  %v1829_v31 = vsel %vm209_vm2, %v4710_v8, 0.0  ;;  %2492 = vmatpush3.msra.mxu1 %v2304_v17 }
 0x2da   :  { %v1830_v61 = vsel %vm209_vm2, %v4724_v52, 0.0  ;;  %v1261_v29 = vrot.slane %v5725_v24, 1  ;;  %v4734_v28 = vpop.eup %2620  ;;  %2646 = vpow2.f32 %v1787_v13  ;;  %v1815_v35 = vadd.f32 %v1814_v15, %v1813_v19  ;;  %2493 = vmatprep.subr.mxu1 %v5364_v57 }
 0x2db   :  { %5720 = vst [vmem:[#allocation77_spill] sm:$0xff] %v4717_v1  ;;  %5723 = vst [vmem:[#allocation68_spill] sm:$0xff] %v4722_v58  ;;  %v4737_v44 = vadd.f32 %v1196_v6, %v5716_v38  ;;  %v4740_v27 = vadd.f32 %v1205_v53, %v5717_v26  ;;  %v4742_v42 = vpop.eup %2622  ;;  %2648 = vpow2.f32 %v1789_v30  ;;  %v1838_v16 = vsel %vm209_vm2, %v4727_v54, 0.0 }
 0x2dc   :  { %v1839_v12 = vsel %vm209_vm2, %v4734_v28, 0.0  ;;  %v4755_v2 = vpop.eup %2624  ;;  %2650 = vpow2.f32 %v1791_v25  ;;  %v1816_v50 = vrot.slane %v1815_v35, 2  ;;  %v1823_v21 = vrot.slane %v1822_v20, 4 }
 0x2dd   :  { %5726 = vst [vmem:[#allocation78_spill] sm:$0xff] %v4737_v44  ;;  %5727 = vst [vmem:[#allocation62_spill] sm:$0xff] %v4740_v27  ;;  %v1831_v9 = vadd.f32 %v1830_v61, %v1829_v31  ;;  %v4757_v51 = vpop.eup %2626  ;;  %2652 = vpow2.f32 %v4672_v60  ;;  %v1840_v0 = vadd.f32 %v1839_v12, %v1838_v16  ;;  %v1847_v56 = vsel %vm209_vm2, %v4742_v42, 0.0 }
 0x2de   :  { %v1848_v4 = vsel %vm209_vm2, %v4755_v2, 0.0  ;;  %v4765_v55 = vpop.eup %2628  ;;  %2654 = vpow2.f32 %v4674_v63  ;;  %v1955_v13 = vmul.f32 %v4680_v40, %v5728_v18  ;;  %v4771_v30 = vadd.f32 %v1252_v41, %v5724_v48 }
 0x2df   :  { %v4774_v25 = vadd.f32 %v1261_v29, %v5725_v24  ;;  %v4776_v60 = vpop.eup %2630  ;;  %v1849_v11 = vadd.f32 %v1848_v4, %v1847_v56  ;;  %v4780_v3 = vmul.f32 %v4688_v7, %v5731_v5  ;;  %2656 = vpow2.f32 %v4676_v23 }
 0x2e0   :  { %5729 = vst [vmem:[#allocation79_spill] sm:$0xff] %v4771_v30  ;;  %v4785_v40 = vpop.eup %2632  ;;  %v1824_v19 = vadd.f32 %v1823_v21, %v1822_v20  ;;  %v1856_v22 = vsel %vm209_vm2, %v4757_v51, 0.0  ;;  %v1817_v7 = vadd.f32 %v1816_v50, %v1815_v35  ;;  %v1832_v37 = vrot.slane %v1831_v9, 4 }
 0x2e1   :  { %5730 = vst [vmem:[#allocation21_spill] sm:$0xff] %v4774_v25  ;;  %5732 = vst [vmem:[#allocation24_spill] sm:$0xff] %v4780_v3  ;;  %v4791_v53 = vpop.eup %2634  ;;  %v1841_v46 = vrot.slane %v1840_v0, 4  ;;  %v1857_v39 = vsel %vm209_vm2, %v4765_v55, 0.0  ;;  %2658 = vpow2.f32 %v4682_v36  ;;  %v4800_v23 = vmul.f32 %v4697_v62, %v5728_v18 }
 0x2e2   :  { %v4795_v43 = vpop.eup %2636  ;;  %v4804_v10 = vmul.f32 %v4704_v59, %v5731_v5  ;;  %v4807_v15 = vsel %vm209_vm2, %v1955_v13, 0.0  ;;  %2660 = vpow2.f32 %v4684_v45  ;;  %v1850_v48 = vrot.slane %v1849_v11, 4 }
 0x2e3   :  { %5734 = vst [vmem:[#allocation44_spill] sm:$0xff] %v4800_v23  ;;  %5736 = vst [vmem:[#allocation45_spill] sm:$0xff] %v4807_v15  ;;  %v4809_v20 = vpop.eup %2638  ;;  %v1858_v41 = vadd.f32 %v1857_v39, %v1856_v22  ;;  %v4814_v36 = vmul.f32 %v4710_v8, %v5728_v18  ;;  %2662 = vpow2.f32 %v4686_v14  ;;  %v1825_v62 = vrot.slane %v1824_v19, 2 }
 0x2e4   :  { %5735 = vst [vmem:[#allocation36_spill] sm:$0xff] %v4804_v10  ;;  %v4816_v31 = vpop.eup %2640  ;;  %v1865_v59 = vsel %vm209_vm2, %v4776_v60, 0.0  ;;  %v4823_v61 = vmul.f32 %v4724_v52, %v5731_v5  ;;  %2664 = vpow2.f32 %v4690_v49  ;;  %v1818_v45 = vrot.slane %v1817_v7, 1 }
 0x2e5   :  { %5737 = vst [vmem:[#allocation25_spill] sm:$0xff] %v4814_v36  ;;  %v4825_v24 = vpop.eup %2642  ;;  %v1833_v29 = vadd.f32 %v1832_v37, %v1831_v9  ;;  %v1842_v8 = vadd.f32 %v1841_v46, %v1840_v0  ;;  %2666 = vpow2.f32 %v4692_v32  ;;  %v1866_v14 = vsel %vm209_vm2, %v4785_v40, 0.0 }
 0x2e6   :  { %5738 = vst [vmem:[#allocation46_spill] sm:$0xff] %v4823_v61  ;;  %v4828_v35 = vpop.eup %2644  ;;  %v1874_v16 = vsel %vm209_vm2, %v4791_v53, 0.0  ;;  %v1875_v52 = vsel %vm209_vm2, %v4795_v43, 0.0  ;;  %2668 = vpow2.f32 %v4699_v34  ;;  %v1851_v49 = vadd.f32 %v1850_v48, %v1849_v11 }
 0x2e7   :  { %v4837_v12 = vpop.eup %2646  ;;  %v1859_v33 = vrot.slane %v1858_v41, 4  ;;  %v1867_v17 = vadd.f32 %v1866_v14, %v1865_v59  ;;  %v1876_v21 = vadd.f32 %v1875_v52, %v1874_v16  ;;  %v1883_v32 = vsel %vm209_vm2, %v4809_v20, 0.0 }
 0x2e8   :  { %v4840_v50 = vpop.eup %2648  ;;  %v1884_v9 = vsel %vm209_vm2, %v4816_v31, 0.0  ;;  %v1892_v0 = vsel %vm209_vm2, %v4825_v24, 0.0  ;;  %v4850_v4 = vadd.f32 %v1825_v62, %v1824_v19  ;;  %v1834_v34 = vrot.slane %v1833_v29, 2 }
 0x2e9   :  { %v4848_v56 = vpop.eup %2650  ;;  %v1868_v13 = vrot.slane %v1867_v17, 4  ;;  %v4854_v11 = vmul.f32 %v4727_v54, %v5728_v18  ;;  %v1877_v37 = vrot.slane %v1876_v21, 4  ;;  %v1885_v46 = vadd.f32 %v1884_v9, %v1883_v32 }
 0x2ea   :  { %v4856_v22 = vpop.eup %2652  ;;  %v1893_v39 = vsel %vm209_vm2, %v4828_v35, 0.0  ;;  %v1901_v48 = vsel %vm209_vm2, %v4837_v12, 0.0  ;;  %v4864_v19 = vadd.f32 %v1818_v45, %v1817_v7  ;;  %v1843_v62 = vrot.slane %v1842_v8, 2 }
 0x2eb   :  { %5739 = vst [vmem:[#allocation26_spill] sm:$0xff] %v4854_v11  ;;  %v4862_v59 = vpop.eup %2654  ;;  %v1852_v14 = vrot.slane %v1851_v49, 2  ;;  %v1894_v16 = vadd.f32 %v1893_v39, %v1892_v0  ;;  %v1860_v52 = vadd.f32 %v1859_v33, %v1858_v41  ;;  %v1869_v54 = vadd.f32 %v1868_v13, %v1867_v17 }
 0x2ec   :  { %5740 = vst [vmem:[#allocation47_spill] sm:$0xff] %v4864_v19  ;;  %v1886_v57 = vrot.slane %v1885_v46, 4  ;;  %v1902_v47 = vsel %vm209_vm2, %v4840_v50, 0.0  ;;  %v4868_v32 = vpop.eup %2656  ;;  %v1878_v9 = vadd.f32 %v1877_v37, %v1876_v21  ;;  %v1910_v38 = vsel %vm209_vm2, %v4848_v56, 0.0 }
 0x2ed   :  { %5741 = vst [vmem:[#allocation28_spill] sm:$0xff] %v4868_v32  ;;  %v1895_v26 = vrot.slane %v1894_v16, 4  ;;  %v1903_v6 = vadd.f32 %v1902_v47, %v1901_v48  ;;  %v4872_v25 = vadd.f32 %v1834_v34, %v1833_v29  ;;  %v1911_v45 = vsel %vm209_vm2, %v4856_v22, 0.0 }
 0x2ee   :  { %v1887_v7 = vadd.f32 %v1886_v57, %v1885_v46  ;;  %v1919_v41 = vsel %vm209_vm2, %v4862_v59, 0.0  ;;  %v4878_v33 = vpop.eup %2658  ;;  %v1827_v17 = vrot.slane %v4850_v4, 1  ;;  %v1844_v0 = vadd.f32 %v1843_v62, %v1842_v8 }
 0x2ef   :  { %5742 = vst [vmem:[#allocation48_spill] sm:$0xff] %v4878_v33  ;;  %v1896_v21 = vadd.f32 %v1895_v26, %v1894_v16  ;;  %v1904_v13 = vrot.slane %v1903_v6, 4  ;;  %v4881_v47 = vpop.eup %2660  ;;  %v1853_v37 = vadd.f32 %v1852_v14, %v1851_v49  ;;  %v1861_v39 = vrot.slane %v1860_v52, 2 }
 0x2f0   :  { %v1912_v29 = vadd.f32 %v1911_v45, %v1910_v38  ;;  %v1920_v57 = vsel %vm209_vm2, %v4868_v32, 0.0  ;;  %v4885_v34 = vpop.eup %2662  ;;  %v1870_v46 = vrot.slane %v1869_v54, 2  ;;  %v1879_v48 = vrot.slane %v1878_v9, 2 }
 0x2f1   :  { %v1905_v30 = vadd.f32 %v1904_v13, %v1903_v6  ;;  %v1921_v58 = vadd.f32 %v1920_v57, %v1919_v41  ;;  %v4887_v1 = vpop.eup %2664  ;;  %v1836_v8 = vrot.slane %v4872_v25, 1  ;;  %v1888_v26 = vrot.slane %v1887_v7, 2 }
 0x2f2   :  { %v1913_v62 = vrot.slane %v1912_v29, 4  ;;  %v1928_v49 = vsel %vm209_vm2, %v4878_v33, 0.0  ;;  %v4892_v14 = vpop.eup %2666  ;;  %v1845_v38 = vrot.slane %v1844_v0, 1  ;;  %v1897_v16 = vrot.slane %v1896_v21, 2 }
 0x2f3   :  { %5743 = vst [vmem:[#allocation29_spill] sm:$0xff] %v4892_v14  ;;  %v1906_v45 = vrot.slane %v1905_v30, 2  ;;  %v1922_v27 = vrot.slane %v1921_v58, 4  ;;  %v4894_v63 = vpop.eup %2668  ;;  %v1854_v44 = vrot.slane %v1853_v37, 1  ;;  %v1862_v6 = vadd.f32 %v1861_v39, %v1860_v52 }
 0x2f4   :  { %5744 = vst [vmem:[#allocation49_spill] sm:$0xff] %v4894_v63  ;;  %v1914_v41 = vadd.f32 %v1913_v62, %v1912_v29  ;;  %v1929_v13 = vsel %vm209_vm2, %v4881_v47, 0.0  ;;  %v1871_v57 = vadd.f32 %v1870_v46, %v1869_v54  ;;  %v1880_v19 = vadd.f32 %v1879_v48, %v1878_v9 }
 0x2f5   :  { %v1923_v15 = vadd.f32 %v1922_v27, %v1921_v58  ;;  %v1930_v61 = vadd.f32 %v1929_v13, %v1928_v49  ;;  %v1889_v36 = vadd.f32 %v1888_v26, %v1887_v7  ;;  %v1937_v10 = vsel %vm209_vm2, %v4885_v34, 0.0 }
 0x2f6   :  { %v1915_v33 = vrot.slane %v1914_v41, 2  ;;  %v1938_v11 = vsel %vm209_vm2, %v4887_v1, 0.0  ;;  %v1898_v23 = vadd.f32 %v1897_v16, %v1896_v21  ;;  %v1907_v3 = vadd.f32 %v1906_v45, %v1905_v30 }
 0x2f7   :  { %v1924_v32 = vrot.slane %v1923_v15, 2  ;;  %v1931_v52 = vrot.slane %v1930_v61, 4  ;;  %v1863_v39 = vrot.slane %v1862_v6, 1  ;;  %v1939_v29 = vadd.f32 %v1938_v11, %v1937_v10 }
 0x2f8   :  { %v1946_v54 = vsel %vm209_vm2, %v4892_v14, 0.0  ;;  %v1947_v58 = vsel %vm209_vm2, %v4894_v63, 0.0  ;;  %v1872_v27 = vrot.slane %v1871_v57, 1  ;;  %v1916_v9 = vadd.f32 %v1915_v33, %v1914_v41 }
 0x2f9   :  { %v1932_v7 = vadd.f32 %v1931_v52, %v1930_v61  ;;  %v1948_v46 = vadd.f32 %v1947_v58, %v1946_v54  ;;  %v1881_v48 = vrot.slane %v1880_v19, 1  ;;  %v1890_v26 = vrot.slane %v1889_v36, 1 }
 0x2fa   :  { %v1925_v62 = vadd.f32 %v1924_v32, %v1923_v15  ;;  %v1940_v49 = vrot.slane %v1939_v29, 4  ;;  %v1899_v21 = vrot.slane %v1898_v23, 1  ;;  %v1908_v30 = vrot.slane %v1907_v3, 1 }
 0x2fb   :  { %v1933_v16 = vrot.slane %v1932_v7, 2  ;;  %v1949_v45 = vrot.slane %v1948_v46, 4  ;;  %v4907_v10 = vadd.f32 %v1827_v17, %v4850_v4  ;;  %v4910_v11 = vadd.f32 %v1836_v8, %v4872_v25 }
 0x2fc   :  { %v4912_v13 = vadd.f32 %v1845_v38, %v1844_v0  ;;  %v1941_v63 = vadd.f32 %v1940_v49, %v1939_v29  ;;  %v4914_v33 = vadd.f32 %v1854_v44, %v1853_v37  ;;  %v1917_v61 = vrot.slane %v1916_v9, 1 }
 0x2fd   :  { %v1934_v41 = vadd.f32 %v1933_v16, %v1932_v7  ;;  %v1950_v52 = vadd.f32 %v1949_v45, %v1948_v46  ;;  %v4916_v15 = vadd.f32 %v1863_v39, %v1862_v6  ;;  %v4918_v32 = vadd.f32 %v1872_v27, %v1871_v57  ;;  %v5745_v57 = vld [vmem:[#allocation82_spill] sm:$0xff]  ;;  %v5746_v39 = vld [vmem:[#allocation61_spill] sm:$0xff] }
 0x2fe   :  { %v1926_v54 = vrot.slane %v1925_v62, 1  ;;  %v1942_v58 = vrot.slane %v1941_v63, 2  ;;  %v4920_v14 = vadd.f32 %v1881_v48, %v1880_v19  ;;  %v4922_v4 = vadd.f32 %v1890_v26, %v1889_v36  ;;  %v5751_v26 = vld [vmem:[#allocation36_spill] sm:$0xff]  ;;  %v5753_v16 = vld [vmem:[#allocation46_spill] sm:$0xff] }
 0x2ff   :  { %v4924_v25 = vadd.f32 %v1899_v21, %v1898_v23  ;;  %v4926_v17 = vadd.f32 %v1908_v30, %v1907_v3  ;;  %v1935_v0 = vrot.slane %v1934_v41, 1  ;;  %v1962_v44 = vmul.f32 %v4734_v28, %v5731_v5 }
 0x300   :  { %v1963_v37 = vmul.f32 %v4742_v42, %v5728_v18  ;;  %v1964_v8 = vmul.f32 %v4755_v2, %v5731_v5  ;;  %v4934_v38 = vadd.f32 %v1917_v61, %v1916_v9  ;;  %v1943_v19 = vadd.f32 %v1942_v58, %v1941_v63  ;;  %v5754_v58 = vld [vmem:[#allocation45_spill] sm:$0xff] }
 0x301   :  { %v1951_v6 = vrot.slane %v1950_v52, 2  ;;  %v1965_v23 = vmul.f32 %v4757_v51, %v5728_v18  ;;  %v4938_v36 = vadd.f32 %v1926_v54, %v1925_v62  ;;  %v1966_v3 = vmul.f32 %v4765_v55, %v5731_v5  ;;  %v5752_v62 = vld [vmem:[#allocation25_spill] sm:$0xff] }
 0x302   :  { %v1967_v28 = vmul.f32 %v4776_v60, %v5728_v18  ;;  %v1968_v42 = vmul.f32 %v4785_v40, %v5731_v5  ;;  %v1969_v2 = vmul.f32 %v4791_v53, %v5728_v18  ;;  %v1970_v63 = vmul.f32 %v4795_v43, %v5731_v5 }
 0x303   :  { %v1971_v51 = vmul.f32 %v4809_v20, %v5745_v57  ;;  %v1972_v29 = vmul.f32 %v4816_v31, %v5746_v39  ;;  %v4954_v27 = vadd.f32 %v1935_v0, %v1934_v41  ;;  %v1973_v55 = vmul.f32 %v4825_v24, %v5745_v57  ;;  %v5747_v24 = vld [vmem:[#allocation28_spill] sm:$0xff] }
 0x304   :  { %v1974_v60 = vmul.f32 %v4828_v35, %v5746_v39  ;;  %v1975_v18 = vmul.f32 %v4837_v12, %v5745_v57  ;;  %v1944_v40 = vrot.slane %v1943_v19, 1  ;;  %v1952_v53 = vadd.f32 %v1951_v6, %v1950_v52  ;;  %v5748_v12 = vld [vmem:[#allocation24_spill] sm:$0xff] }
 0x305   :  { %v1976_v5 = vmul.f32 %v4840_v50, %v5746_v39  ;;  %v4966_v43 = vmul.f32 %v4848_v56, %v5745_v57  ;;  %v4970_v20 = vmul.f32 %v4856_v22, %v5746_v39  ;;  %v4974_v31 = vmul.f32 %v4862_v59, %v5745_v57  ;;  %v5749_v50 = vld [vmem:[#allocation44_spill] sm:$0xff]  ;;  %v5750_v56 = vld [vmem:[#allocation26_spill] sm:$0xff] }
 0x306   :  { %v4978_v35 = vmul.f32 %v5747_v24, %v5746_v39  ;;  %v1988_v9 = vsel %vm209_vm2, %v5748_v12, 0.0  ;;  %v1996_v7 = vsel %vm209_vm2, %v5749_v50, 0.0  ;;  %v2014_v46 = vsel %vm209_vm2, %v5750_v56, 0.0 }
 0x307   :  { %v2015_v22 = vsel %vm209_vm2, %v1962_v44, 0.0  ;;  %v2023_v48 = vsel %vm209_vm2, %v1963_v37, 0.0  ;;  %v1997_v59 = vsel %vm209_vm2, %v5751_v26, 0.0  ;;  %v2005_v49 = vsel %vm209_vm2, %v5752_v62, 0.0 }
 0x308   :  { %v2016_v21 = vadd.f32 %v2015_v22, %v2014_v46  ;;  %v2024_v30 = vsel %vm209_vm2, %v1964_v8, 0.0  ;;  %v2006_v45 = vsel %vm209_vm2, %v5753_v16, 0.0  ;;  %v2032_v41 = vsel %vm209_vm2, %v1965_v23, 0.0 }
 0x309   :  { %v2025_v61 = vadd.f32 %v2024_v30, %v2023_v48  ;;  %v2033_v52 = vsel %vm209_vm2, %v1966_v3, 0.0  ;;  %v1953_v54 = vrot.slane %v1952_v53, 1  ;;  %v1989_v0 = vadd.f32 %v1988_v9, %v5754_v58  ;;  %v5755_v48 = vld [vmem:[#allocation48_spill] sm:$0xff] }
 0x30a   :  { %v2017_v44 = vrot.slane %v2016_v21, 4  ;;  %v2034_v37 = vadd.f32 %v2033_v52, %v2032_v41  ;;  %v1998_v6 = vadd.f32 %v1997_v59, %v1996_v7  ;;  %v2041_v12 = vsel %vm209_vm2, %v1967_v28, 0.0 }
 0x30b   :  { %v2026_v24 = vrot.slane %v2025_v61, 4  ;;  %v2042_v50 = vsel %vm209_vm2, %v1968_v42, 0.0  ;;  %v2007_v8 = vadd.f32 %v2006_v45, %v2005_v49  ;;  %v1981_v23 = vmul.f32 %v5755_v48, %v5745_v57 }
 0x30c   :  { %v2018_v56 = vadd.f32 %v2017_v44, %v2016_v21  ;;  %v2035_v46 = vrot.slane %v2034_v37, 4  ;;  %v2043_v22 = vadd.f32 %v2042_v50, %v2041_v12  ;;  %v2050_v3 = vsel %vm209_vm2, %v1969_v2, 0.0  ;;  %v5756_v21 = vld [vmem:[#allocation29_spill] sm:$0xff] }
 0x30d   :  { %v2027_v26 = vadd.f32 %v2026_v24, %v2025_v61  ;;  %v2051_v9 = vsel %vm209_vm2, %v1970_v63, 0.0  ;;  %v1982_v7 = vmul.f32 %v4881_v47, %v5746_v39  ;;  %v1983_v28 = vmul.f32 %v4885_v34, %v5745_v57  ;;  %v5757_v47 = vld [vmem:[#allocation49_spill] sm:$0xff] }
 0x30e   :  { %v2036_v59 = vadd.f32 %v2035_v46, %v2034_v37  ;;  %v2044_v42 = vrot.slane %v2043_v22, 4  ;;  %v5008_v62 = vadd.f32 %v1944_v40, %v1943_v19  ;;  %v1984_v49 = vmul.f32 %v4887_v1, %v5746_v39 }
 0x30f   :  { %v1985_v30 = vmul.f32 %v5756_v21, %v5745_v57  ;;  %v1990_v16 = vrot.slane %v1989_v0, 4  ;;  %v1999_v2 = vrot.slane %v1998_v6, 4  ;;  %v2008_v45 = vrot.slane %v2007_v8, 4 }
 0x310   :  { %v2019_v63 = vrot.slane %v2018_v56, 2  ;;  %v2052_v61 = vadd.f32 %v2051_v9, %v2050_v3  ;;  %v5014_v41 = vadd.f32 %v1953_v54, %v1952_v53  ;;  %v1986_v34 = vmul.f32 %v5757_v47, %v5746_v39 }
 0x311   :  { %v2028_v52 = vrot.slane %v2027_v26, 2  ;;  %v2059_v19 = vsel %vm209_vm2, %v1971_v51, 0.0  ;;  %v2037_v40 = vrot.slane %v2036_v59, 2  ;;  %v2045_v58 = vadd.f32 %v2044_v42, %v2043_v22 }
 0x312   :  { %v2060_v1 = vsel %vm209_vm2, %v1972_v29, 0.0  ;;  %v2077_v44 = vsel %vm209_vm2, %v1975_v18, 0.0  ;;  %v5021_v57 = vadd.f32 %v1990_v16, %v1989_v0  ;;  %v2068_v37 = vsel %vm209_vm2, %v1973_v55, 0.0 }
 0x313   :  { %v2069_v24 = vsel %vm209_vm2, %v1974_v60, 0.0  ;;  %v2078_v53 = vsel %vm209_vm2, %v1976_v5, 0.0  ;;  %v5026_v54 = vadd.f32 %v1999_v2, %v1998_v6  ;;  %v5028_v39 = vadd.f32 %v2008_v45, %v2007_v8 }
 0x314   :  { %v5030_v12 = vadd.f32 %v2019_v63, %v2018_v56  ;;  %v2053_v51 = vrot.slane %v2052_v61, 4  ;;  %v2029_v50 = vadd.f32 %v2028_v52, %v2027_v26  ;;  %v2061_v46 = vadd.f32 %v2060_v1, %v2059_v19 }
 0x315   :  { %v2079_v29 = vadd.f32 %v2078_v53, %v2077_v44  ;;  %v2086_v18 = vsel %vm209_vm2, %v4966_v43, 0.0  ;;  %v2038_v0 = vadd.f32 %v2037_v40, %v2036_v59  ;;  %v2046_v22 = vrot.slane %v2045_v58, 2  ;;  %v5758_v40 = vld [vmem:[#allocation47_spill] sm:$0xff] }
 0x316   :  { %v2070_v55 = vadd.f32 %v2069_v24, %v2068_v37  ;;  %v2087_v60 = vsel %vm209_vm2, %v4970_v20, 0.0  ;;  %v2095_v6 = vsel %vm209_vm2, %v4974_v31, 0.0  ;;  %v2096_v8 = vsel %vm209_vm2, %v4978_v35, 0.0 }
 0x317   :  { %v2088_v5 = vadd.f32 %v2087_v60, %v2086_v18  ;;  %v2104_v56 = vsel %vm209_vm2, %v1981_v23, 0.0  ;;  %v2054_v48 = vadd.f32 %v2053_v51, %v2052_v61  ;;  %v2097_v26 = vadd.f32 %v2096_v8, %v2095_v6 }
 0x318   :  { %v2105_v3 = vsel %vm209_vm2, %v1982_v7, 0.0  ;;  %v2113_v43 = vsel %vm209_vm2, %v1983_v28, 0.0  ;;  %v2080_v9 = vrot.slane %v2079_v29, 4  ;;  %v2114_v20 = vsel %vm209_vm2, %v1984_v49, 0.0 }
 0x319   :  { %v2089_v59 = vrot.slane %v2088_v5, 4  ;;  %v2106_v42 = vadd.f32 %v2105_v3, %v2104_v56  ;;  %v2030_v21 = vrot.slane %v2029_v50, 1  ;;  %v2098_v16 = vrot.slane %v2097_v26, 4 }
 0x31a   :  { %v2122_v31 = vsel %vm209_vm2, %v1985_v30, 0.0  ;;  %v2123_v2 = vsel %vm209_vm2, %v1986_v34, 0.0  ;;  %v2010_v35 = vrot.slane %v5028_v39, 2  ;;  %v2062_v23 = vrot.slane %v2061_v46, 4 }
 0x31b   :  { %v2071_v45 = vrot.slane %v2070_v55, 4  ;;  %v2115_v63 = vadd.f32 %v2114_v20, %v2113_v43  ;;  %v2021_v7 = vrot.slane %v5030_v12, 1  ;;  %v2039_v61 = vrot.slane %v2038_v0, 1 }
 0x31c   :  { %v2090_v28 = vadd.f32 %v2089_v59, %v2088_v5  ;;  %v2107_v47 = vrot.slane %v2106_v42, 4  ;;  %v2055_v52 = vrot.slane %v2054_v48, 2  ;;  %v5048_v19 = vadd.f32 %v2080_v9, %v2079_v29 }
 0x31d   :  { %v2124_v49 = vadd.f32 %v2123_v2, %v2122_v31  ;;  %2670 = vrcp.f32 %v5758_v40  ;;  %v5051_v1 = vadd.f32 %v2030_v21, %v2029_v50  ;;  %v5053_v30 = vadd.f32 %v2046_v22, %v2045_v58  ;;  %v5768_v21 = vld [vmem:[#allocation54_spill] sm:$0xff]  ;;  %v5769_v2 = vld [vmem:[#allocation55_spill] sm:$0xff] }
 0x31e   :  { %v2099_v34 = vadd.f32 %v2098_v16, %v2097_v26  ;;  %2672 = vrcp.f32 %v4907_v10  ;;  %v5056_v44 = vadd.f32 %v2062_v23, %v2061_v46  ;;  %v5058_v37 = vadd.f32 %v2071_v45, %v2070_v55  ;;  %v5759_v46 = vld [vmem:[#allocation78_spill] sm:$0xff]  ;;  %v5766_v26 = vld [vmem:[#allocation15_spill] sm:$0xff] }
 0x31f   :  { %v2116_v24 = vrot.slane %v2115_v63, 4  ;;  %2674 = vrcp.f32 %v4910_v11  ;;  %v5061_v53 = vadd.f32 %v2039_v61, %v2038_v0  ;;  %v2091_v51 = vrot.slane %v2090_v28, 2  ;;  %v5761_v0 = vld [vmem:[#allocation19_spill] sm:$0xff] }
 0x320   :  { %v2108_v29 = vadd.f32 %v2107_v47, %v2106_v42  ;;  %2676 = vrcp.f32 %v4912_v13  ;;  %v5064_v50 = vadd.f32 %v2055_v52, %v2054_v48  ;;  %v2082_v58 = vrot.slane %v5048_v19, 2  ;;  %v5763_v13 = vld [vmem:[#allocation62_spill] sm:$0xff] }
 0x321   :  { %v2125_v18 = vrot.slane %v2124_v49, 4  ;;  %2678 = vrcp.f32 %v4914_v33  ;;  %v2100_v10 = vrot.slane %v2099_v34, 2  ;;  %v5760_v22 = vrot.slane %v5759_v46, 1  ;;  %v5765_v33 = vld [vmem:[#allocation53_spill] sm:$0xff] }
 0x322   :  { %2680 = vrcp.f32 %v4916_v15  ;;  %v5762_v55 = vrot.slane %v5761_v0, 2  ;;  %v5075_v5 = vadd.f32 %v2116_v24, %v2115_v63  ;;  %v5764_v6 = vrot.slane %v5763_v13, 1 }
 0x323   :  { %v1199_v11 = vadd.f32 %v5760_v22, %v5759_v46  ;;  %2682 = vrcp.f32 %v4918_v32  ;;  %v1277_v56 = vrot.slane %v5765_v33, 2  ;;  %v5082_v48 = vadd.f32 %v2091_v51, %v2090_v28  ;;  %v5772_v28 = vld [vmem:[#allocation65_spill] sm:$0xff]  ;;  %v5776_v46 = vld [vmem:[#allocation40_spill] sm:$0xff] }
 0x324   :  { %v1269_v60 = vadd.f32 %v5762_v55, %v5761_v0  ;;  %v1208_v8 = vadd.f32 %v5764_v6, %v5763_v13  ;;  %v2109_v15 = vrot.slane %v2108_v29, 2  ;;  %2684 = vrcp.f32 %v4920_v14  ;;  %v5775_v51 = vld [vmem:[#allocation57_spill] sm:$0xff]  ;;  %v5778_v55 = vld [vmem:[#allocation74_spill] sm:$0xff]  ;;  %v5779_v13 = vld [vmem:[#allocation68_spill] sm:$0xff] }
 0x325   :  { %v5767_v3 = vrot.slane %v5766_v26, 2  ;;  %v5088_v9 = vadd.f32 %v2125_v18, %v2124_v49  ;;  %2686 = vrcp.f32 %v4922_v4  ;;  %v1278_v59 = vadd.f32 %v1277_v56, %v5765_v33  ;;  %v5770_v4 = vld [vmem:[#allocation77_spill] sm:$0xff]  ;;  %v5780_v6 = vld [vmem:[#allocation58_spill] sm:$0xff] }
 0x326   :  { %v1270_v32 = vrot.slane %v1269_v60, 1  ;;  %v5092_v42 = vadd.f32 %v2100_v10, %v2099_v34  ;;  %2688 = vrcp.f32 %v4924_v25  ;;  %v1324_v16 = vrot.slane %v5768_v21, 1  ;;  %v5781_v33 = vld [vmem:[#allocation17_spill] sm:$0xff]  ;;  %v5782_v56 = vld [vmem:[#allocation42_spill] sm:$0xff] }
 0x327   :  { %v1287_v43 = vadd.f32 %v5767_v3, %v5766_v26  ;;  %v2118_v14 = vrot.slane %v5075_v5, 2  ;;  %2690 = vrcp.f32 %v4926_v17  ;;  %v1279_v31 = vrot.slane %v1278_v59, 1  ;;  %v5774_v17 = vld [vmem:[#allocation39_spill] sm:$0xff] }
 0x328   :  { %v1333_v23 = vrot.slane %v5769_v2, 1  ;;  %v5099_v45 = vadd.f32 %v2109_v15, %v2108_v29  ;;  %2692 = vrcp.f32 %v4934_v38  ;;  %v5771_v63 = vrot.slane %v5770_v4, 1  ;;  %v5783_v26 = vld [vmem:[#allocation67_spill] sm:$0xff] }
 0x329   :  { %v1288_v20 = vrot.slane %v1287_v43, 1  ;;  %v5773_v25 = vrot.slane %v5772_v28, 1  ;;  %2694 = vrcp.f32 %v4938_v36  ;;  %v1271_v52 = vadd.f32 %v1270_v32, %v1269_v60  ;;  %v5777_v36 = vld [vmem:[#allocation72_spill] sm:$0xff] }
 0x32a   :  { %v1217_v61 = vadd.f32 %v5771_v63, %v5770_v4  ;;  %v1280_v49 = vadd.f32 %v1279_v31, %v1278_v59  ;;  %v1351_v40 = vmul.f32 %v5774_v17, %v1199_v11  ;;  %v5110_v34 = vpop.eup %2670  ;;  %2696 = vrcp.f32 %v4954_v27  ;;  %v5788_v31 = vld [vmem:[#allocation18_spill] sm:$0xff]  ;;  %v5789_v4 = vld [vmem:[#allocation37_spill] sm:$0xff] }
 0x32b   :  { %v1298_v47 = vadd.f32 %v5773_v25, %v5772_v28  ;;  %v1289_v24 = vadd.f32 %v1288_v20, %v1287_v43  ;;  %v1325_v38 = vadd.f32 %v1324_v16, %v5768_v21  ;;  %v1352_v29 = vmul.f32 %v5775_v51, %v1208_v8  ;;  %v5115_v18 = vpop.eup %2672  ;;  %v5784_v8 = vld [vmem:[#allocation60_spill] sm:$0xff]  ;;  %v5786_v20 = vld [vmem:[#allocation79_spill] sm:$0xff]  ;;  %v5790_v63 = vld [vmem:[#allocation73_spill] sm:$0xff] }
 0x32c   :  { %v1334_v10 = vadd.f32 %v1333_v23, %v5769_v2  ;;  %v1353_v22 = vmul.f32 %v5776_v46, %v1217_v61  ;;  %v1359_v0 = vmul.f32 %v5777_v36, %v1271_v52  ;;  %v1360_v60 = vmul.f32 %v5778_v55, %v1280_v49  ;;  %v5121_v11 = vpop.eup %2674  ;;  %v5785_v43 = vld [vmem:[#allocation76_spill] sm:$0xff]  ;;  %v5787_v21 = vld [vmem:[#allocation43_spill] sm:$0xff]  ;;  %v5792_v36 = vld [vmem:[#allocation14_spill] sm:$0xff] }
 0x32d   :  { %v1354_v27 = vmul.f32 %v5780_v6, %v5779_v13  ;;  %v1355_v15 = vmul.f32 %v5782_v56, %v5781_v33  ;;  %v1356_v3 = vmul.f32 %v5784_v8, %v5783_v26  ;;  %v1361_v32 = vmul.f32 %v5785_v43, %v1289_v24  ;;  %v5130_v59 = vpop.eup %2676  ;;  %v5791_v46 = vld [vmem:[#allocation56_spill] sm:$0xff]  ;;  %v5793_v13 = vld [vmem:[#allocation21_spill] sm:$0xff]  ;;  %v5794_v6 = vld [vmem:[#allocation70_spill] sm:$0xff] }
 0x32e   :  { %v1357_v16 = vmul.f32 %v5787_v21, %v5786_v20  ;;  %v1362_v2 = vmul.f32 %v5788_v31, %v1298_v47  ;;  %v5135_v23 = vpop.eup %2678  ;;  %v1363_v61 = vmul.f32 %v5790_v63, %v5789_v4  ;;  %v1386_v28 = vsel %vm1385_vm4, %v1352_v29, %v1351_v40  ;;  %v5795_v33 = vld [vmem:[#allocation66_spill] sm:$0xff]  ;;  %v1368_v21 = vld [vmem:[%s5260_s2 + $0x10] sm:$0xff] }
 0x32f   :  { %v5140_v25 = vpop.eup %2680  ;;  %v1388_v52 = vsel %vm1387_vm5, %v1353_v22, %v1386_v28  ;;  %v1399_v49 = vsel %vm1385_vm4, %v1360_v60, %v1359_v0  ;;  %v1992_v51 = vrot.slane %v5021_v57, 2  ;;  %v2001_v40 = vrot.slane %v5026_v54, 2  ;;  %v1367_v26 = vld [vmem:[%s5260_s2] sm:$0xff] }
 0x330   :  { %v5144_v47 = vpop.eup %2682  ;;  %v1390_v17 = vsel %vm1389_vm6, %v1354_v27, %v1388_v52  ;;  %v1400_v24 = vsel %vm1387_vm5, %v1361_v32, %v1399_v49  ;;  %v1364_v55 = vmul.f32 %v5792_v36, %v5791_v46  ;;  %v1358_v27 = vmul.f32 %v5794_v6, %v5793_v13 }
 0x331   :  { %v5150_v29 = vpop.eup %2684  ;;  %v1392_v22 = vsel %vm1391_vm7, %v1355_v15, %v1390_v17  ;;  %v1401_v0 = vsel %vm1389_vm6, %v1362_v2, %v1400_v24  ;;  %v1365_v56 = vmul.f32 %v5795_v33, %v1325_v38  ;;  %v5796_v15 = vld [vmem:[#allocation16_spill] sm:$0xff]  ;;  %v2011_v38 = vadd.f32 %v2010_v35, %v5028_v39 }
 0x332   :  { %v5156_v60 = vpop.eup %2686  ;;  %v1394_v8 = vsel %vm1393_vm8, %v1356_v3, %v1392_v22  ;;  %v1402_v43 = vsel %vm1391_vm7, %v1363_v61, %v1401_v0  ;;  %v1366_v20 = vmul.f32 %v5796_v15, %v1334_v10  ;;  %v1993_v61 = vadd.f32 %v1992_v51, %v5021_v57 }
 0x333   :  { %v2689_v32 = vpop.eup %2688  ;;  %v1396_v31 = vsel %vm1395_vm9, %v1357_v16, %v1394_v8  ;;  %v1403_v2 = vsel %vm1393_vm8, %v1364_v55, %v1402_v43  ;;  %v2002_v10 = vadd.f32 %v2001_v40, %v5026_v54  ;;  %v2127_v52 = vrot.slane %v5088_v9, 2 }
 0x334   :  { %v2691_v4 = vpop.eup %2690  ;;  %v1398_v3 = vsel %vm1397_vm10, %v1358_v27, %v1396_v31  ;;  %v1404_v63 = vsel %vm1395_vm9, %v1365_v56, %v1403_v2  ;;  %2698 = vrcp.f32 %v5008_v62  ;;  %v2102_v39 = vrot.slane %v5092_v42, 1 }
 0x335   :  { %v2693_v28 = vpop.eup %2692  ;;  %v1405_v16 = vsel %vm1397_vm10, %v1366_v20, %v1404_v63  ;;  %v1408_v49 = vmul.f32 %v1398_v3, %v1367_v26  ;;  %v2111_v35 = vrot.slane %v5099_v45, 1  ;;  %2700 = vrcp.f32 %v5014_v41 }
 0x336   :  { %v2695_v17 = vpop.eup %2694  ;;  %v1409_v24 = vmul.f32 %v1405_v16, %v1368_v21  ;;  %v2012_v57 = vrot.slane %v2011_v38, 1  ;;  %v2064_v54 = vrot.slane %v5056_v44, 2  ;;  %v2073_v51 = vrot.slane %v5058_v37, 2 }
 0x337   :  { %v2697_v46 = vpop.eup %2696  ;;  %v2083_v62 = vadd.f32 %v2082_v58, %v5048_v19  ;;  %v2093_v40 = vrot.slane %v5082_v48, 1  ;;  %v2119_v36 = vadd.f32 %v2118_v14, %v5075_v5  ;;  %v1994_v55 = vrot.slane %v1993_v61, 1 }
 0x338   :  { %v2003_v22 = vrot.slane %v2002_v10, 1  ;;  %v2128_v41 = vadd.f32 %v2127_v52, %v5088_v9  ;;  %v1410_v0 = vsel %vm209_vm2, %v1408_v49, 0.0  ;;  %v2065_v13 = vadd.f32 %v2064_v54, %v5056_v44 }
 0x339   :  { %v2074_v6 = vadd.f32 %v2073_v51, %v5058_v37  ;;  %v2103_v27 = vadd.f32 %v2102_v39, %v5092_v42  ;;  %v2112_v19 = vadd.f32 %v2111_v35, %v5099_v45  ;;  %v1417_v58 = vsel %vm209_vm2, %v1409_v24, 0.0 }
 0x33a   :  { %v2084_v33 = vrot.slane %v2083_v62, 1  ;;  %v2013_v56 = vadd.f32 %v2012_v57, %v2011_v38  ;;  %v2048_v5 = vrot.slane %v5053_v30, 1  ;;  %v2066_v14 = vrot.slane %v2065_v13, 1 }
 0x33b   :  { %v2075_v26 = vrot.slane %v2074_v6, 1  ;;  %v1411_v8 = vrot.slane %v1410_v0, 4  ;;  %v1995_v9 = vadd.f32 %v1994_v55, %v1993_v61  ;;  %v2004_v43 = vadd.f32 %v2003_v22, %v2002_v10 }
 0x33c   :  { %v2057_v15 = vrot.slane %v5064_v50, 1  ;;  %v1418_v44 = vrot.slane %v1417_v58, 4  ;;  %v2067_v20 = vadd.f32 %v2066_v14, %v2065_v13  ;;  %v2120_v37 = vrot.slane %v2119_v36, 1 }
 0x33d   :  { %v2129_v21 = vrot.slane %v2128_v41, 1  ;;  %v2076_v42 = vadd.f32 %v2075_v26, %v2074_v6  ;;  %v2085_v31 = vadd.f32 %v2084_v33, %v2083_v62  ;;  %v2147_v45 = vmul.f32 %v5110_v34, %v1995_v9 }
 0x33e   :  { %v2148_v2 = vmul.f32 %v5115_v18, %v2004_v43  ;;  %v2022_v38 = vadd.f32 %v2021_v7, %v5030_v12  ;;  %v2049_v3 = vadd.f32 %v2048_v5, %v5053_v30  ;;  %v2149_v63 = vmul.f32 %v5121_v11, %v2013_v56 }
 0x33f   :  { %v2155_v61 = vmul.f32 %v5156_v60, %v2067_v20  ;;  %v2058_v10 = vadd.f32 %v2057_v15, %v5064_v50  ;;  %v2094_v52 = vadd.f32 %v2093_v40, %v5082_v48  ;;  %v2156_v16 = vmul.f32 %v2689_v32, %v2076_v42 }
 0x340   :  { %v2157_v49 = vmul.f32 %v2691_v4, %v2085_v31  ;;  %v1412_v39 = vadd.f32 %v1411_v8, %v1410_v0  ;;  %v1419_v34 = vadd.f32 %v1418_v44, %v1417_v58  ;;  %v2121_v35 = vadd.f32 %v2120_v37, %v2119_v36  ;;  %v2163_v36 = vld [vmem:[%s5260_s2 + $0x8] sm:$0xff] }
 0x341   :  { %v2130_v18 = vadd.f32 %v2129_v21, %v2128_v41  ;;  %v2699_v24 = vpop.eup %2698  ;;  %v2150_v57 = vmul.f32 %v5130_v59, %v2022_v38  ;;  %v2158_v12 = vmul.f32 %v2693_v28, %v2094_v52  ;;  %v2181_v7 = vsel %vm1385_vm4, %v2148_v2, %v2147_v45 }
 0x342   :  { %v2188_v30 = vsel %vm1385_vm4, %v2156_v16, %v2155_v61  ;;  %v2701_v11 = vpop.eup %2700  ;;  %v2151_v50 = vmul.f32 %v5135_v23, %v5051_v1  ;;  %v2159_v60 = vmul.f32 %v2695_v17, %v2103_v27  ;;  %v2182_v48 = vsel %vm1387_vm5, %v2149_v63, %v2181_v7  ;;  %v2303_v61 = vld [vmem:[%s5268_s10 + $0x8] sm:$0xff]  ;;  %v2429_v16 = vld [vmem:[%s5267_s9] ss:$0 sm:$0xff] }
 0x343   :  { %v2189_v32 = vsel %vm1387_vm5, %v2157_v49, %v2188_v30  ;;  %v2152_v4 = vmul.f32 %v5140_v25, %v5061_v53  ;;  %v2160_v54 = vmul.f32 %v2697_v46, %v2112_v19  ;;  %v2183_v59 = vsel %vm1389_vm6, %v2150_v57, %v2182_v48  ;;  %v2164_v53 = vld [vmem:[%s5260_s2 + $0x18] sm:$0xff]  ;;  %2494 = vmatpush3.msra.mxu1 %v2303_v61 }
 0x344   :  { %v2190_v28 = vsel %vm1389_vm6, %v2158_v12, %v2189_v32  ;;  %v2153_v51 = vmul.f32 %v5144_v47, %v2049_v3  ;;  %v2161_v62 = vmul.f32 %v2699_v24, %v2121_v35  ;;  %v2184_v40 = vsel %vm1391_vm7, %v2151_v50, %v2183_v59 }
 0x345   :  { %v2191_v1 = vsel %vm1391_vm7, %v2159_v60, %v2190_v28  ;;  %v2154_v23 = vmul.f32 %v5150_v29, %v2058_v10  ;;  %v2162_v17 = vmul.f32 %v2701_v11, %v2130_v18  ;;  %v2185_v25 = vsel %vm1393_vm8, %v2152_v4, %v2184_v40  ;;  %v2302_v10 = vld [vmem:[%s5268_s10] sm:$0xff] }
 0x346   :  { %v2192_v47 = vsel %vm1393_vm8, %v2160_v54, %v2191_v1  ;;  %v2186_v46 = vsel %vm1395_vm9, %v2153_v51, %v2185_v25  ;;  %v1413_v22 = vrot.slane %v1412_v39, 2  ;;  %v1420_v41 = vrot.slane %v1419_v34, 2  ;;  %v2431_v18 = vld [vmem:[#allocation2] ss:$0 sm:$0xff] }
 0x347   :  { %v2193_v55 = vsel %vm1395_vm9, %v2161_v62, %v2192_v47  ;;  %v2187_v29 = vsel %vm1397_vm10, %v2154_v23, %v2186_v46  ;;  %v5797_v52 = vmov 0.0  }
 0x348   :  { %v2194_v0 = vsel %vm1397_vm10, %v2162_v17, %v2193_v55  ;;  %v2197_v13 = vmul.f32 %v2187_v29, %v2163_v36  ;;  %v1414_v58 = vadd.f32 %v1413_v22, %v1412_v39  ;;  %v1421_v33 = vadd.f32 %v1420_v41, %v1419_v34  ;;  %2495 = vmatprep.subr.mxu1 %v5797_v52 }
 0x349   :  { %v2198_v6 = vmul.f32 %v2194_v0, %v2164_v53  ;;  %2496 = vmatpush3.msra.mxu1 %v2302_v10 }
 0x34a   :  { %v2199_v27 = vsel %vm209_vm2, %v2197_v13, 0.0  ;;  %v1415_v8 = vrot.slane %v1414_v58, 1  ;;  %v1422_v9 = vrot.slane %v1421_v33, 1 }
 0x34b   :  { %v2206_v19 = vsel %vm209_vm2, %v2198_v6, 0.0  ;;  %v2200_v56 = vrot.slane %v2199_v27, 4 }
 0x34c   :  { %v2207_v5 = vrot.slane %v2206_v19, 4  ;;  %v1416_v37 = vadd.f32 %v1415_v8, %v1414_v58  ;;  %v1423_v21 = vadd.f32 %v1422_v9, %v1421_v33 }
 0x34d   :  { %v2201_v14 = vadd.f32 %v2200_v56, %v2199_v27 }
 0x34e   :  { %v2208_v26 = vadd.f32 %v2207_v5, %v2206_v19 }
 0x34f   :  { %v2202_v43 = vrot.slane %v2201_v14, 2 }
 0x350   :  { %v2209_v15 = vrot.slane %v2208_v26, 2 }
 0x351   :  { %v2203_v44 = vadd.f32 %v2202_v43, %v2201_v14 }
 0x352   :  { %v2210_v20 = vadd.f32 %v2209_v15, %v2208_v26 }
 0x353   :  { %v2204_v42 = vrot.slane %v2203_v44, 1 }
 0x354   :  { %v2211_v31 = vrot.slane %v2210_v20, 1 }
 0x355   :  { %v2205_v45 = vadd.f32 %v2204_v42, %v2203_v44 }
 0x356   :  { %v2212_v2 = vadd.f32 %v2211_v31, %v2210_v20 }
 0x357   :  { %v2213_v38 = vadd.f32 %v2205_v45, %v1416_v37 }
 0x358   :  { %v2214_v3 = vadd.f32 %v2212_v2, %v1423_v21 }
 0x35a   :  { %v2228_v63 = vsel %vm1385_vm4, %v2214_v3, %v2213_v38 }
 0x35b   :  { %2487 = vmatmul.mubr.msk.f32.vlgmr.msra.gmra.mxu0 %vm209_vm2, %v2228_v63 }
 0x41b   :  { %v2297_v49 = vpop.f32.mrf.mxu0 }
 0x41c   :  { %v2298_v39 = vadd.f32 %v2429_v16, %v2297_v49 }
 0x41d   :  { %v2488_v34 = vpop.f32.mrf.mxu0 }
 0x41e   :  { %v2301_v35 = vmax.f32 %v2298_v39, 0.0 }
 0x420   :  { %2498 = vmatmul.mubr.msk.f32.vlgmr.msra.gmra.mxu1 %vm209_vm2, %v2301_v35 }
 0x4e0   :  { %v2382_v24 = vpop.f32.mrf.mxu1 }
 0x4e1   :  { %v2383_v57 = vadd.f32 %v2431_v18, %v2382_v24 }
 0x4e2   :  { %v2499_v12 = vpop.f32.mrf.mxu1 }
 0x4e3   :  { %2387 = vst.msk [vmem:[%s5270_s12] sm:$0x3] %vm2386_vm11, %v2383_v57 }
 0x4e4   :  { %2392 = vsyncpa [#allocation4], 1 }
 0x4e5   :  { %2393 = vsyncpa [#allocation6], 1 }

</bundles_post_ra>
